<compile_context>
chip_gen: v7x
topology: tpu7x:2x2x1
jax: 0.10.0
libtpu: 0.0.40
codegen_flags: <defaults>
</compile_context>

<pallas_src>
import jax
import jax.numpy as jnp
import numpy as np
from jax import lax
from jax.experimental import pallas as pl
from jax.experimental.pallas import tpu as pltpu

FC_IN, FC_HID, FC_OUT = 1024, 512, 256

# 128-multiples keep the MXU fed on v5e (4x128x128) and are fine on v6e/v7x.
TILE_M = 128
TILE_N = 128


def _round_up(x, m):
    return (x + m - 1) // m * m


def _vmem_limit_bytes(resident, tiles, headroom=8 << 20):
    """Computed VMEM budget: resident operands + double-buffered tiles + slack.

    Clamped to [16 MiB, 48 MiB]: at/above v5e's 16 MiB default scoped limit and
    comfortably below v7x's 64 MiB physical VMEM per TensorCore.
    """
    need = resident + 2 * tiles + headroom
    return int(min(max(need, 16 << 20), 48 << 20))


# ----------------------------------------------------------------------------
# Phase 1: deep-kernel features  z = (fc(x)) / lengthscale   (row-tiled)
# ----------------------------------------------------------------------------
def _feature_kernel(x_ref, w1_ref, b1_ref, mask_ref, w2_ref, b2_ref,
                    alpha_ref, z_ref):
    # Linear(1024 -> 512): bf16 operands on the MXU, f32 accumulation.
    h = jnp.dot(x_ref[...], w1_ref[...], preferred_element_type=jnp.float32)
    h = h + b1_ref[...]
    # PReLU + dropout stay in f32 on the VPU.
    alpha = alpha_ref[0]
    h = jnp.where(h > 0.0, h, alpha * h)
    h = h * mask_ref[...]                     # pre-scaled keep mask (1/0.9 or 0)
    # Linear(512 -> 256), with 1/lengthscale pre-folded into W2/b2.
    z = jnp.dot(h.astype(jnp.bfloat16), w2_ref[...],
                preferred_element_type=jnp.float32)
    z = z + b2_ref[...]
    z_ref[...] = z.astype(jnp.bfloat16)


# ----------------------------------------------------------------------------
# Phase 2: ARD-RBF covariance, tiled over (row-tile, col-tile)
# ----------------------------------------------------------------------------
def _rbf_cov_kernel(zi_ref, zj_ref, ai_ref, aj_ref, scale_ref, cov_ref):
    # Gram tile on the MXU: bf16 operands, f32 accumulation.
    gram = lax.dot_general(zi_ref[...], zj_ref[...],
                           (((1,), (1,)), ((), ())),
                           preferred_element_type=jnp.float32)   # (TILE_M, TILE_N)
    # -0.5*d2 = gram + a_i + a_j  with  a = -0.5*||z||^2 ;  clamp to <= 0.
    e = jnp.minimum(gram + ai_ref[...] + aj_ref[...], 0.0)
    cov_ref[...] = scale_ref[0] * jnp.exp(e)


# ----------------------------------------------------------------------------
# Wrapper
# ----------------------------------------------------------------------------
def dkl_forward(features, target, params, *, train=True, dropout_mask=None):
    """Training-branch forward of DKLModel: returns (mean, covariance) of the
    prior MVN `logits = gp_model(fc(features))`.

    `target` only feeds gp_model.set_train_data and does not change the prior
    MVN returned on the training path, so it is accepted but unused.
    """
    del target
    n = features.shape[0]
    n_pad = _round_up(max(n, TILE_M), TILE_M)   # MXU-aligned row count

    # ---- host-side parameter prep -----------------------------------------
    invls = params["inv_lengthscale"].reshape(1, FC_OUT).astype(jnp.float32)
    w1 = params["w1"].astype(jnp.bfloat16)                      # (1024, 512)
    b1 = params["b1"].reshape(1, FC_HID).astype(jnp.float32)
    # Fold 1/lengthscale into the second linear layer (removes an N x 256 VPU
    # multiply and one VMEM input inside the kernel).
    w2 = (params["w2"] * invls).astype(jnp.bfloat16)            # (512, 256)
    b2 = (params["b2"].reshape(1, FC_OUT) * invls).astype(jnp.float32)
    alpha = jnp.array([params["prelu_alpha"]], jnp.float32)
    outputscale = jnp.array([params["outputscale"]], jnp.float32)

    # ---- inputs: pad rows up to a 128-multiple -----------------------------
    x = jnp.pad(features.astype(jnp.float32), ((0, n_pad - n), (0, 0)))
    x = x.astype(jnp.bfloat16)
    if train:
        if dropout_mask is None:
            raise ValueError("train=True requires dropout_mask of shape (N, 512)")
        mask = dropout_mask.astype(jnp.float32)
    else:
        # TODO(synk): eval branch also applies the Gaussian likelihood and
        # exact-GP posterior conditioning; only the prior MVN is computed here.
        mask = jnp.ones((n, FC_HID), jnp.float32)
    mask = jnp.pad(mask, ((0, n_pad - n), (0, 0)))

    smem = pl.BlockSpec(memory_space=pltpu.MemorySpace.SMEM)

    # ---- phase 1: features -------------------------------------------------
    gm = n_pad // TILE_M
    feat_tiles = (TILE_M * FC_IN * 2 + TILE_M * FC_HID * 4 + TILE_M * FC_OUT * 2)
    feat_resident = (FC_IN * FC_HID * 2 + FC_HID * FC_OUT * 2
                     + (FC_HID + FC_OUT) * 4)
    z = pl.pallas_call(
        _feature_kernel,
        grid=(gm,),
        in_specs=[
            pl.BlockSpec((TILE_M, FC_IN), lambda i: (i, 0)),    # x row tile
            pl.BlockSpec((FC_IN, FC_HID), lambda i: (0, 0)),    # W1 (resident)
            pl.BlockSpec((1, FC_HID), lambda i: (0, 0)),        # b1
            pl.BlockSpec((TILE_M, FC_HID), lambda i: (i, 0)),   # dropout mask
            pl.BlockSpec((FC_HID, FC_OUT), lambda i: (0, 0)),   # W2 (resident)
            pl.BlockSpec((1, FC_OUT), lambda i: (0, 0)),        # b2
            smem,                                               # PReLU alpha
        ],
        out_specs=pl.BlockSpec((TILE_M, FC_OUT), lambda i: (i, 0)),
        out_shape=jax.ShapeDtypeStruct((n_pad, FC_OUT), jnp.bfloat16),
        compiler_params=pltpu.CompilerParams(
            dimension_semantics=("parallel",),
            vmem_limit_bytes=_vmem_limit_bytes(feat_resident, feat_tiles)),
    )(x, w1, b1, mask, w2, b2, alpha)

    # ---- row norms, precomputed ONCE in both orientations ------------------
    # (avoids a per-covariance-tile (TILE,1) <-> (1,TILE) XLU transpose)
    zf = z.astype(jnp.float32)
    a = -0.5 * jnp.sum(zf * zf, axis=1)        # (n_pad,)
    a_col = a[:, None]                         # (n_pad, 1)
    a_row = a[None, :]                         # (1, n_pad)

    # ---- phase 2: covariance ------------------------------------------------
    gi, gj = n_pad // TILE_M, n_pad // TILE_N
    cov_tiles = (2 * TILE_M * FC_OUT * 2 + TILE_M * TILE_N * 4
                 + (TILE_M + TILE_N) * 4)
    cov = pl.pallas_call(
        _rbf_cov_kernel,
        grid=(gi, gj),
        in_specs=[
            pl.BlockSpec((TILE_M, FC_OUT), lambda i, j: (i, 0)),   # z_i tile
            pl.BlockSpec((TILE_N, FC_OUT), lambda i, j: (j, 0)),   # z_j tile
            pl.BlockSpec((TILE_M, 1), lambda i, j: (i, 0)),        # a_i (column)
            pl.BlockSpec((1, TILE_N), lambda i, j: (0, j)),        # a_j (row)
            smem,                                                  # outputscale
        ],
        out_specs=pl.BlockSpec((TILE_M, TILE_N), lambda i, j: (i, j)),
        out_shape=jax.ShapeDtypeStruct((n_pad, n_pad), jnp.float32),
        compiler_params=pltpu.CompilerParams(
            dimension_semantics=("parallel", "parallel"),
            vmem_limit_bytes=_vmem_limit_bytes(0, cov_tiles)),
    )(z, z, a_col, a_row, outputscale)

    # Constant mean is produced here instead of as a lane-width-1 kernel output.
    mean = jnp.full((n,), params["mean_const"], jnp.float32)
    # NOTE: the covariance phase is writeback/HBM-bound, so a triangular
    # (symmetry-exploiting) grid + wrapper mirror would add more N^2 traffic
    # than it saves; the full tile grid is kept.
    # TODO(synk): downstream Cholesky should add a small diagonal jitter
    # (e.g. 1e-4 * outputscale) as gpytorch does at factorization time.
    return mean, cov[:n, :n]


# ----------------------------------------------------------------------------
# Pure-JAX f32 reference of the same forward (for the numeric check).
# ----------------------------------------------------------------------------
def dkl_reference(features, params, dropout_mask):
    x = features.astype(jnp.float32)
    h = x @ params["w1"] + params["b1"].reshape(1, FC_HID)
    h = jnp.where(h > 0.0, h, params["prelu_alpha"] * h)
    h = h * dropout_mask
    z = h @ params["w2"] + params["b2"].reshape(1, FC_OUT)
    zs = z * params["inv_lengthscale"].reshape(1, FC_OUT)
    sq = jnp.sum(zs * zs, axis=1)
    d2 = jnp.maximum(sq[:, None] + sq[None, :] - 2.0 * (zs @ zs.T), 0.0)
    cov = params["outputscale"] * jnp.exp(-0.5 * d2)
    mean = jnp.full((features.shape[0],), params["mean_const"], jnp.float32)
    return mean, cov


# ----------------------------------------------------------------------------
# Deterministic parameter init (shapes from DKLModel.__init__, use_ard=True)
# ----------------------------------------------------------------------------
def init_params(key, *, lengthscale=16.0):
    """Weights stored (in_dim, out_dim) so the kernels compute x @ W directly.

    gpytorch's default raw-parameter init gives lengthscale = outputscale =
    softplus(0) = log 2; a larger lengthscale is used here so the example
    covariance has non-trivial off-diagonal mass for the numeric check.
    """
    k1, k2, k3, k4 = jax.random.split(key, 4)
    w1 = jax.random.normal(k1, (FC_IN, FC_HID), jnp.float32) / np.sqrt(FC_IN)
    b1 = 0.01 * jax.random.normal(k2, (1, FC_HID), jnp.float32)
    w2 = jax.random.normal(k3, (FC_HID, FC_OUT), jnp.float32) / np.sqrt(FC_HID)
    b2 = 0.01 * jax.random.normal(k4, (1, FC_OUT), jnp.float32)
    ls = jnp.full((1, FC_OUT), lengthscale, jnp.float32)   # ARD: one per z dim
    return {
        "w1": w1, "b1": b1, "w2": w2, "b2": b2,
        "prelu_alpha": 0.25,                   # nn.PReLU default init
        "inv_lengthscale": 1.0 / ls,
        "outputscale": float(np.log(2.0)),     # softplus(0), ScaleKernel default
        "mean_const": 0.0,                     # ConstantMean default
    }


if __name__ == "__main__":
    key = jax.random.PRNGKey(0)
    pkey, xkey, tkey, mkey = jax.random.split(key, 4)

    N = 200                      # pads to 256 -> 2 row tiles, 2x2 covariance grid
    features = jax.random.normal(xkey, (N, FC_IN), jnp.float32)
    target = jax.random.normal(tkey, (N,), jnp.float32)
    params = init_params(pkey)

    # Dropout keep-mask (p_drop = 0.1), pre-scaled by 1/0.9.
    # NOTE: a fresh mask (fresh key) must be drawn every training step.
    keep = jax.random.bernoulli(mkey, 0.9, (N, FC_HID))
    dropout_mask = keep.astype(jnp.float32) / 0.9

    mean, covar = dkl_forward(features, target, params, train=True,
                              dropout_mask=dropout_mask)
    jax.block_until_ready((mean, covar))

    assert mean.shape == (N,) and covar.shape == (N, N)
    assert bool(jnp.all(jnp.isfinite(mean))) and bool(jnp.all(jnp.isfinite(covar)))

    ref_mean, ref_cov = dkl_reference(features, params, dropout_mask)
    cov_err = float(jnp.max(jnp.abs(covar - ref_cov)))
    mean_err = float(jnp.max(jnp.abs(mean - ref_mean)))
    assert cov_err < 3e-2, f"covariance mismatch: max abs err = {cov_err}"
    assert mean_err < 1e-6, f"mean mismatch: max abs err = {mean_err}"
    print("KERNEL_OK")
</pallas_src>

<mosaic_0001>
module attributes {stable_mosaic.version = 11 : i64} {
  func.func @_feature_kernel(%arg0: i32, %arg1: memref<128x1024xbf16, #tpu.memory_space<vmem>>, %arg2: memref<1024x512xbf16, #tpu.memory_space<vmem>>, %arg3: memref<1x512xf32, #tpu.memory_space<vmem>>, %arg4: memref<128x512xf32, #tpu.memory_space<vmem>>, %arg5: memref<512x256xbf16, #tpu.memory_space<vmem>>, %arg6: memref<1x256xf32, #tpu.memory_space<vmem>>, %arg7: memref<1xf32, #tpu.memory_space<smem>>, %arg8: memref<128x256xbf16, #tpu.memory_space<vmem>>) attributes {dimension_semantics = [#tpu.dimension_semantics<parallel>], iteration_bounds = array<i64: 2>, scalar_prefetch = 0 : i64, scratch_operands = 0 : i64, tpu.core_type = #tpu.core_type<tc>, window_params = [{transform_indices = @transform_0, window_bounds = array<i64: 128, 1024>}, {pipeline_mode = #tpu.pipeline_mode<synchronous>, transform_indices = @transform_1, window_bounds = array<i64: 1024, 512>}, {pipeline_mode = #tpu.pipeline_mode<synchronous>, transform_indices = @transform_2, window_bounds = array<i64: 1, 512>}, {transform_indices = @transform_3, window_bounds = array<i64: 128, 512>}, {pipeline_mode = #tpu.pipeline_mode<synchronous>, transform_indices = @transform_4, window_bounds = array<i64: 512, 256>}, {pipeline_mode = #tpu.pipeline_mode<synchronous>, transform_indices = @transform_5, window_bounds = array<i64: 1, 256>}, {transform_indices = @transform_6, window_bounds = array<i64: 1>}, {transform_indices = @transform_7, window_bounds = array<i64: 128, 256>}]} {
    %c0 = arith.constant 0 : index
    %c0_0 = arith.constant 0 : index
    %0 = vector.load %arg1[%c0, %c0_0] : memref<128x1024xbf16, #tpu.memory_space<vmem>>, vector<128x1024xbf16>
    %c0_1 = arith.constant 0 : index
    %c0_2 = arith.constant 0 : index
    %1 = vector.load %arg2[%c0_1, %c0_2] : memref<1024x512xbf16, #tpu.memory_space<vmem>>, vector<1024x512xbf16>
    %cst = arith.constant dense<0.000000e+00> : vector<128x512xf32>
    %2 = tpu.matmul %0, %1, %cst {dimension_numbers = #tpu.dot_dimension_numbers<[1], [0], [0], [1], [0, 0, 1, 1], [], []>} : vector<128x1024xbf16>, vector<1024x512xbf16>, vector<128x512xf32> -> vector<128x512xf32>
    %c0_3 = arith.constant 0 : index
    %c0_4 = arith.constant 0 : index
    %3 = vector.load %arg3[%c0_3, %c0_4] : memref<1x512xf32, #tpu.memory_space<vmem>>, vector<1x512xf32>
    %4 = vector.broadcast %3 : vector<1x512xf32> to vector<128x512xf32>
    %5 = arith.addf %2, %4 : vector<128x512xf32>
    %c0_5 = arith.constant 0 : index
    %6 = memref.load %arg7[%c0_5] : memref<1xf32, #tpu.memory_space<smem>>
    %cst_6 = arith.constant 0.000000e+00 : f32
    %7 = vector.broadcast %cst_6 : f32 to vector<128x512xf32>
    %8 = arith.cmpf ogt, %5, %7 : vector<128x512xf32>
    %9 = vector.broadcast %6 : f32 to vector<128x512xf32>
    %10 = arith.mulf %9, %5 : vector<128x512xf32>
    %11 = arith.select %8, %5, %10 : vector<128x512xi1>, vector<128x512xf32>
    %c0_7 = arith.constant 0 : index
    %c0_8 = arith.constant 0 : index
    %12 = vector.load %arg4[%c0_7, %c0_8] : memref<128x512xf32, #tpu.memory_space<vmem>>, vector<128x512xf32>
    %13 = arith.mulf %11, %12 : vector<128x512xf32>
    %14 = arith.truncf %13 : vector<128x512xf32> to vector<128x512xbf16>
    %c0_9 = arith.constant 0 : index
    %c0_10 = arith.constant 0 : index
    %15 = vector.load %arg5[%c0_9, %c0_10] : memref<512x256xbf16, #tpu.memory_space<vmem>>, vector<512x256xbf16>
    %cst_11 = arith.constant dense<0.000000e+00> : vector<128x256xf32>
    %16 = tpu.matmul %14, %15, %cst_11 {dimension_numbers = #tpu.dot_dimension_numbers<[1], [0], [0], [1], [0, 0, 1, 1], [], []>} : vector<128x512xbf16>, vector<512x256xbf16>, vector<128x256xf32> -> vector<128x256xf32>
    %c0_12 = arith.constant 0 : index
    %c0_13 = arith.constant 0 : index
    %17 = vector.load %arg6[%c0_12, %c0_13] : memref<1x256xf32, #tpu.memory_space<vmem>>, vector<1x256xf32>
    %18 = vector.broadcast %17 : vector<1x256xf32> to vector<128x256xf32>
    %19 = arith.addf %16, %18 : vector<128x256xf32>
    %20 = arith.truncf %19 : vector<128x256xf32> to vector<128x256xbf16>
    %c0_14 = arith.constant 0 : index
    %c0_15 = arith.constant 0 : index
    %21 = vector.load %arg8[%c0_14, %c0_15] : memref<128x256xbf16, #tpu.memory_space<vmem>>, vector<128x256xbf16>
    tpu.vector_store %arg8[%c0_14, %c0_15], %20 {strides = array<i32>} : memref<128x256xbf16, #tpu.memory_space<vmem>>, vector<128x256xbf16>,
    return
  }
  func.func @transform_0(%arg0: i32) -> (i32, i32) {
    %c0_i32 = arith.constant 0 : i32
    %c0_i32_0 = arith.constant 0 : i32
    return %arg0, %c0_i32 : i32, i32
  }
  func.func @transform_1(%arg0: i32) -> (i32, i32) {
    %c0_i32 = arith.constant 0 : i32
    %c0_i32_0 = arith.constant 0 : i32
    %c0_i32_1 = arith.constant 0 : i32
    return %c0_i32, %c0_i32_0 : i32, i32
  }
  func.func @transform_2(%arg0: i32) -> (i32, i32) {
    %c0_i32 = arith.constant 0 : i32
    %c0_i32_0 = arith.constant 0 : i32
    %c0_i32_1 = arith.constant 0 : i32
    return %c0_i32, %c0_i32_0 : i32, i32
  }
  func.func @transform_3(%arg0: i32) -> (i32, i32) {
    %c0_i32 = arith.constant 0 : i32
    %c0_i32_0 = arith.constant 0 : i32
    return %arg0, %c0_i32 : i32, i32
  }
  func.func @transform_4(%arg0: i32) -> (i32, i32) {
    %c0_i32 = arith.constant 0 : i32
    %c0_i32_0 = arith.constant 0 : i32
    %c0_i32_1 = arith.constant 0 : i32
    return %c0_i32, %c0_i32_0 : i32, i32
  }
  func.func @transform_5(%arg0: i32) -> (i32, i32) {
    %c0_i32 = arith.constant 0 : i32
    %c0_i32_0 = arith.constant 0 : i32
    %c0_i32_1 = arith.constant 0 : i32
    return %c0_i32, %c0_i32_0 : i32, i32
  }
  func.func @transform_6(%arg0: i32) -> i32 {
    %c0_i32 = arith.constant 0 : i32
    %c0_i32_0 = arith.constant 0 : i32
    return %c0_i32 : i32
  }
  func.func @transform_7(%arg0: i32) -> (i32, i32) {
    %c0_i32 = arith.constant 0 : i32
    %c0_i32_0 = arith.constant 0 : i32
    return %arg0, %c0_i32 : i32, i32
  }
}

</mosaic_0001>

<bundles_post_ra>
// kernel: tpu_custom_call.1
= control target key start
LH: loop header
LB: loop body
LE: loop exit
PB: predicated region body
PF: predicated region fallthrough
CT: control target
= control target key end

     0   :  { %s6994_s0 = inlined_call_operand.hbm [shape: bf16[256,1024], index: 0, kind: input, shape index: {}]   ;;  %s6995_s1 = inlined_call_operand.hbm [shape: bf16[1024,512], index: 1, kind: input, shape index: {}]   ;;  %s6996_s2 = inlined_call_operand.vmem [shape: f32[1,512], index: 2, kind: input, shape index: {}]   ;;  %s6997_s3 = inlined_call_operand.hbm [shape: f32[256,512], index: 3, kind: input, shape index: {}]   ;;  %s6998_s4 = inlined_call_operand.hbm [shape: bf16[512,256], index: 4, kind: input, shape index: {}]   ;;  %s6999_s5 = inlined_call_operand.vmem [shape: f32[1,256], index: 5, kind: input, shape index: {}]   ;;  %s7000_s6 = inlined_call_operand.<no memory space> [shape: f32[1], index: 6, kind: input, shape index: {}]   ;;  %s7001_s7 = inlined_call_operand.hbm [shape: bf16[256,256], index: 7, kind: output, shape index: {}]  }
   0x1   :  { %7017 = sst [smem:[#allocation21_spill]] %s6994_s0 }
   0x2   :  { %7018 = sst [smem:[#allocation22_spill]] %s6995_s1 }
   0x3   :  { %7019 = sst [smem:[#allocation23_spill]] %s7001_s7 }
   0x4   :  { %12 = sst [smem:[#allocation2]] %s7000_s6 }
   0x5   :  { %13 = vsyncpa [#allocation4], 0 }
   0x6   :  { %15 = vsyncpa [#allocation4 + $0x1], 0 }
   0x7   :  { %16 = vsyncpa [#allocation7], 0 }
   0x8   :  { %17 = vsyncpa [#allocation5], 0 }
   0x9   :  { %19 = vsyncpa [#allocation5 + $0x1], 0  ;;  %s6009_s26 = smov 0   ;;  %s6011_s27 = smov 0  }
   0xa   :  { %s6013_s28 = smov 0   ;;  %s6015_s29 = smov 0  }
   0xb LB: > { %7020 = sst [smem:[#allocation16_spill]] %s5939_s26  ;;  %s6030_s6 = sadd.s32 4294967295, %s5951_s29   ;;  %s5951_s29 = sphi %s6015_s29, %s7052_s29   ;;  %s5947_s28 = sphi %s6013_s28, %s7054_s28   ;;  %s5943_s27 = sphi %s6011_s27, %s7056_s27   ;;  %s5939_s26 = sphi %s6009_s26, %s7055_s26  }
   0xc   : > { %7021 = sst [smem:[#allocation17_spill]] %s5947_s28  ;;  %s4430_s30 = sadd.s32 4294967294, %s5951_s29  }
   0xd   : > { %p45_p0 = scmp.ne.s32.totalorder %s5943_s27, %s5939_s26  ;;  %p7002_p1 = scmp.eq.s32.totalorder %s6030_s6, 0 }
   0xe   : > { %p206_p3 = scmp.eq.s32.totalorder %s4430_s30, 1  ;;  %p4431_p5 = scmp.ge.s32.totalorder %s5951_s29, 1 }
   0xf   : > { %p6039_p4 = por %p7002_p1, %p45_p0  ;;  %p213_p7 = scmp.lt.s32.totalorder %s5951_s29, 3 }
  0x10   : > { %p6044_p6 = por %p206_p3, %p45_p0  ;;  %s5953_s11 = smov [#allocation6]  }
  0x11   : > { %s7022_s8 = scalar_select %p6039_p4, 1, 0 }
  0x12   : > { %s7023_s9 = scalar_select %p6044_p6, 1, 0 }
  0x13   : > { %p6049_p8 = pnand %p4431_p5, %p213_p7  ;;  %s225_s12 = sshll.u32 %s5953_s11, 4  ;;  %s6053_s12 = int_to_ptr.vmem [resolvable:$true] %s225_s12 }
  0x14   : > { %7024 = sst [smem:[#allocation18_spill]] %s7023_s9  ;;  %s6065_s14 = sadd.s32 1, %s5951_s29  }
  0x15   : > { %s7025_s10 = scalar_select %p6049_p8, 1, 0 }
  0x16   : > { %p5211_p9 = pneg %p6049_p8  ;;  %7027 = sst [smem:[#allocation19_spill]] %s6065_s14 }
  0x17   : > { %s32_s15 = sadd.s32 1, %s5947_s28  ;;  %s29_s16 = ssub.s32 %s5951_s29, %s6065_s14 }
  0x18   : > { %p6060_p11 = pnand %p5211_p9, %p7002_p1  ;;  %s7028_s1 = sld [smem:[#allocation22_spill]] }
  0x1a   : > { %p7004_p13 = pneg %p6060_p11 }
  0x1e   : > { %s5757_s19 = scalar_lea.hbm %s7028_s1, 32768 }
  0x1f   : > { %p5758_p12 = scmp.ne.s32.totalorder %s7028_s1, %s5757_s19  ;;  %p5764_p5 = scmp.lt.u32.totalorder %s5757_s19, %s7028_s1 }
  0x21   : > { %p5760_p0 = pnand %p7004_p13, %p5758_p12 }
  0x23   : > { %p5761_p3 = pneg %p5760_p0 }
  0x25   : > { %p5766_p7 = pnand %p5764_p5, %p5761_p3 }
  0x27   : > { %5769 = shalt.err (!%p5766_p7)
}
  0x28   : > { %s5770_s24 = scalar_lea.vmem %s6053_s12, 32768  ;;  %p5778_p2 = scmp.lt.s32.totalorder %s6053_s12, %s6053_s12 }
  0x29   : > { %p5771_p9 = scmp.ne.s32.totalorder %s6053_s12, %s5770_s24  ;;  %p5779_p12 = scmp.lt.s32.totalorder %s5770_s24, %s5770_s24 }
  0x2b   : > { %p5773_p10 = pnand %p5771_p9, %p7004_p13  ;;  %p5780_p0 = por %p5779_p12, %p5778_p2 }
  0x2d   : > { %p5774_p1 = pneg %p5773_p10 }
  0x2f   : > { %p5781_p6 = pnand %p5780_p0, %p5774_p1 }
  0x31   : > { %5784 = shalt.err (!%p5781_p6)
}
  0x32   : > { %s5954_s25 = smov 256   ;;  %s5955_s30 = smov 16  }
  0x33   : > { %5214 = dma.hbm_to_vmem [thread:$0]  (!%p6060_p11), %s7028_s1, 32768, %s6053_s12, [#allocation7], %s5954_s25, %s5954_s25, %s5955_s30  }
  0x34   : > { %p30_p1 = scmp.eq.s32.totalorder %s29_s16, 0  ;;  %p39_p2 = scmp.ne.s32.totalorder %s5947_s28, %s5943_s27 }
  0x35   : > { %p40_p6 = scmp.eq.s32.totalorder %s5951_s29, 0  ;;  %p5231_p10 = scmp.lt.s32.totalorder %s5951_s29, 2 }
  0x36   : > { %s6102_s18 = scalar_select %p30_p1, %s5947_s28, %s32_s15  }
  0x37   : > { %p41_p3 = por %p40_p6, %p39_p2  ;;  %p7030_p5 = scmp.eq.s32.totalorder %s6030_s6, 1 }
  0x38   : > { %7029 = sst [smem:[#allocation20_spill]] %s6102_s18  ;;  %s261_s20 = sand.u32 1, %s5951_s29  }
  0x39   : > { %p6106_p7 = por %p7030_p5, %p39_p2  ;;  %s263_s21 = sand.u32 1, %s5947_s28  }
  0x3a   : > { %s6112_s22 = sshll.u32 %s263_s21, 9  ;;  %s7003_s23 = sshll.u32 %s5951_s29, 13 }
  0x3b   : > { %s7031_s19 = scalar_select %p6106_p7, 1, 0 }
  0x3c   : > { %s7032_s0 = sld [smem:[#allocation21_spill]]  ;;  %s265_s15 = scalar_lea.vmem [#allocation3], %s6112_s22 }
  0x3d   : > { %s273_s25 = sshll.u32 %s265_s15, 4  ;;  %p6125_p9 = pnand %p5231_p10, %p41_p3  ;;  %s6123_s25 = int_to_ptr.vmem [resolvable:$true] %s273_s25 }
  0x3e   : > { %s6129_s11 = scalar_lea.sflag [#allocation4], %s261_s20 }
  0x3f   : > { %s7033_s30 = scalar_select %p6125_p9, 1, 0 }
  0x40   : > { %p7014_p0 = pneg %p6125_p9 }
  0x42   : > { %s6120_s24 = scalar_lea.hbm %s7032_s0, %s7003_s23  ;;  %s5790_s16 = scalar_lea.hbm %s7032_s0, 16384 }
  0x43   : > { %s5785_s17 = scalar_lea.hbm %s6120_s24, 8192  ;;  %p5791_p6 = scmp.lt.u32.totalorder %s6120_s24, %s7032_s0 }
  0x44   : > { %p5786_p12 = scmp.ne.s32.totalorder %s6120_s24, %s5785_s17  ;;  %p5792_p10 = scmp.lt.u32.totalorder %s5790_s16, %s5785_s17 }
  0x45   : > { %p5794_p5 = scmp.lt.u32.totalorder %s5785_s17, %s6120_s24 }
  0x46   : > { %p5788_p1 = pnand %p7014_p0, %p5786_p12  ;;  %p5793_p3 = por %p5792_p10, %p5791_p6 }
  0x48   : > { %p5789_p2 = pneg %p5788_p1  ;;  %p5795_p13 = por %p5794_p5, %p5793_p3 }
  0x4a   : > { %p5796_p7 = pnand %p5795_p13, %p5789_p2 }
  0x4c   : > { %5799 = shalt.err (!%p5796_p7)
}
  0x4d   : > { %s5800_s20 = scalar_lea.vmem %s6123_s25, 8192  ;;  %s5956_s21 = smov [#allocation3]  }
  0x4e   : > { %p5801_p12 = scmp.ne.s32.totalorder %s6123_s25, %s5800_s20  ;;  %s5805_s12 = sshll.u32 %s5956_s21, 4  ;;  %s5806_s12 = int_to_ptr.vmem [resolvable:$false] %s5805_s12 }
  0x4f   : > { %s5807_s23 = scalar_lea.vmem %s5806_s12, 16384  ;;  %p5808_p8 = scmp.lt.s32.totalorder %s6123_s25, %s5806_s12 }
  0x50   : > { %p5803_p1 = pnand %p5801_p12, %p7014_p0  ;;  %p5809_p6 = scmp.lt.s32.totalorder %s5807_s23, %s5800_s20 }
  0x52   : > { %p5804_p4 = pneg %p5803_p1  ;;  %p5810_p10 = por %p5809_p6, %p5808_p8 }
  0x54   : > { %p5811_p3 = pnand %p5810_p10, %p5804_p4 }
  0x56   : > { %5814 = shalt.err (!%p5811_p3)
}
  0x57   : > { %s5957_s17 = smov 512   ;;  %s5958_s16 = smov 32  }
  0x58   : > { %5221 = dma.hbm_to_vmem [thread:$0]  (!%p6125_p9), %s6120_s24, 8192, %s6123_s25, %s6129_s11, %s5957_s17, %s5957_s17, %s5958_s16  }
  0x59   : > { %s7034_s15 = sshll.u32 %s5951_s29, 13  ;;  %s287_s23 = scalar_lea.vmem [#allocation8], %s6112_s22 }
  0x5a   : > { %s6165_s12 = scalar_lea.hbm %s6997_s3, %s7034_s15  ;;  %s295_s0 = sshll.u32 %s287_s23, 4  ;;  %s6168_s0 = int_to_ptr.vmem [resolvable:$true] %s295_s0 }
  0x5b   : > { %s5959_s1 = smov [#allocation9]   ;;  %s5815_s9 = scalar_lea.hbm %s6998_s4, 8192 }
  0x5c   : > { %s241_s18 = sshll.u32 %s5959_s1, 4  ;;  %p5816_p4 = scmp.ne.s32.totalorder %s6998_s4, %s5815_s9  ;;  %s242_s18 = int_to_ptr.vmem [resolvable:$true] %s241_s18 }
  0x5d   : > { %p7035_p8 = pneg %p6060_p11  ;;  %p5822_p2 = scmp.lt.u32.totalorder %s5815_s9, %s6998_s4 }
  0x5f   : > { %p5818_p13 = pnand %p5816_p4, %p7035_p8 }
  0x61   : > { %p5819_p7 = pneg %p5818_p13 }
  0x63   : > { %p5824_p5 = pnand %p5822_p2, %p5819_p7 }
  0x65   : > { %5827 = shalt.err (!%p5824_p5)
}
  0x66   : > { %s5828_s1 = scalar_lea.vmem %s242_s18, 8192  ;;  %p7036_p1 = pmov %p7035_p8 }
  0x67   : > { %p5829_p12 = scmp.ne.s32.totalorder %s242_s18, %s5828_s1  ;;  %p5836_p3 = scmp.lt.s32.totalorder %s242_s18, %s242_s18 }
  0x68   : > { %p5837_p0 = scmp.lt.s32.totalorder %s5828_s1, %s5828_s1 }
  0x69   : > { %p5831_p6 = pnand %p5829_p12, %p7036_p1 }
  0x6a   : > { %p5838_p9 = por %p5837_p0, %p5836_p3 }
  0x6b   : > { %p5832_p10 = pneg %p5831_p6 }
  0x6d   : > { %p5839_p4 = pnand %p5838_p9, %p5832_p10 }
  0x6f   : > { %5842 = shalt.err (!%p5839_p4)
}
  0x70   : > { %s5960_s7 = smov 128   ;;  %s5961_s26 = smov 8  }
  0x71   : > { %5217 = dma.hbm_to_vmem [thread:$0]  (!%p6060_p11), %s6998_s4, 8192, %s242_s18, [#allocation7], %s5960_s7, %s5960_s7, %s5961_s26  }
  0x72   : > { %s5843_s14 = scalar_lea.hbm %s6165_s12, 8192  ;;  %p7037_p13 = scmp.ne.s32.totalorder %s7033_s30, 0 }
  0x73   : > { %p5844_p8 = scmp.ne.s32.totalorder %s6165_s12, %s5843_s14  ;;  %s5848_s21 = scalar_lea.hbm %s6997_s3, 16384 }
  0x74   : > { %p7038_p7 = pneg %p7037_p13  ;;  %p5849_p2 = scmp.lt.u32.totalorder %s6165_s12, %s6997_s3 }
  0x75   : > { %p5850_p5 = scmp.lt.u32.totalorder %s5848_s21, %s5843_s14  ;;  %p5852_p1 = scmp.lt.u32.totalorder %s5843_s14, %s6165_s12 }
  0x76   : > { %p5846_p0 = pnand %p5844_p8, %p7038_p7 }
  0x77   : > { %p5851_p12 = por %p5850_p5, %p5849_p2 }
  0x78   : > { %p5847_p9 = pneg %p5846_p0 }
  0x79   : > { %p5853_p6 = por %p5852_p1, %p5851_p12 }
  0x7b   : > { %p5854_p10 = pnand %p5853_p6, %p5847_p9 }
  0x7d   : > { %5857 = shalt.err (!%p5854_p10)
}
  0x7e   : > { %s5858_s13 = scalar_lea.vmem %s6168_s0, 8192  ;;  %p7039_p3 = pmov %p7038_p7 }
  0x7f   : > { %p5859_p11 = scmp.ne.s32.totalorder %s6168_s0, %s5858_s13  ;;  %s5962_s18 = smov [#allocation8]  }
  0x80   : > { %s5863_s24 = sshll.u32 %s5962_s18, 4  ;;  %s5864_s24 = int_to_ptr.vmem [resolvable:$false] %s5863_s24 }
  0x81   : > { %p5861_p4 = pnand %p5859_p11, %p7039_p3  ;;  %s5865_s22 = scalar_lea.vmem %s5864_s24, 16384 }
  0x82   : > { %p5866_p7 = scmp.lt.s32.totalorder %s6168_s0, %s5864_s24  ;;  %p5867_p0 = scmp.lt.s32.totalorder %s5865_s22, %s5858_s13 }
  0x83   : > { %p5862_p8 = pneg %p5861_p4 }
  0x84   : > { %p5868_p2 = por %p5867_p0, %p5866_p7 }
  0x86   : > { %p5869_p5 = pnand %p5868_p2, %p5862_p8 }
  0x88   : > { %5872 = shalt.err (!%p5869_p5)
}
  0x89   : > { %5224 = dma.hbm_to_vmem [thread:$0]  (!%p7037_p13), %s6165_s12, 8192, %s6168_s0, %s6129_s11, %s5957_s17, %s5957_s17, %s5958_s16  }
  0x8a   : > { %p7040_p9 = scmp.ne.s32.totalorder %s7025_s10, 0 }
  0x8b   : > { %s309_s1 = sand.u32 (!%p7040_p9), 1, %s6030_s6   ;;  %s6221_s7 = sand.u32 (!%p7040_p9), 1, %s5943_s27  }
  0x8c   : > { %307 = sbr.rel (%p7040_p9) target bundleno = 993 (0x3e1), region = 48  ;;  %s4444_s26 = sshll.u32 (!%p7040_p9), %s6221_s7, 9 }
  0x8d   : > { %s310_s28 = scalar_lea.sflag (!%p7040_p9), [#allocation4], %s309_s1  ;;  %s6224_s30 = scalar_lea.vmem (!%p7040_p9), [#allocation3], %s4444_s26 }
  0x8e   : > { %p7041_p12 = scmp.ne.s32.totalorder (!%p7040_p9), %s7022_s8, 0 }
  0x93   : > { %5918 = dma.done.wait (%p7041_p12), %s310_s28, 8192  }
  0x94   : > { %5920 = vsyncadd (%p7041_p12), %s310_s28, 4294959104  ;;  %p7042_p13 = scmp.eq.s32.totalorder %s6030_s6, 0 }
  0x96   : > { %5922 = dma.done.wait (%p7042_p13), [#allocation7], 32768   ;;  %p7043_p1 = pmov %p7042_p13 }
  0x97   : > { %s6234_s0 = scalar_lea.vmem [#allocation8], %s4444_s26 }
  0x98   : > { %5924 = vsyncadd (%p7043_p1), [#allocation7], 4294934528 }
  0x99   : > { %5926 = dma.done.wait (%p7041_p12), %s310_s28, 8192  }
  0x9a   : > { %5928 = vsyncadd (%p7041_p12), %s310_s28, 4294959104  ;;  %p7044_p6 = pmov %p7043_p1 }
  0x9b   : > { %p7045_p10 = pmov %p7043_p1 }
  0x9c   : > { %5930 = dma.done.wait (%p7044_p6), [#allocation7], 8192  }
  0x9d   : > { %5932 = vsyncadd (%p7045_p10), [#allocation7], 4294959104  ;;  %v5277_v0 = vld [vmem:[#allocation6 + $0x4] ss:$16 sps:$4 sm:$0xff]   ;;  %v5281_v2 = vld [vmem:[#allocation6] ss:$16 sps:$4 sm:$0xff]  }
  0x9e   : > { %v5279_v1 = vld [vmem:[#allocation6 + $0x204] ss:$16 sps:$4 sm:$0xff]   ;;  %2311 = vmatprep.subr.bf16.mxu1 %v5277_v0  ;;  %v5282_v3 = vld [vmem:[#allocation6 + $0x200] ss:$16 sps:$4 sm:$0xff]   ;;  %v370_v50 = vld [vmem:[%s6224_s30 + $0x8] sm:$0xff]  ;;  %s3215_s11 = sld [smem:[#allocation2]] }
  0x9f   : > { %2424 = vmatprep.subr.bf16.mxu0 %v5279_v1  ;;  %v5283_v4 = vld [vmem:[#allocation6 + $0x24] ss:$16 sps:$4 sm:$0xff]   ;;  %2312 = vmatpush1.bf16.msra.mxu1 %v5281_v2  ;;  %v5287_v6 = vld [vmem:[#allocation6 + $0x20] ss:$16 sps:$4 sm:$0xff]   ;;  %v374_v51 = vld [vmem:[%s6224_s30 + $0x28] sm:$0xff]  ;;  %s4448_s12 = sshll.u32 %s6221_s7, 7 }
  0xa0   : > { %2425 = vmatpush1.bf16.msra.mxu0 %v5282_v3  ;;  %v5285_v5 = vld [vmem:[#allocation6 + $0x224] ss:$16 sps:$4 sm:$0xff]   ;;  %2313 = vmatprep.subr.bf16.mxu1 %v5283_v4  ;;  %v5288_v7 = vld [vmem:[#allocation6 + $0x220] ss:$16 sps:$4 sm:$0xff]   ;;  %v6250_v55 = vcombine.high %v370_v50, %v374_v51  ;;  %s6897_s9 = scalar_lea.vmem [#allocation10], %s4448_s12  ;;  %s4876_s14 = sshll.u32 %s6030_s6, 11 }
  0xa1   : > { %2426 = vmatprep.subr.bf16.mxu0 %v5285_v5  ;;  %v5289_v8 = vld [vmem:[#allocation6 + $0x44] ss:$16 sps:$4 sm:$0xff]   ;;  %v5293_v10 = vld [vmem:[#allocation6 + $0x40] ss:$16 sps:$4 sm:$0xff]   ;;  %s4318_s25 = sshll.u32 %s6897_s9, 4  ;;  %s7046_s20 = sld [smem:[#allocation23_spill]]  ;;  %s6948_s25 = int_to_ptr.vmem [resolvable:$true] %s4318_s25 }
  0xa2   : > { %v5291_v9 = vld [vmem:[#allocation6 + $0x244] ss:$16 sps:$4 sm:$0xff]   ;;  %v5294_v11 = vld [vmem:[#allocation6 + $0x240] ss:$16 sps:$4 sm:$0xff]   ;;  %2456 = vmatprep.mubr.bf16.mxu0 %v6250_v55  ;;  %s4304_s6 = scalar_lea.sflag [#allocation5], %s6221_s7  ;;  %s5873_s13 = scalar_lea.vmem %s6948_s25, 2048 }
  0xa3   : > { %2314 = vmatpush1.bf16.msra.mxu1 %v5287_v6  ;;  %v5295_v12 = vld [vmem:[#allocation6 + $0x64] ss:$16 sps:$4 sm:$0xff]   ;;  %v5299_v14 = vld [vmem:[#allocation6 + $0x60] ss:$16 sps:$4 sm:$0xff]   ;;  %p5874_p11 = scmp.ne.s32.totalorder %s6948_s25, %s5873_s13  ;;  %p7047_p3 = scmp.ne.s32.totalorder %s7031_s19, 0 }
  0xa4   : > { %2427 = vmatpush1.bf16.msra.mxu0 %v5288_v7  ;;  %2315 = vmatprep.subr.bf16.mxu1 %v5289_v8  ;;  %v5297_v13 = vld [vmem:[#allocation6 + $0x264] ss:$16 sps:$4 sm:$0xff]   ;;  %v5300_v15 = vld [vmem:[#allocation6 + $0x260] ss:$16 sps:$4 sm:$0xff]   ;;  %v5378_v7 = vld [vmem:[#allocation6 + $0xc] ss:$16 sps:$4 sm:$0xff]  }
  0xa5   : > { %2428 = vmatprep.subr.bf16.mxu0 %v5291_v9  ;;  %v5301_v16 = vld [vmem:[#allocation6 + $0x84] ss:$16 sps:$4 sm:$0xff]   ;;  %v5305_v18 = vld [vmem:[#allocation6 + $0x80] ss:$16 sps:$4 sm:$0xff]   ;;  %v5376_v9 = vld [vmem:[#allocation6 + $0x8] ss:$16 sps:$4 sm:$0xff]   ;;  %p5875_p4 = pnand %p5874_p11, %p7047_p3 }
  0xa6   : > { %v5303_v17 = vld [vmem:[#allocation6 + $0x284] ss:$16 sps:$4 sm:$0xff]   ;;  %v5306_v19 = vld [vmem:[#allocation6 + $0x280] ss:$16 sps:$4 sm:$0xff]   ;;  %s5963_s18 = smov [#allocation10]  }
  0xa7   : > { %2316 = vmatpush1.bf16.msra.mxu1 %v5293_v10  ;;  %v5307_v20 = vld [vmem:[#allocation6 + $0xa4] ss:$16 sps:$4 sm:$0xff]   ;;  %v5311_v22 = vld [vmem:[#allocation6 + $0xa0] ss:$16 sps:$4 sm:$0xff]   ;;  %s6946_s23 = scalar_lea.hbm %s7046_s20, %s4876_s14  ;;  %p5876_p8 = pneg %p5875_p4 }
  0xa8   : > { %2429 = vmatpush1.bf16.msra.mxu0 %v5294_v11  ;;  %2317 = vmatprep.subr.bf16.mxu1 %v5295_v12  ;;  %v5309_v21 = vld [vmem:[#allocation6 + $0x2a4] ss:$16 sps:$4 sm:$0xff]   ;;  %v5312_v23 = vld [vmem:[#allocation6 + $0x2a0] ss:$16 sps:$4 sm:$0xff]   ;;  %v6257_v12 = vcombine.low %v370_v50, %v374_v51  ;;  %s5877_s24 = sshll.u32 %s5963_s18, 4  ;;  %s5878_s24 = int_to_ptr.vmem [resolvable:$false] %s5877_s24 }
  0xa9   : > { %2430 = vmatprep.subr.bf16.mxu0 %v5297_v13  ;;  %v5313_v24 = vld [vmem:[#allocation6 + $0xc4] ss:$16 sps:$4 sm:$0xff]   ;;  %v5317_v26 = vld [vmem:[#allocation6 + $0xc0] ss:$16 sps:$4 sm:$0xff]   ;;  %s5879_s22 = scalar_lea.vmem %s5878_s24, 4096  ;;  %p5880_p7 = scmp.lt.s32.totalorder %s6948_s25, %s5878_s24 }
  0xaa   : > { %v5315_v25 = vld [vmem:[#allocation6 + $0x2c4] ss:$16 sps:$4 sm:$0xff]   ;;  %v5318_v27 = vld [vmem:[#allocation6 + $0x2c0] ss:$16 sps:$4 sm:$0xff]   ;;  %p5881_p0 = scmp.lt.s32.totalorder %s5879_s22, %s5873_s13 }
  0xab   : > { %2318 = vmatpush1.bf16.msra.mxu1 %v5299_v14  ;;  %v5319_v28 = vld [vmem:[#allocation6 + $0xe4] ss:$16 sps:$4 sm:$0xff]   ;;  %v5323_v30 = vld [vmem:[#allocation6 + $0xe0] ss:$16 sps:$4 sm:$0xff]   ;;  %v378_v14 = vld [vmem:[%s6224_s30 + $0x48] sm:$0xff] }
  0xac   : > { %2431 = vmatpush1.bf16.msra.mxu0 %v5300_v15  ;;  %2319 = vmatprep.subr.bf16.mxu1 %v5301_v16  ;;  %v5321_v29 = vld [vmem:[#allocation6 + $0x2e4] ss:$16 sps:$4 sm:$0xff]   ;;  %v5324_v31 = vld [vmem:[#allocation6 + $0x2e0] ss:$16 sps:$4 sm:$0xff]   ;;  %v382_v15 = vld [vmem:[%s6224_s30 + $0x68] sm:$0xff]  ;;  %p5882_p2 = por %p5881_p0, %p5880_p7 }
  0xad   : > { %2432 = vmatprep.subr.bf16.mxu0 %v5303_v17  ;;  %v5325_v32 = vld [vmem:[#allocation6 + $0x104] ss:$16 sps:$4 sm:$0xff]   ;;  %v5329_v34 = vld [vmem:[#allocation6 + $0x100] ss:$16 sps:$4 sm:$0xff]   ;;  %v5384_v17 = vld [vmem:[#allocation6 + $0x2c] ss:$16 sps:$4 sm:$0xff]  }
  0xae   : > { %v5327_v33 = vld [vmem:[#allocation6 + $0x304] ss:$16 sps:$4 sm:$0xff]   ;;  %v5330_v35 = vld [vmem:[#allocation6 + $0x300] ss:$16 sps:$4 sm:$0xff]   ;;  %p5883_p5 = pnand %p5882_p2, %p5876_p8 }
  0xaf   : > { %2320 = vmatpush1.bf16.msra.mxu1 %v5305_v18  ;;  %v5331_v36 = vld [vmem:[#allocation6 + $0x124] ss:$16 sps:$4 sm:$0xff]   ;;  %v5335_v38 = vld [vmem:[#allocation6 + $0x120] ss:$16 sps:$4 sm:$0xff]  }
  0xb0   : > { %2433 = vmatpush1.bf16.msra.mxu0 %v5306_v19  ;;  %2321 = vmatprep.subr.bf16.mxu1 %v5307_v20  ;;  %v5333_v37 = vld [vmem:[#allocation6 + $0x324] ss:$16 sps:$4 sm:$0xff]   ;;  %v5336_v39 = vld [vmem:[#allocation6 + $0x320] ss:$16 sps:$4 sm:$0xff]   ;;  %v6264_v19 = vcombine.high %v378_v14, %v382_v15 }
  0xb1   : > { %2434 = vmatprep.subr.bf16.mxu0 %v5309_v21  ;;  %v5337_v40 = vld [vmem:[#allocation6 + $0x144] ss:$16 sps:$4 sm:$0xff]   ;;  %v5341_v42 = vld [vmem:[#allocation6 + $0x140] ss:$16 sps:$4 sm:$0xff]   ;;  %v5382_v21 = vld [vmem:[#allocation6 + $0x28] ss:$16 sps:$4 sm:$0xff]  }
  0xb2   : > { %v5339_v41 = vld [vmem:[#allocation6 + $0x344] ss:$16 sps:$4 sm:$0xff]   ;;  %v5342_v43 = vld [vmem:[#allocation6 + $0x340] ss:$16 sps:$4 sm:$0xff]  }
  0xb3   : > { %2322 = vmatpush1.bf16.msra.mxu1 %v5311_v22  ;;  %v5343_v44 = vld [vmem:[#allocation6 + $0x164] ss:$16 sps:$4 sm:$0xff]   ;;  %v5347_v46 = vld [vmem:[#allocation6 + $0x160] ss:$16 sps:$4 sm:$0xff]  }
  0xb4   : > { %2435 = vmatpush1.bf16.msra.mxu0 %v5312_v23  ;;  %2323 = vmatprep.subr.bf16.mxu1 %v5313_v24  ;;  %v5345_v45 = vld [vmem:[#allocation6 + $0x364] ss:$16 sps:$4 sm:$0xff]   ;;  %v5348_v47 = vld [vmem:[#allocation6 + $0x360] ss:$16 sps:$4 sm:$0xff]   ;;  %v5390_v23 = vld [vmem:[#allocation6 + $0x4c] ss:$16 sps:$4 sm:$0xff]  }
  0xb5   : > { %2436 = vmatprep.subr.bf16.mxu0 %v5315_v25  ;;  %v369_v48 = vld [vmem:[%s6224_s30] sm:$0xff]  ;;  %v5388_v25 = vld [vmem:[#allocation6 + $0x48] ss:$16 sps:$4 sm:$0xff]  }
  0xb6   : > { %v373_v49 = vld [vmem:[%s6224_s30 + $0x20] sm:$0xff] }
  0xb7   : > { %2324 = vmatpush1.bf16.msra.mxu1 %v5317_v26  ;;  %v5349_v52 = vld [vmem:[#allocation6 + $0x184] ss:$16 sps:$4 sm:$0xff]   ;;  %v6248_v53 = vcombine.high %v369_v48, %v373_v49  ;;  %v5353_v56 = vld [vmem:[#allocation6 + $0x180] ss:$16 sps:$4 sm:$0xff]   ;;  %v6255_v11 = vcombine.low %v369_v48, %v373_v49  ;;  %v5408_v49 = vld [vmem:[#allocation6 + $0xac] ss:$16 sps:$4 sm:$0xff]  }
  0xb8   : > { %2437 = vmatpush1.bf16.msra.mxu0 %v5318_v27  ;;  %2325 = vmatprep.subr.bf16.mxu1 %v5319_v28  ;;  %v5351_v54 = vld [vmem:[#allocation6 + $0x384] ss:$16 sps:$4 sm:$0xff]   ;;  %v5354_v57 = vld [vmem:[#allocation6 + $0x380] ss:$16 sps:$4 sm:$0xff]  }
  0xb9   : > { %2438 = vmatprep.subr.bf16.mxu0 %v5321_v29  ;;  %2343 = vmatprep.mubr.bf16.mxu1 %v6248_v53  ;;  %v5355_v58 = vld [vmem:[#allocation6 + $0x1a4] ss:$16 sps:$4 sm:$0xff]   ;;  %v5359_v60 = vld [vmem:[#allocation6 + $0x1a0] ss:$16 sps:$4 sm:$0xff]   ;;  %v6274_v29 = vcombine.low %v378_v14, %v382_v15 }
  0xba   : > { %v5357_v59 = vld [vmem:[#allocation6 + $0x3a4] ss:$16 sps:$4 sm:$0xff]   ;;  %v5360_v61 = vld [vmem:[#allocation6 + $0x3a0] ss:$16 sps:$4 sm:$0xff]  }
  0xbb   : > { %2326 = vmatpush1.bf16.msra.mxu1 %v5323_v30  ;;  %v5361_v62 = vld [vmem:[#allocation6 + $0x1c4] ss:$16 sps:$4 sm:$0xff]   ;;  %v5365_v0 = vld [vmem:[#allocation6 + $0x1c0] ss:$16 sps:$4 sm:$0xff]   ;;  %v386_v30 = vld [vmem:[%s6224_s30 + $0x88] sm:$0xff] }
  0xbc   : > { %2439 = vmatpush1.bf16.msra.mxu0 %v5324_v31  ;;  %2327 = vmatprep.subr.bf16.mxu1 %v5325_v32  ;;  %v5363_v63 = vld [vmem:[#allocation6 + $0x3c4] ss:$16 sps:$4 sm:$0xff]   ;;  %v5366_v1 = vld [vmem:[#allocation6 + $0x3c0] ss:$16 sps:$4 sm:$0xff]   ;;  %v390_v31 = vld [vmem:[%s6224_s30 + $0xa8] sm:$0xff] }
  0xbd   : > { %2440 = vmatprep.subr.bf16.mxu0 %v5327_v33  ;;  %v5367_v2 = vld [vmem:[#allocation6 + $0x1e4] ss:$16 sps:$4 sm:$0xff]   ;;  %v5371_v4 = vld [vmem:[#allocation6 + $0x1e0] ss:$16 sps:$4 sm:$0xff]   ;;  %v5396_v33 = vld [vmem:[#allocation6 + $0x6c] ss:$16 sps:$4 sm:$0xff]  }
  0xbe   : > { %v5369_v3 = vld [vmem:[#allocation6 + $0x3e4] ss:$16 sps:$4 sm:$0xff]   ;;  %v5372_v5 = vld [vmem:[#allocation6 + $0x3e0] ss:$16 sps:$4 sm:$0xff]  }
  0xbf   : > { %2328 = vmatpush1.bf16.msra.mxu1 %v5329_v34  ;;  %v5375_v6 = vld [vmem:[#allocation6 + $0x404] ss:$16 sps:$4 sm:$0xff]   ;;  %v5373_v8 = vld [vmem:[#allocation6 + $0x400] ss:$16 sps:$4 sm:$0xff]  }
  0xc0   : > { %2441 = vmatpush1.bf16.msra.mxu0 %v5330_v35  ;;  %2329 = vmatprep.subr.bf16.mxu1 %v5331_v36  ;;  %v377_v10 = vld [vmem:[%s6224_s30 + $0x40] sm:$0xff]  ;;  %v6280_v35 = vcombine.high %v386_v30, %v390_v31 }
  0xc1   : > { %2442 = vmatprep.subr.bf16.mxu0 %v5333_v37  ;;  %v381_v13 = vld [vmem:[%s6224_s30 + $0x60] sm:$0xff]  ;;  %v5394_v37 = vld [vmem:[#allocation6 + $0x68] ss:$16 sps:$4 sm:$0xff]  }
  0xc2   : > { %v5381_v16 = vld [vmem:[#allocation6 + $0x424] ss:$16 sps:$4 sm:$0xff]   ;;  %v6262_v18 = vcombine.high %v377_v10, %v381_v13  ;;  %v5379_v20 = vld [vmem:[#allocation6 + $0x420] ss:$16 sps:$4 sm:$0xff]   ;;  %v6272_v28 = vcombine.low %v377_v10, %v381_v13 }
  0xc3   : > { %2330 = vmatpush1.bf16.msra.mxu1 %v5335_v38  ;;  %v5387_v22 = vld [vmem:[#allocation6 + $0x444] ss:$16 sps:$4 sm:$0xff]   ;;  %v5385_v24 = vld [vmem:[#allocation6 + $0x440] ss:$16 sps:$4 sm:$0xff]  }
  0xc4   : > { %2443 = vmatpush1.bf16.msra.mxu0 %v5336_v39  ;;  %2331 = vmatprep.subr.bf16.mxu1 %v5337_v40  ;;  %v385_v26 = vld [vmem:[%s6224_s30 + $0x80] sm:$0xff]  ;;  %v5402_v39 = vld [vmem:[#allocation6 + $0x8c] ss:$16 sps:$4 sm:$0xff]  }
  0xc5   : > { %2444 = vmatprep.subr.bf16.mxu0 %v5339_v41  ;;  %v389_v27 = vld [vmem:[%s6224_s30 + $0xa0] sm:$0xff]  ;;  %v5400_v41 = vld [vmem:[#allocation6 + $0x88] ss:$16 sps:$4 sm:$0xff]  }
  0xc6   : > { %v5393_v32 = vld [vmem:[#allocation6 + $0x464] ss:$16 sps:$4 sm:$0xff]   ;;  %v6278_v34 = vcombine.high %v385_v26, %v389_v27  ;;  %v5391_v36 = vld [vmem:[#allocation6 + $0x460] ss:$16 sps:$4 sm:$0xff]  }
  0xc7   : > { %2332 = vmatpush1.bf16.msra.mxu1 %v5341_v42  ;;  %v5399_v38 = vld [vmem:[#allocation6 + $0x484] ss:$16 sps:$4 sm:$0xff]   ;;  %v5397_v40 = vld [vmem:[#allocation6 + $0x480] ss:$16 sps:$4 sm:$0xff]  }
  0xc8   : > { %2445 = vmatpush1.bf16.msra.mxu0 %v5342_v43  ;;  %2333 = vmatprep.subr.bf16.mxu1 %v5343_v44  ;;  %v393_v42 = vld [vmem:[%s6224_s30 + $0xc0] sm:$0xff]  ;;  %v6288_v44 = vcombine.low %v385_v26, %v389_v27  ;;  %v5430_v27 = vld [vmem:[#allocation6 + $0x128] ss:$16 sps:$4 sm:$0xff]  }
  0xc9   : > { %2446 = vmatprep.subr.bf16.mxu0 %v5345_v45  ;;  %v397_v43 = vld [vmem:[%s6224_s30 + $0xe0] sm:$0xff]  ;;  %v6290_v45 = vcombine.low %v386_v30, %v390_v31  ;;  %v5438_v31 = vld [vmem:[#allocation6 + $0x14c] ss:$16 sps:$4 sm:$0xff]  }
  0xca   : > { %v5405_v48 = vld [vmem:[#allocation6 + $0x4a4] ss:$16 sps:$4 sm:$0xff]   ;;  %v6294_v50 = vcombine.high %v393_v42, %v397_v43  ;;  %v5427_v26 = vld [vmem:[#allocation6 + $0x520] ss:$16 sps:$4 sm:$0xff]  }
  0xcb   : > { %2334 = vmatpush1.bf16.msra.mxu1 %v5347_v46  ;;  %v394_v46 = vld [vmem:[%s6224_s30 + $0xc8] sm:$0xff]  ;;  %v409_v10 = vld [vmem:[%s6224_s30 + $0x140] sm:$0xff] }
  0xcc   : > { %2447 = vmatpush1.bf16.msra.mxu0 %v5348_v47  ;;  %2335 = vmatprep.subr.bf16.mxu1 %v5349_v52  ;;  %v398_v47 = vld [vmem:[%s6224_s30 + $0xe8] sm:$0xff]  ;;  %v5403_v52 = vld [vmem:[#allocation6 + $0x4a0] ss:$16 sps:$4 sm:$0xff]   ;;  %v5435_v30 = vld [vmem:[#allocation6 + $0x544] ss:$16 sps:$4 sm:$0xff]  }
  0xcd   : > { %2448 = vmatprep.subr.bf16.mxu0 %v5351_v54  ;;  %v6296_v51 = vcombine.high %v394_v46, %v398_v47  ;;  %v5406_v54 = vld [vmem:[#allocation6 + $0xa8] ss:$16 sps:$4 sm:$0xff]   ;;  %v413_v13 = vld [vmem:[%s6224_s30 + $0x160] sm:$0xff] }
  0xcf   : > { %2336 = vmatpush1.bf16.msra.mxu1 %v5353_v56  ;;  %v5411_v56 = vld [vmem:[#allocation6 + $0x4c4] ss:$16 sps:$4 sm:$0xff]  }
  0xd0   : > { %2449 = vmatpush1.bf16.msra.mxu0 %v5354_v57  ;;  %2337 = vmatprep.subr.bf16.mxu1 %v5355_v58  ;;  %v5414_v57 = vld [vmem:[#allocation6 + $0xcc] ss:$16 sps:$4 sm:$0xff]   ;;  %v5409_v58 = vld [vmem:[#allocation6 + $0x4c0] ss:$16 sps:$4 sm:$0xff]  }
  0xd1   : > { %2450 = vmatprep.subr.bf16.mxu0 %v5357_v59  ;;  %v401_v59 = vld [vmem:[%s6224_s30 + $0x100] sm:$0xff] }
  0xd3   : > { %2338 = vmatpush1.bf16.msra.mxu1 %v5359_v60  ;;  %v405_v60 = vld [vmem:[%s6224_s30 + $0x120] sm:$0xff] }
  0xd4   : > { %2451 = vmatpush1.bf16.msra.mxu0 %v5360_v61  ;;  %2339 = vmatprep.subr.bf16.mxu1 %v5361_v62  ;;  %v6304_v61 = vcombine.low %v393_v42, %v397_v43  ;;  %v6306_v62 = vcombine.low %v394_v46, %v398_v47  ;;  %v6320_v14 = vcombine.low %v401_v59, %v405_v60  ;;  %v5441_v42 = vld [vmem:[#allocation6 + $0x564] ss:$16 sps:$4 sm:$0xff]   ;;  %v5444_v43 = vld [vmem:[#allocation6 + $0x16c] ss:$16 sps:$4 sm:$0xff]  }
  0xd5   : > { %2452 = vmatprep.subr.bf16.mxu0 %v5363_v63  ;;  %v402_v63 = vld [vmem:[%s6224_s30 + $0x108] sm:$0xff] }
  0xd7   : > { %2340 = vmatpush1.bf16.msra.mxu1 %v5365_v0  ;;  %v406_v0 = vld [vmem:[%s6224_s30 + $0x128] sm:$0xff] }
  0xd8   : > { %2453 = vmatpush1.bf16.msra.mxu0 %v5366_v1  ;;  %2341 = vmatprep.subr.bf16.mxu1 %v5367_v2  ;;  %v5412_v1 = vld [vmem:[#allocation6 + $0xc8] ss:$16 sps:$4 sm:$0xff]   ;;  %v5417_v2 = vld [vmem:[#allocation6 + $0x4e4] ss:$16 sps:$4 sm:$0xff]   ;;  %v6322_v15 = vcombine.low %v402_v63, %v406_v0 }
  0xd9   : > { %2454 = vmatprep.subr.bf16.mxu0 %v5369_v3  ;;  %v5420_v3 = vld [vmem:[#allocation6 + $0xec] ss:$16 sps:$4 sm:$0xff]  }
  0xdb   : > { %2342 = vmatpush1.bf16.msra.mxu1 %v5371_v4  ;;  %v6310_v4 = vcombine.high %v401_v59, %v405_v60 }
  0xdc   : > { %2455 = vmatpush1.bf16.msra.mxu0 %v5372_v5  ;;  %2763 = vmatprep.subr.bf16.mxu1 %v5378_v7  ;;  %v6312_v5 = vcombine.high %v402_v63, %v406_v0  ;;  %v5418_v7 = vld [vmem:[#allocation6 + $0xe8] ss:$16 sps:$4 sm:$0xff]   ;;  %v5445_v0 = vld [vmem:[#allocation6 + $0x580] ss:$16 sps:$4 sm:$0xff]  }
  0xdd   : > { %2537 = vmatprep.subr.bf16.mxu0 %v5375_v6  ;;  %v5415_v6 = vld [vmem:[#allocation6 + $0x4e0] ss:$16 sps:$4 sm:$0xff]   ;;  %v430_v63 = vld [vmem:[%s6224_s30 + $0x1e8] sm:$0xff] }
  0xde   : > { %2344 = vmatmul.mubr.bf16.vlgmr.msra.gmra.mrb[0].mxu1 %v6255_v11 }
  0xdf   : > { %2457 = vmatmul.mubr.bf16.vlgmr.msra.gmra.mrb[0].mxu0 %v6257_v12  ;;  %2764 = vmatpush1.bf16.msra.mxu1 %v5376_v9  ;;  %v5426_v9 = vld [vmem:[#allocation6 + $0x10c] ss:$16 sps:$4 sm:$0xff]  }
  0xe0   : > { %2538 = vmatpush1.bf16.msra.mxu0 %v5373_v8  ;;  %2765 = vmatprep.subr.bf16.mxu1 %v5384_v17  ;;  %v5423_v8 = vld [vmem:[#allocation6 + $0x504] ss:$16 sps:$4 sm:$0xff]   ;;  %v414_v17 = vld [vmem:[%s6224_s30 + $0x168] sm:$0xff] }
  0xe1   : > { %2539 = vmatprep.subr.bf16.mxu0 %v5381_v16  ;;  %2353 = vmatprep.mubr.bf16.mxu1 %v6262_v18  ;;  %v410_v16 = vld [vmem:[%s6224_s30 + $0x148] sm:$0xff] }
  0xe2   : > { %2466 = vmatprep.mubr.bf16.mxu0 %v6264_v19 }
  0xe3   : > { %2766 = vmatpush1.bf16.msra.mxu1 %v5382_v21  ;;  %v5424_v21 = vld [vmem:[#allocation6 + $0x108] ss:$16 sps:$4 sm:$0xff]  }
  0xe4   : > { %2540 = vmatpush1.bf16.msra.mxu0 %v5379_v20  ;;  %2767 = vmatprep.subr.bf16.mxu1 %v5390_v23  ;;  %v5421_v20 = vld [vmem:[#allocation6 + $0x500] ss:$16 sps:$4 sm:$0xff]   ;;  %v5432_v23 = vld [vmem:[#allocation6 + $0x12c] ss:$16 sps:$4 sm:$0xff]  }
  0xe5   : > { %2541 = vmatprep.subr.bf16.mxu0 %v5387_v22  ;;  %v5429_v22 = vld [vmem:[#allocation6 + $0x524] ss:$16 sps:$4 sm:$0xff]  }
  0xe6   : > { %2354 = vmatmul.mubr.bf16.gmra.mrb[4].mxu1 %v6272_v28 }
  0xe7   : > { %2467 = vmatmul.mubr.bf16.gmra.mrb[4].mxu0 %v6274_v29  ;;  %2768 = vmatpush1.bf16.msra.mxu1 %v5388_v25  ;;  %v6328_v25 = vcombine.high %v410_v16, %v414_v17 }
  0xe8   : > { %2542 = vmatpush1.bf16.msra.mxu0 %v5385_v24  ;;  %2769 = vmatprep.subr.bf16.mxu1 %v5396_v33  ;;  %v6326_v24 = vcombine.high %v409_v10, %v413_v13  ;;  %v5436_v33 = vld [vmem:[#allocation6 + $0x148] ss:$16 sps:$4 sm:$0xff]  }
  0xe9   : > { %2543 = vmatprep.subr.bf16.mxu0 %v5393_v32  ;;  %2363 = vmatprep.mubr.bf16.mxu1 %v6278_v34  ;;  %v5433_v32 = vld [vmem:[#allocation6 + $0x540] ss:$16 sps:$4 sm:$0xff]  }
  0xea   : > { %2476 = vmatprep.mubr.bf16.mxu0 %v6280_v35 }
  0xeb   : > { %2770 = vmatpush1.bf16.msra.mxu1 %v5394_v37  ;;  %v421_v37 = vld [vmem:[%s6224_s30 + $0x1a0] sm:$0xff] }
  0xec   : > { %2544 = vmatpush1.bf16.msra.mxu0 %v5391_v36  ;;  %2771 = vmatprep.subr.bf16.mxu1 %v5402_v39  ;;  %v417_v36 = vld [vmem:[%s6224_s30 + $0x180] sm:$0xff]  ;;  %v6338_v39 = vcombine.low %v410_v16, %v414_v17 }
  0xed   : > { %2545 = vmatprep.subr.bf16.mxu0 %v5399_v38  ;;  %v6336_v38 = vcombine.low %v409_v10, %v413_v13  ;;  %v6342_v46 = vcombine.high %v417_v36, %v421_v37  ;;  %v6353_v59 = vcombine.low %v417_v36, %v421_v37  ;;  %v5459_v10 = vld [vmem:[#allocation6 + $0x5c4] ss:$16 sps:$4 sm:$0xff]   ;;  %v5462_v13 = vld [vmem:[#allocation6 + $0x1cc] ss:$16 sps:$4 sm:$0xff]   ;;  %v5469_v37 = vld [vmem:[#allocation6 + $0x600] ss:$16 sps:$4 sm:$0xff]  }
  0xee   : > { %2364 = vmatmul.mubr.bf16.gmra.mrb[8].mxu1 %v6288_v44  ;;  %v5474_v36 = vld [vmem:[#allocation6 + $0x20c] ss:$16 sps:$4 sm:$0xff]  }
  0xef   : > { %2477 = vmatmul.mubr.bf16.gmra.mrb[8].mxu0 %v6290_v45  ;;  %2772 = vmatpush1.bf16.msra.mxu1 %v5400_v41  ;;  %v422_v41 = vld [vmem:[%s6224_s30 + $0x1a8] sm:$0xff] }
  0xf0   : > { %2546 = vmatpush1.bf16.msra.mxu0 %v5397_v40  ;;  %2773 = vmatprep.subr.bf16.mxu1 %v5408_v49  ;;  %v418_v40 = vld [vmem:[%s6224_s30 + $0x188] sm:$0xff] }
  0xf1   : > { %2547 = vmatprep.subr.bf16.mxu0 %v5405_v48  ;;  %2373 = vmatprep.mubr.bf16.mxu1 %v6294_v50  ;;  %v6344_v47 = vcombine.high %v418_v40, %v422_v41  ;;  %v5439_v48 = vld [vmem:[#allocation6 + $0x560] ss:$16 sps:$4 sm:$0xff]   ;;  %v5442_v49 = vld [vmem:[#allocation6 + $0x168] ss:$16 sps:$4 sm:$0xff]   ;;  %v6355_v60 = vcombine.low %v418_v40, %v422_v41 }
  0xf2   : > { %2486 = vmatprep.mubr.bf16.mxu0 %v6296_v51  ;;  %v5472_v40 = vld [vmem:[#allocation6 + $0x208] ss:$16 sps:$4 sm:$0xff]  }
  0xf3   : > { %2774 = vmatpush1.bf16.msra.mxu1 %v5406_v54  ;;  %v5450_v54 = vld [vmem:[#allocation6 + $0x18c] ss:$16 sps:$4 sm:$0xff]  }
  0xf4   : > { %2548 = vmatpush1.bf16.msra.mxu0 %v5403_v52  ;;  %2775 = vmatprep.subr.bf16.mxu1 %v5414_v57  ;;  %v5447_v52 = vld [vmem:[#allocation6 + $0x584] ss:$16 sps:$4 sm:$0xff]  }
  0xf5   : > { %2549 = vmatprep.subr.bf16.mxu0 %v5411_v56  ;;  %v425_v56 = vld [vmem:[%s6224_s30 + $0x1c0] sm:$0xff] }
  0xf6   : > { %2374 = vmatmul.mubr.bf16.gmra.mrb[12].mxu1 %v6304_v61  ;;  %v429_v57 = vld [vmem:[%s6224_s30 + $0x1e0] sm:$0xff] }
  0xf7   : > { %2487 = vmatmul.mubr.bf16.gmra.mrb[12].mxu0 %v6306_v62  ;;  %2776 = vmatpush1.bf16.msra.mxu1 %v5412_v1  ;;  %v5448_v1 = vld [vmem:[#allocation6 + $0x188] ss:$16 sps:$4 sm:$0xff]   ;;  %v6366_v16 = vcombine.low %v425_v56, %v429_v57 }
  0xf8   : > { %2550 = vmatpush1.bf16.msra.mxu0 %v5409_v58  ;;  %2777 = vmatprep.subr.bf16.mxu1 %v5420_v3  ;;  %v426_v58 = vld [vmem:[%s6224_s30 + $0x1c8] sm:$0xff] }
  0xf9   : > { %2551 = vmatprep.subr.bf16.mxu0 %v5417_v2  ;;  %2383 = vmatprep.mubr.bf16.mxu1 %v6310_v4  ;;  %v5453_v2 = vld [vmem:[#allocation6 + $0x5a4] ss:$16 sps:$4 sm:$0xff]   ;;  %v5456_v3 = vld [vmem:[#allocation6 + $0x1ac] ss:$16 sps:$4 sm:$0xff]   ;;  %v6368_v17 = vcombine.low %v426_v58, %v430_v63 }
  0xfa   : > { %2496 = vmatprep.mubr.bf16.mxu0 %v6312_v5 }
  0xfb   : > { %2778 = vmatpush1.bf16.msra.mxu1 %v5418_v7  ;;  %v6360_v7 = vcombine.high %v426_v58, %v430_v63  ;;  %v387_v58 = vld [vmem:[%s6224_s30 + $0x90] sm:$0xff] }
  0xfc   : > { %2552 = vmatpush1.bf16.msra.mxu0 %v5415_v6  ;;  %2779 = vmatprep.subr.bf16.mxu1 %v5426_v9  ;;  %v6358_v6 = vcombine.high %v425_v56, %v429_v57  ;;  %v5454_v9 = vld [vmem:[#allocation6 + $0x1a8] ss:$16 sps:$4 sm:$0xff]   ;;  %v5483_v56 = vld [vmem:[#allocation6 + $0x644] ss:$16 sps:$4 sm:$0xff]   ;;  %v5486_v57 = vld [vmem:[#allocation6 + $0x24c] ss:$16 sps:$4 sm:$0xff]  }
  0xfd   : > { %2553 = vmatprep.subr.bf16.mxu0 %v5423_v8  ;;  %v5451_v8 = vld [vmem:[#allocation6 + $0x5a0] ss:$16 sps:$4 sm:$0xff]  }
  0xfe   : > { %2384 = vmatmul.mubr.bf16.gmra.mrb[16].mxu1 %v6320_v14 }
  0xff   : > { %2497 = vmatmul.mubr.bf16.gmra.mrb[16].mxu0 %v6322_v15  ;;  %2780 = vmatpush1.bf16.msra.mxu1 %v5424_v21  ;;  %v375_v21 = vld [vmem:[%s6224_s30 + $0x30] sm:$0xff] }
 0x100   : > { %2554 = vmatpush1.bf16.msra.mxu0 %v5421_v20  ;;  %2781 = vmatprep.subr.bf16.mxu1 %v5432_v23  ;;  %v371_v20 = vld [vmem:[%s6224_s30 + $0x10] sm:$0xff]  ;;  %v5460_v23 = vld [vmem:[#allocation6 + $0x1c8] ss:$16 sps:$4 sm:$0xff]  }
 0x101   : > { %2555 = vmatprep.subr.bf16.mxu0 %v5429_v22  ;;  %2393 = vmatprep.mubr.bf16.mxu1 %v6326_v24  ;;  %v5457_v22 = vld [vmem:[#allocation6 + $0x5c0] ss:$16 sps:$4 sm:$0xff]   ;;  %v6378_v41 = vcombine.low %v371_v20, %v375_v21 }
 0x102   : > { %2506 = vmatprep.mubr.bf16.mxu0 %v6328_v25 }
 0x103   : > { %2782 = vmatpush1.bf16.msra.mxu1 %v5430_v27  ;;  %v5468_v27 = vld [vmem:[#allocation6 + $0x1ec] ss:$16 sps:$4 sm:$0xff]  }
 0x104   : > { %2556 = vmatpush1.bf16.msra.mxu0 %v5427_v26  ;;  %2783 = vmatprep.subr.bf16.mxu1 %v5438_v31  ;;  %v5465_v26 = vld [vmem:[#allocation6 + $0x5e4] ss:$16 sps:$4 sm:$0xff]   ;;  %v5463_v31 = vld [vmem:[#allocation6 + $0x5e0] ss:$16 sps:$4 sm:$0xff]  }
 0x105   : > { %2557 = vmatprep.subr.bf16.mxu0 %v5435_v30  ;;  %v6372_v30 = vcombine.high %v371_v20, %v375_v21  ;;  %v395_v21 = vld [vmem:[%s6224_s30 + $0xd0] sm:$0xff] }
 0x106   : > { %2394 = vmatmul.mubr.bf16.gmra.mrb[20].mxu1 %v6336_v38 }
 0x107   : > { %2507 = vmatmul.mubr.bf16.gmra.mrb[20].mxu0 %v6338_v39  ;;  %2784 = vmatpush1.bf16.msra.mxu1 %v5436_v33  ;;  %v5471_v33 = vld [vmem:[#allocation6 + $0x604] ss:$16 sps:$4 sm:$0xff]  }
 0x108   : > { %2558 = vmatpush1.bf16.msra.mxu0 %v5433_v32  ;;  %2785 = vmatprep.subr.bf16.mxu1 %v5444_v43  ;;  %v5466_v32 = vld [vmem:[#allocation6 + $0x1e8] ss:$16 sps:$4 sm:$0xff]   ;;  %v383_v43 = vld [vmem:[%s6224_s30 + $0x70] sm:$0xff] }
 0x109   : > { %2559 = vmatprep.subr.bf16.mxu0 %v5441_v42  ;;  %2403 = vmatprep.mubr.bf16.mxu1 %v6342_v46  ;;  %v379_v42 = vld [vmem:[%s6224_s30 + $0x50] sm:$0xff] }
 0x10a   : > { %2516 = vmatprep.mubr.bf16.mxu0 %v6344_v47  ;;  %v6389_v63 = vcombine.low %v379_v42, %v383_v43 }
 0x10b   : > { %2786 = vmatpush1.bf16.msra.mxu1 %v5442_v49  ;;  %v5480_v49 = vld [vmem:[#allocation6 + $0x22c] ss:$16 sps:$4 sm:$0xff]  }
 0x10c   : > { %2560 = vmatpush1.bf16.msra.mxu0 %v5439_v48  ;;  %2787 = vmatprep.subr.bf16.mxu1 %v5450_v54  ;;  %v5477_v48 = vld [vmem:[#allocation6 + $0x624] ss:$16 sps:$4 sm:$0xff]   ;;  %v5478_v54 = vld [vmem:[#allocation6 + $0x228] ss:$16 sps:$4 sm:$0xff]  }
 0x10d   : > { %2561 = vmatprep.subr.bf16.mxu0 %v5447_v52  ;;  %v6382_v52 = vcombine.high %v379_v42, %v383_v43  ;;  %v407_v42 = vld [vmem:[%s6224_s30 + $0x130] sm:$0xff] }
 0x10e   : > { %2404 = vmatmul.mubr.bf16.gmra.mrb[24].mxu1 %v6353_v59  ;;  %v5505_v43 = vld [vmem:[#allocation6 + $0x6c0] ss:$16 sps:$4 sm:$0xff]  }
 0x10f   : > { %2517 = vmatmul.mubr.bf16.gmra.mrb[24].mxu0 %v6355_v60  ;;  %2788 = vmatpush1.bf16.msra.mxu1 %v5448_v1  ;;  %v5481_v1 = vld [vmem:[#allocation6 + $0x640] ss:$16 sps:$4 sm:$0xff]  }
 0x110   : > { %2562 = vmatpush1.bf16.msra.mxu0 %v5445_v0  ;;  %2789 = vmatprep.subr.bf16.mxu1 %v5456_v3  ;;  %v391_v0 = vld [vmem:[%s6224_s30 + $0xb0] sm:$0xff]  ;;  %v5492_v3 = vld [vmem:[#allocation6 + $0x26c] ss:$16 sps:$4 sm:$0xff]  }
 0x111   : > { %2563 = vmatprep.subr.bf16.mxu0 %v5453_v2  ;;  %2413 = vmatprep.mubr.bf16.mxu1 %v6358_v6  ;;  %v5489_v2 = vld [vmem:[#allocation6 + $0x664] ss:$16 sps:$4 sm:$0xff]   ;;  %v6398_v20 = vcombine.low %v387_v58, %v391_v0 }
 0x112   : > { %2526 = vmatprep.mubr.bf16.mxu0 %v6360_v7 }
 0x113   : > { %2790 = vmatpush1.bf16.msra.mxu1 %v5454_v9  ;;  %v5490_v9 = vld [vmem:[#allocation6 + $0x268] ss:$16 sps:$4 sm:$0xff]  }
 0x114   : > { %2564 = vmatpush1.bf16.msra.mxu0 %v5451_v8  ;;  %2791 = vmatprep.subr.bf16.mxu1 %v5462_v13  ;;  %v6392_v8 = vcombine.high %v387_v58, %v391_v0  ;;  %v5498_v13 = vld [vmem:[#allocation6 + $0x28c] ss:$16 sps:$4 sm:$0xff]   ;;  %v411_v58 = vld [vmem:[%s6224_s30 + $0x150] sm:$0xff] }
 0x115   : > { %2565 = vmatprep.subr.bf16.mxu0 %v5459_v10  ;;  %v5495_v10 = vld [vmem:[#allocation6 + $0x684] ss:$16 sps:$4 sm:$0xff]  }
 0x116   : > { %2414 = vmatmul.mubr.bf16.gmra.mrb[28].mxu1 %v6366_v16 }
 0x117   : > { %2527 = vmatmul.mubr.bf16.gmra.mrb[28].mxu0 %v6368_v17  ;;  %2792 = vmatpush1.bf16.msra.mxu1 %v5460_v23  ;;  %v5493_v23 = vld [vmem:[#allocation6 + $0x680] ss:$16 sps:$4 sm:$0xff]  }
 0x118   : > { %2566 = vmatpush1.bf16.msra.mxu0 %v5457_v22  ;;  %2793 = vmatprep.subr.bf16.mxu1 %v5468_v27  ;;  %v399_v22 = vld [vmem:[%s6224_s30 + $0xf0] sm:$0xff]  ;;  %v5504_v27 = vld [vmem:[#allocation6 + $0x2ac] ss:$16 sps:$4 sm:$0xff]  }
 0x119   : > { %2567 = vmatprep.subr.bf16.mxu0 %v5465_v26  ;;  %2569 = vmatprep.mubr.bf16.mxu0 %v6372_v30  ;;  %v5501_v26 = vld [vmem:[#allocation6 + $0x6a4] ss:$16 sps:$4 sm:$0xff]  }
 0x11a   : > { %2795 = vmatprep.mubr.bf16.mxu1 %v6248_v53  ;;  %v5475_v53 = vld [vmem:[#allocation6 + $0x620] ss:$16 sps:$4 sm:$0xff]  }
 0x11b   : > { %2794 = vmatpush1.bf16.msra.mxu1 %v5466_v32  ;;  %v5502_v32 = vld [vmem:[#allocation6 + $0x2a8] ss:$16 sps:$4 sm:$0xff]  }
 0x11c   : > { %2568 = vmatpush1.bf16.msra.mxu0 %v5463_v31  ;;  %2876 = vmatprep.subr.bf16.mxu1 %v5474_v36  ;;  %v6402_v31 = vcombine.high %v395_v21, %v399_v22  ;;  %v5510_v36 = vld [vmem:[#allocation6 + $0x2cc] ss:$16 sps:$4 sm:$0xff]  }
 0x11d   : > { %2650 = vmatprep.subr.bf16.mxu0 %v5471_v33  ;;  %v5507_v33 = vld [vmem:[#allocation6 + $0x6c4] ss:$16 sps:$4 sm:$0xff]  }
 0x11e   : > { %2796 = vmatmul.mubr.bf16.vlgmr.msra.gmra.mrb[32].mxu1 %v6255_v11  ;;  %v5484_v11 = vld [vmem:[#allocation6 + $0x248] ss:$16 sps:$4 sm:$0xff]  }
 0x11f   : > { %2570 = vmatmul.mubr.bf16.vlgmr.msra.gmra.mrb[0].mxu0 %v6378_v41  ;;  %2877 = vmatpush1.bf16.msra.mxu1 %v5472_v40  ;;  %v6409_v40 = vcombine.low %v395_v21, %v399_v22  ;;  %v5529_v21 = vld [vmem:[#allocation6 + $0x740] ss:$16 sps:$4 sm:$0xff]  }
 0x120   : > { %2651 = vmatpush1.bf16.msra.mxu0 %v5469_v37  ;;  %2878 = vmatprep.subr.bf16.mxu1 %v5480_v49  ;;  %v403_v37 = vld [vmem:[%s6224_s30 + $0x110] sm:$0xff]  ;;  %v5516_v49 = vld [vmem:[#allocation6 + $0x2ec] ss:$16 sps:$4 sm:$0xff]  }
 0x121   : > { %2652 = vmatprep.subr.bf16.mxu0 %v5477_v48  ;;  %2579 = vmatprep.mubr.bf16.mxu0 %v6382_v52  ;;  %v5513_v48 = vld [vmem:[#allocation6 + $0x6e4] ss:$16 sps:$4 sm:$0xff]   ;;  %v6419_v0 = vcombine.low %v403_v37, %v407_v42 }
 0x122   : > { %2805 = vmatprep.mubr.bf16.mxu1 %v6262_v18  ;;  %v5487_v18 = vld [vmem:[#allocation6 + $0x660] ss:$16 sps:$4 sm:$0xff]  }
 0x123   : > { %2879 = vmatpush1.bf16.msra.mxu1 %v5478_v54  ;;  %v5514_v54 = vld [vmem:[#allocation6 + $0x2e8] ss:$16 sps:$4 sm:$0xff]  }
 0x124   : > { %2653 = vmatpush1.bf16.msra.mxu0 %v5475_v53  ;;  %2880 = vmatprep.subr.bf16.mxu1 %v5486_v57  ;;  %v6412_v53 = vcombine.high %v403_v37, %v407_v42  ;;  %v5522_v57 = vld [vmem:[#allocation6 + $0x30c] ss:$16 sps:$4 sm:$0xff]   ;;  %v5541_v37 = vld [vmem:[#allocation6 + $0x780] ss:$16 sps:$4 sm:$0xff]  }
 0x125   : > { %2654 = vmatprep.subr.bf16.mxu0 %v5483_v56  ;;  %v5519_v56 = vld [vmem:[#allocation6 + $0x704] ss:$16 sps:$4 sm:$0xff]  }
 0x126   : > { %2806 = vmatmul.mubr.bf16.gmra.mrb[36].mxu1 %v6272_v28  ;;  %v5496_v28 = vld [vmem:[#allocation6 + $0x288] ss:$16 sps:$4 sm:$0xff]  }
 0x127   : > { %2580 = vmatmul.mubr.bf16.gmra.mrb[4].mxu0 %v6389_v63  ;;  %2881 = vmatpush1.bf16.msra.mxu1 %v5484_v11  ;;  %v5517_v11 = vld [vmem:[#allocation6 + $0x700] ss:$16 sps:$4 sm:$0xff]  }
 0x128   : > { %2655 = vmatpush1.bf16.msra.mxu0 %v5481_v1  ;;  %2882 = vmatprep.subr.bf16.mxu1 %v5492_v3  ;;  %v415_v1 = vld [vmem:[%s6224_s30 + $0x170] sm:$0xff]  ;;  %v5528_v3 = vld [vmem:[#allocation6 + $0x32c] ss:$16 sps:$4 sm:$0xff]  }
 0x129   : > { %2656 = vmatprep.subr.bf16.mxu0 %v5489_v2  ;;  %2589 = vmatprep.mubr.bf16.mxu0 %v6392_v8  ;;  %v5525_v2 = vld [vmem:[#allocation6 + $0x724] ss:$16 sps:$4 sm:$0xff]   ;;  %v6428_v22 = vcombine.low %v411_v58, %v415_v1 }
 0x12a   : > { %2815 = vmatprep.mubr.bf16.mxu1 %v6278_v34  ;;  %v5499_v34 = vld [vmem:[#allocation6 + $0x6a0] ss:$16 sps:$4 sm:$0xff]  }
 0x12b   : > { %2883 = vmatpush1.bf16.msra.mxu1 %v5490_v9  ;;  %v5526_v9 = vld [vmem:[#allocation6 + $0x328] ss:$16 sps:$4 sm:$0xff]  }
 0x12c   : > { %2657 = vmatpush1.bf16.msra.mxu0 %v5487_v18  ;;  %2884 = vmatprep.subr.bf16.mxu1 %v5498_v13  ;;  %v6422_v18 = vcombine.high %v411_v58, %v415_v1  ;;  %v5534_v13 = vld [vmem:[#allocation6 + $0x34c] ss:$16 sps:$4 sm:$0xff]   ;;  %v5553_v58 = vld [vmem:[#allocation6 + $0x7c0] ss:$16 sps:$4 sm:$0xff]  }
 0x12d   : > { %2658 = vmatprep.subr.bf16.mxu0 %v5495_v10  ;;  %v5531_v10 = vld [vmem:[#allocation6 + $0x744] ss:$16 sps:$4 sm:$0xff]   ;;  %v372_v1 = vld [vmem:[%s6224_s30 + $0x18] sm:$0xff] }
 0x12e   : > { %2816 = vmatmul.mubr.bf16.gmra.mrb[40].mxu1 %v6288_v44  ;;  %v5508_v44 = vld [vmem:[#allocation6 + $0x2c8] ss:$16 sps:$4 sm:$0xff]  }
 0x12f   : > { %2590 = vmatmul.mubr.bf16.gmra.mrb[8].mxu0 %v6398_v20  ;;  %2885 = vmatpush1.bf16.msra.mxu1 %v5496_v28  ;;  %v419_v28 = vld [vmem:[%s6224_s30 + $0x190] sm:$0xff] }
 0x130   : > { %2659 = vmatpush1.bf16.msra.mxu0 %v5493_v23  ;;  %2886 = vmatprep.subr.bf16.mxu1 %v5504_v27  ;;  %v5532_v23 = vld [vmem:[#allocation6 + $0x348] ss:$16 sps:$4 sm:$0xff]   ;;  %v5540_v27 = vld [vmem:[#allocation6 + $0x36c] ss:$16 sps:$4 sm:$0xff]  }
 0x131   : > { %2660 = vmatprep.subr.bf16.mxu0 %v5501_v26  ;;  %2599 = vmatprep.mubr.bf16.mxu0 %v6402_v31  ;;  %v423_v26 = vld [vmem:[%s6224_s30 + $0x1b0] sm:$0xff] }
 0x132   : > { %2825 = vmatprep.mubr.bf16.mxu1 %v6294_v50  ;;  %v5511_v50 = vld [vmem:[#allocation6 + $0x6e0] ss:$16 sps:$4 sm:$0xff]   ;;  %v6438_v42 = vcombine.low %v419_v28, %v423_v26 }
 0x133   : > { %2887 = vmatpush1.bf16.msra.mxu1 %v5502_v32  ;;  %v5538_v32 = vld [vmem:[#allocation6 + $0x368] ss:$16 sps:$4 sm:$0xff]  }
 0x134   : > { %2661 = vmatpush1.bf16.msra.mxu0 %v5499_v34  ;;  %2888 = vmatprep.subr.bf16.mxu1 %v5510_v36  ;;  %v6432_v34 = vcombine.high %v419_v28, %v423_v26  ;;  %v5546_v36 = vld [vmem:[#allocation6 + $0x38c] ss:$16 sps:$4 sm:$0xff]   ;;  %v5565_v28 = vld [vmem:[#allocation6 + $0x408] ss:$16 sps:$4 sm:$0xff]  }
 0x135   : > { %2662 = vmatprep.subr.bf16.mxu0 %v5507_v33  ;;  %v5543_v33 = vld [vmem:[#allocation6 + $0x784] ss:$16 sps:$4 sm:$0xff]  }
 0x136   : > { %2826 = vmatmul.mubr.bf16.gmra.mrb[44].mxu1 %v6304_v61  ;;  %v5520_v61 = vld [vmem:[#allocation6 + $0x308] ss:$16 sps:$4 sm:$0xff]  }
 0x137   : > { %2600 = vmatmul.mubr.bf16.gmra.mrb[12].mxu0 %v6409_v40  ;;  %2889 = vmatpush1.bf16.msra.mxu1 %v5508_v44  ;;  %v431_v44 = vld [vmem:[%s6224_s30 + $0x1f0] sm:$0xff] }
 0x138   : > { %2663 = vmatpush1.bf16.msra.mxu0 %v5505_v43  ;;  %2890 = vmatprep.subr.bf16.mxu1 %v5516_v49  ;;  %v427_v43 = vld [vmem:[%s6224_s30 + $0x1d0] sm:$0xff]  ;;  %v5552_v49 = vld [vmem:[#allocation6 + $0x3ac] ss:$16 sps:$4 sm:$0xff]  }
 0x139   : > { %2664 = vmatprep.subr.bf16.mxu0 %v5513_v48  ;;  %2609 = vmatprep.mubr.bf16.mxu0 %v6412_v53  ;;  %v5549_v48 = vld [vmem:[#allocation6 + $0x7a4] ss:$16 sps:$4 sm:$0xff]  }
 0x13a   : > { %2835 = vmatprep.mubr.bf16.mxu1 %v6310_v4  ;;  %v5523_v4 = vld [vmem:[#allocation6 + $0x720] ss:$16 sps:$4 sm:$0xff]  }
 0x13b   : > { %2891 = vmatpush1.bf16.msra.mxu1 %v5514_v54  ;;  %v5550_v54 = vld [vmem:[#allocation6 + $0x3a8] ss:$16 sps:$4 sm:$0xff]  }
 0x13c   : > { %2665 = vmatpush1.bf16.msra.mxu0 %v5511_v50  ;;  %2892 = vmatprep.subr.bf16.mxu1 %v5522_v57  ;;  %v6442_v50 = vcombine.high %v427_v43, %v431_v44  ;;  %v5558_v57 = vld [vmem:[#allocation6 + $0x3cc] ss:$16 sps:$4 sm:$0xff]  }
 0x13d   : > { %2666 = vmatprep.subr.bf16.mxu0 %v5519_v56  ;;  %v5555_v56 = vld [vmem:[#allocation6 + $0x7c4] ss:$16 sps:$4 sm:$0xff]  }
 0x13e   : > { %2836 = vmatmul.mubr.bf16.gmra.mrb[48].mxu1 %v6320_v14  ;;  %v5537_v14 = vld [vmem:[#allocation6 + $0x764] ss:$16 sps:$4 sm:$0xff]  }
 0x13f   : > { %2610 = vmatmul.mubr.bf16.gmra.mrb[16].mxu0 %v6419_v0  ;;  %2893 = vmatpush1.bf16.msra.mxu1 %v5520_v61  ;;  %v376_v61 = vld [vmem:[%s6224_s30 + $0x38] sm:$0xff] }
 0x140   : > { %2667 = vmatpush1.bf16.msra.mxu0 %v5517_v11  ;;  %2894 = vmatprep.subr.bf16.mxu1 %v5528_v3  ;;  %v6449_v11 = vcombine.low %v427_v43, %v431_v44  ;;  %v5564_v3 = vld [vmem:[#allocation6 + $0x3ec] ss:$16 sps:$4 sm:$0xff]  }
 0x141   : > { %2668 = vmatprep.subr.bf16.mxu0 %v5525_v2  ;;  %2619 = vmatprep.mubr.bf16.mxu0 %v6422_v18  ;;  %v5561_v2 = vld [vmem:[#allocation6 + $0x7e4] ss:$16 sps:$4 sm:$0xff]   ;;  %v5579_v43 = vld [vmem:[#allocation6 + $0x48c] ss:$16 sps:$4 sm:$0xff]  }
 0x142   : > { %2845 = vmatprep.mubr.bf16.mxu1 %v6326_v24  ;;  %v5535_v24 = vld [vmem:[#allocation6 + $0x760] ss:$16 sps:$4 sm:$0xff]   ;;  %v396_v44 = vld [vmem:[%s6224_s30 + $0xd8] sm:$0xff] }
 0x143   : > { %2895 = vmatpush1.bf16.msra.mxu1 %v5526_v9  ;;  %v6452_v9 = vcombine.high %v372_v1, %v376_v61 }
 0x144   : > { %2669 = vmatpush1.bf16.msra.mxu0 %v5523_v4  ;;  %2896 = vmatprep.subr.bf16.mxu1 %v5534_v13  ;;  %v5559_v4 = vld [vmem:[#allocation6 + $0x7e0] ss:$16 sps:$4 sm:$0xff]   ;;  %v380_v13 = vld [vmem:[%s6224_s30 + $0x58] sm:$0xff] }
 0x145   : > { %2670 = vmatprep.subr.bf16.mxu0 %v5531_v10  ;;  %v5567_v10 = vld [vmem:[#allocation6 + $0x40c] ss:$16 sps:$4 sm:$0xff]  }
 0x146   : > { %2846 = vmatmul.mubr.bf16.gmra.mrb[52].mxu1 %v6336_v38  ;;  %v5544_v38 = vld [vmem:[#allocation6 + $0x388] ss:$16 sps:$4 sm:$0xff]  }
 0x147   : > { %2620 = vmatmul.mubr.bf16.gmra.mrb[20].mxu0 %v6428_v22  ;;  %2897 = vmatpush1.bf16.msra.mxu1 %v5532_v23  ;;  %v6460_v23 = vcombine.low %v372_v1, %v376_v61  ;;  %v5588_v61 = vld [vmem:[#allocation6 + $0x4ec] ss:$16 sps:$4 sm:$0xff]  }
 0x148   : > { %2671 = vmatpush1.bf16.msra.mxu0 %v5529_v21  ;;  %2898 = vmatprep.subr.bf16.mxu1 %v5540_v27  ;;  %v384_v21 = vld [vmem:[%s6224_s30 + $0x78] sm:$0xff] }
 0x149   : > { %2672 = vmatprep.subr.bf16.mxu0 %v5537_v14  ;;  %2629 = vmatprep.mubr.bf16.mxu0 %v6432_v34  ;;  %v6462_v26 = vcombine.high %v380_v13, %v384_v21  ;;  %v5568_v14 = vld [vmem:[#allocation6 + $0x428] ss:$16 sps:$4 sm:$0xff]   ;;  %v5573_v27 = vld [vmem:[#allocation6 + $0x44c] ss:$16 sps:$4 sm:$0xff]  }
 0x14a   : > { %2855 = vmatprep.mubr.bf16.mxu1 %v6342_v46  ;;  %v5547_v46 = vld [vmem:[#allocation6 + $0x7a0] ss:$16 sps:$4 sm:$0xff]  }
 0x14b   : > { %2899 = vmatpush1.bf16.msra.mxu1 %v5538_v32  ;;  %v392_v32 = vld [vmem:[%s6224_s30 + $0xb8] sm:$0xff] }
 0x14c   : > { %2673 = vmatpush1.bf16.msra.mxu0 %v5535_v24  ;;  %2900 = vmatprep.subr.bf16.mxu1 %v5546_v36  ;;  %v388_v24 = vld [vmem:[%s6224_s30 + $0x98] sm:$0xff] }
 0x14d   : > { %2674 = vmatprep.subr.bf16.mxu0 %v5543_v33  ;;  %v6470_v33 = vcombine.low %v380_v13, %v384_v21  ;;  %v5576_v36 = vld [vmem:[#allocation6 + $0x46c] ss:$16 sps:$4 sm:$0xff]   ;;  %v5661_v13 = vld [vmem:[#allocation9] ss:$8 sps:$4 sm:$0xff]  }
 0x14e   : > { %2856 = vmatmul.mubr.bf16.gmra.mrb[56].mxu1 %v6353_v59  ;;  %v5556_v59 = vld [vmem:[#allocation6 + $0x3c8] ss:$16 sps:$4 sm:$0xff]   ;;  %v5666_v21 = vld [vmem:[#allocation9 + $0x14] ss:$8 sps:$4 sm:$0xff]  }
 0x14f   : > { %2630 = vmatmul.mubr.bf16.gmra.mrb[24].mxu0 %v6438_v42  ;;  %2901 = vmatpush1.bf16.msra.mxu1 %v5544_v38  ;;  %v400_v38 = vld [vmem:[%s6224_s30 + $0xf8] sm:$0xff] }
 0x150   : > { %2675 = vmatpush1.bf16.msra.mxu0 %v5541_v37  ;;  %2902 = vmatprep.subr.bf16.mxu1 %v5552_v49  ;;  %v6472_v37 = vcombine.high %v388_v24, %v392_v32  ;;  %v5582_v49 = vld [vmem:[#allocation6 + $0x4ac] ss:$16 sps:$4 sm:$0xff]  }
 0x151   : > { %2676 = vmatprep.subr.bf16.mxu0 %v5549_v48  ;;  %2639 = vmatprep.mubr.bf16.mxu0 %v6442_v50  ;;  %v6480_v48 = vcombine.low %v388_v24, %v392_v32  ;;  %v5595_v24 = vld [vmem:[#allocation6 + $0x548] ss:$16 sps:$4 sm:$0xff]   ;;  %v5600_v32 = vld [vmem:[#allocation6 + $0x56c] ss:$16 sps:$4 sm:$0xff]  }
 0x152   : > { %2865 = vmatprep.mubr.bf16.mxu1 %v6358_v6  ;;  %v5562_v6 = vld [vmem:[#allocation6 + $0x3e8] ss:$16 sps:$4 sm:$0xff]  }
 0x153   : > { %2903 = vmatpush1.bf16.msra.mxu1 %v5550_v54  ;;  %v5585_v54 = vld [vmem:[#allocation6 + $0x4cc] ss:$16 sps:$4 sm:$0xff]  }
 0x154   : > { %2677 = vmatpush1.bf16.msra.mxu0 %v5547_v46  ;;  %2904 = vmatprep.subr.bf16.mxu1 %v5558_v57  ;;  %v6482_v46 = vcombine.high %v396_v44, %v400_v38  ;;  %v6490_v57 = vcombine.low %v396_v44, %v400_v38  ;;  %v432_v44 = vld [vmem:[%s6224_s30 + $0x1f8] sm:$0xff]  ;;  %v5667_v38 = vld [vmem:[#allocation9 + $0x20] ss:$8 sps:$4 sm:$0xff]  }
 0x155   : > { %2678 = vmatprep.subr.bf16.mxu0 %v5555_v56  ;;  %v404_v56 = vld [vmem:[%s6224_s30 + $0x118] sm:$0xff] }
 0x156   : > { %2866 = vmatmul.mubr.bf16.gmra.mrb[60].mxu1 %v6366_v16  ;;  %v5570_v16 = vld [vmem:[#allocation6 + $0x42c] ss:$16 sps:$4 sm:$0xff]  }
 0x157   : > { %2640 = vmatmul.mubr.bf16.gmra.mrb[28].mxu0 %v6449_v11  ;;  %2905 = vmatpush1.bf16.msra.mxu1 %v5556_v59  ;;  %v412_v59 = vld [vmem:[%s6224_s30 + $0x158] sm:$0xff] }
 0x158   : > { %2679 = vmatpush1.bf16.msra.mxu0 %v5553_v58  ;;  %2906 = vmatprep.subr.bf16.mxu1 %v5564_v3  ;;  %v5583_v58 = vld [vmem:[#allocation6 + $0x4c8] ss:$16 sps:$4 sm:$0xff]  }
 0x159   : > { %2680 = vmatprep.subr.bf16.mxu0 %v5561_v2  ;;  %2682 = vmatprep.mubr.bf16.mxu0 %v6452_v9  ;;  %v416_v2 = vld [vmem:[%s6224_s30 + $0x178] sm:$0xff] }
 0x15a   : > { %2908 = vmatprep.mubr.bf16.mxu1 %v6250_v55  ;;  %v5571_v55 = vld [vmem:[#allocation6 + $0x448] ss:$16 sps:$4 sm:$0xff]  }
 0x15b   : > { %2907 = vmatpush1.bf16.msra.mxu1 %v5562_v6  ;;  %v6502_v6 = vcombine.high %v412_v59, %v416_v2 }
 0x15c   : > { %2681 = vmatpush1.bf16.msra.mxu0 %v5559_v4  ;;  %2989 = vmatprep.subr.bf16.mxu1 %v5567_v10  ;;  %v5589_v4 = vld [vmem:[#allocation6 + $0x508] ss:$16 sps:$4 sm:$0xff]   ;;  %v5663_v10 = vld [vmem:[#allocation9 + $0x4] ss:$8 sps:$4 sm:$0xff]  }
 0x15d   : > { %3965 = vmatprep.subr.bf16.mxu0 %v5663_v10  ;;  %v5613_v10 = vld [vmem:[#allocation6 + $0x608] ss:$16 sps:$4 sm:$0xff]  }
 0x15e   : > { %2909 = vmatmul.mubr.bf16.vlgmr.msra.gmra.mrb[32].mxu1 %v6257_v12  ;;  %v5574_v12 = vld [vmem:[#allocation6 + $0x468] ss:$16 sps:$4 sm:$0xff]  }
 0x15f   : > { %2683 = vmatmul.mubr.bf16.vlgmr.msra.gmra.mrb[0].mxu0 %v6460_v23  ;;  %2990 = vmatpush1.bf16.msra.mxu1 %v5565_v28  ;;  %v5597_v28 = vld [vmem:[#allocation6 + $0x54c] ss:$16 sps:$4 sm:$0xff]  }
 0x160   : > { %2692 = vmatprep.mubr.bf16.mxu0 %v6462_v26  ;;  %2991 = vmatprep.subr.bf16.mxu1 %v5570_v16  ;;  %v420_v16 = vld [vmem:[%s6224_s30 + $0x198] sm:$0xff] }
 0x161   : > { %2918 = vmatprep.mubr.bf16.mxu1 %v6264_v19  ;;  %v5577_v19 = vld [vmem:[#allocation6 + $0x488] ss:$16 sps:$4 sm:$0xff]   ;;  %3966 = vmatpush1.bf16.msra.mxu0 %v5661_v13  ;;  %v5618_v13 = vld [vmem:[#allocation6 + $0x62c] ss:$16 sps:$4 sm:$0xff]  }
 0x162   : > { %3967 = vmatprep.subr.bf16.mxu0 %v5666_v21  ;;  %v5684_v21 = vld [vmem:[#allocation9 + $0x74] ss:$8 sps:$4 sm:$0xff]  }
 0x163   : > { %2992 = vmatpush1.bf16.msra.mxu1 %v5568_v14  ;;  %v424_v14 = vld [vmem:[%s6224_s30 + $0x1b8] sm:$0xff] }
 0x164   : > { %2993 = vmatprep.subr.bf16.mxu1 %v5573_v27  ;;  %v6510_v27 = vcombine.low %v412_v59, %v416_v2  ;;  %v5678_v59 = vld [vmem:[#allocation9 + $0x54] ss:$8 sps:$4 sm:$0xff]   ;;  %v5610_v2 = vld [vmem:[#allocation6 + $0x5e8] ss:$16 sps:$4 sm:$0xff]  }
 0x166   : > { %2919 = vmatmul.mubr.bf16.gmra.mrb[36].mxu1 %v6274_v29  ;;  %v5580_v29 = vld [vmem:[#allocation6 + $0x4a8] ss:$16 sps:$4 sm:$0xff]  }
 0x167   : > { %2693 = vmatmul.mubr.bf16.gmra.mrb[4].mxu0 %v6470_v33  ;;  %2994 = vmatpush1.bf16.msra.mxu1 %v5571_v55  ;;  %v5664_v55 = vld [vmem:[#allocation9 + $0x10] ss:$8 sps:$4 sm:$0xff]  }
 0x168   : > { %2702 = vmatprep.mubr.bf16.mxu0 %v6472_v37  ;;  %2995 = vmatprep.subr.bf16.mxu1 %v5576_v36  ;;  %v5598_v36 = vld [vmem:[#allocation6 + $0x568] ss:$16 sps:$4 sm:$0xff]  }
 0x169   : > { %2928 = vmatprep.mubr.bf16.mxu1 %v6280_v35  ;;  %v408_v35 = vld [vmem:[%s6224_s30 + $0x138] sm:$0xff]  ;;  %3968 = vmatpush1.bf16.msra.mxu0 %v5664_v55 }
 0x16a   : > { %v6492_v1 = vcombine.high %v404_v56, %v408_v35  ;;  %v6500_v3 = vcombine.low %v404_v56, %v408_v35  ;;  %v5604_v56 = vld [vmem:[#allocation6 + $0x5a8] ss:$16 sps:$4 sm:$0xff]   ;;  %v5675_v35 = vld [vmem:[#allocation9 + $0x44] ss:$8 sps:$4 sm:$0xff]   ;;  %v5690_v55 = vld [vmem:[#allocation9 + $0x94] ss:$8 sps:$4 sm:$0xff]  }
 0x16b   : > { %2996 = vmatpush1.bf16.msra.mxu1 %v5574_v12  ;;  %v5603_v12 = vld [vmem:[#allocation6 + $0x58c] ss:$16 sps:$4 sm:$0xff]  }
 0x16c   : > { %2997 = vmatprep.subr.bf16.mxu1 %v5579_v43  ;;  %v428_v43 = vld [vmem:[%s6224_s30 + $0x1d8] sm:$0xff] }
 0x16e   : > { %2929 = vmatmul.mubr.bf16.gmra.mrb[40].mxu1 %v6290_v45  ;;  %v5586_v45 = vld [vmem:[#allocation6 + $0x4e8] ss:$16 sps:$4 sm:$0xff]  }
 0x16f   : > { %2703 = vmatmul.mubr.bf16.gmra.mrb[8].mxu0 %v6480_v48  ;;  %2998 = vmatpush1.bf16.msra.mxu1 %v5577_v19  ;;  %v6520_v19 = vcombine.low %v420_v16, %v424_v14 }
 0x170   : > { %2712 = vmatprep.mubr.bf16.mxu0 %v6482_v46  ;;  %2999 = vmatprep.subr.bf16.mxu1 %v5582_v49  ;;  %v5601_v49 = vld [vmem:[#allocation6 + $0x588] ss:$16 sps:$4 sm:$0xff]  }
 0x171   : > { %2938 = vmatprep.mubr.bf16.mxu1 %v6296_v51  ;;  %v5591_v51 = vld [vmem:[#allocation6 + $0x50c] ss:$16 sps:$4 sm:$0xff]  }
 0x173   : > { %3000 = vmatpush1.bf16.msra.mxu1 %v5580_v29  ;;  %v6522_v29 = vcombine.high %v428_v43, %v432_v44 }
 0x174   : > { %3001 = vmatprep.subr.bf16.mxu1 %v5585_v54  ;;  %v5672_v54 = vld [vmem:[#allocation9 + $0x34] ss:$8 sps:$4 sm:$0xff]  }
 0x176   : > { %2939 = vmatmul.mubr.bf16.gmra.mrb[44].mxu1 %v6306_v62  ;;  %v5594_v62 = vld [vmem:[#allocation6 + $0x52c] ss:$16 sps:$4 sm:$0xff]  }
 0x177   : > { %2713 = vmatmul.mubr.bf16.gmra.mrb[12].mxu0 %v6490_v57  ;;  %3002 = vmatpush1.bf16.msra.mxu1 %v5583_v58  ;;  %v5609_v58 = vld [vmem:[#allocation6 + $0x5cc] ss:$16 sps:$4 sm:$0xff]  }
 0x178   : > { %2722 = vmatprep.mubr.bf16.mxu0 %v6492_v1  ;;  %3003 = vmatprep.subr.bf16.mxu1 %v5588_v61  ;;  %v6528_v61 = vcombine.low %v428_v43, %v432_v44  ;;  %v5630_v43 = vld [vmem:[#allocation6 + $0x6ac] ss:$16 sps:$4 sm:$0xff]   ;;  %v5691_v44 = vld [vmem:[#allocation9 + $0xa0] ss:$8 sps:$4 sm:$0xff]  }
 0x179   : > { %2948 = vmatprep.mubr.bf16.mxu1 %v6312_v5  ;;  %v5592_v5 = vld [vmem:[#allocation6 + $0x528] ss:$16 sps:$4 sm:$0xff]  }
 0x17b   : > { %3004 = vmatpush1.bf16.msra.mxu1 %v5586_v45  ;;  %v5607_v45 = vld [vmem:[#allocation6 + $0x5c8] ss:$16 sps:$4 sm:$0xff]  }
 0x17c   : > { %3005 = vmatprep.subr.bf16.mxu1 %v5591_v51  ;;  %v5612_v51 = vld [vmem:[#allocation6 + $0x5ec] ss:$16 sps:$4 sm:$0xff]  }
 0x17e   : > { %2949 = vmatmul.mubr.bf16.gmra.mrb[48].mxu1 %v6322_v15  ;;  %v6512_v15 = vcombine.high %v420_v16, %v424_v14  ;;  %v5687_v16 = vld [vmem:[#allocation9 + $0x84] ss:$8 sps:$4 sm:$0xff]   ;;  %v5619_v14 = vld [vmem:[#allocation6 + $0x648] ss:$16 sps:$4 sm:$0xff]  }
 0x17f   : > { %2723 = vmatmul.mubr.bf16.gmra.mrb[16].mxu0 %v6500_v3  ;;  %3006 = vmatpush1.bf16.msra.mxu1 %v5589_v4  ;;  %v5676_v4 = vld [vmem:[#allocation9 + $0x50] ss:$8 sps:$4 sm:$0xff]  }
 0x180   : > { %2732 = vmatprep.mubr.bf16.mxu0 %v6502_v6  ;;  %3007 = vmatprep.subr.bf16.mxu1 %v5594_v62  ;;  %v5681_v62 = vld [vmem:[#allocation9 + $0x64] ss:$8 sps:$4 sm:$0xff]  }
 0x181   : > { %2958 = vmatprep.mubr.bf16.mxu1 %v6328_v25  ;;  %v5669_v25 = vld [vmem:[#allocation9 + $0x24] ss:$8 sps:$4 sm:$0xff]  }
 0x182   : > { %3969 = vmatprep.subr.bf16.mxu0 %v5669_v25  ;;  %v5688_v25 = vld [vmem:[#allocation9 + $0x90] ss:$8 sps:$4 sm:$0xff]  }
 0x183   : > { %3008 = vmatpush1.bf16.msra.mxu1 %v5592_v5  ;;  %3970 = vmatpush1.bf16.msra.mxu0 %v5667_v38  ;;  %v5679_v5 = vld [vmem:[#allocation9 + $0x60] ss:$8 sps:$4 sm:$0xff]   ;;  %v5696_v38 = vld [vmem:[#allocation9 + $0xb4] ss:$8 sps:$4 sm:$0xff]  }
 0x184   : > { %3009 = vmatprep.subr.bf16.mxu1 %v5597_v28  ;;  %3971 = vmatprep.subr.bf16.mxu0 %v5672_v54  ;;  %v5682_v28 = vld [vmem:[#allocation9 + $0x70] ss:$8 sps:$4 sm:$0xff]   ;;  %v5699_v54 = vld [vmem:[#allocation9 + $0xc4] ss:$8 sps:$4 sm:$0xff]  }
 0x186   : > { %2959 = vmatmul.mubr.bf16.gmra.mrb[52].mxu1 %v6338_v39  ;;  %v5606_v39 = vld [vmem:[#allocation6 + $0x5ac] ss:$16 sps:$4 sm:$0xff]  }
 0x187   : > { %2733 = vmatmul.mubr.bf16.gmra.mrb[20].mxu0 %v6510_v27  ;;  %3010 = vmatpush1.bf16.msra.mxu1 %v5595_v24  ;;  %v5624_v24 = vld [vmem:[#allocation6 + $0x66c] ss:$16 sps:$4 sm:$0xff]  }
 0x188   : > { %2742 = vmatprep.mubr.bf16.mxu0 %v6512_v15  ;;  %3011 = vmatprep.subr.bf16.mxu1 %v5600_v32  ;;  %v5685_v32 = vld [vmem:[#allocation9 + $0x80] ss:$8 sps:$4 sm:$0xff]  }
 0x189   : > { %2968 = vmatprep.mubr.bf16.mxu1 %v6344_v47  ;;  %v5670_v47 = vld [vmem:[#allocation9 + $0x30] ss:$8 sps:$4 sm:$0xff]  }
 0x18a   : > { %3972 = vmatpush1.bf16.msra.mxu0 %v5670_v47 }
 0x18b   : > { %3012 = vmatpush1.bf16.msra.mxu1 %v5598_v36  ;;  %3973 = vmatprep.subr.bf16.mxu0 %v5675_v35  ;;  %v5693_v36 = vld [vmem:[#allocation9 + $0xa4] ss:$8 sps:$4 sm:$0xff]   ;;  %v5631_v35 = vld [vmem:[#allocation6 + $0x6c8] ss:$16 sps:$4 sm:$0xff]  }
 0x18c   : > { %3013 = vmatprep.subr.bf16.mxu1 %v5603_v12  ;;  %v5625_v12 = vld [vmem:[#allocation6 + $0x688] ss:$16 sps:$4 sm:$0xff]  }
 0x18e   : > { %2969 = vmatmul.mubr.bf16.gmra.mrb[56].mxu1 %v6355_v60  ;;  %v5673_v60 = vld [vmem:[#allocation9 + $0x40] ss:$8 sps:$4 sm:$0xff]  }
 0x18f   : > { %2743 = vmatmul.mubr.bf16.gmra.mrb[24].mxu0 %v6520_v19  ;;  %3014 = vmatpush1.bf16.msra.mxu1 %v5601_v49  ;;  %v5694_v49 = vld [vmem:[#allocation9 + $0xb0] ss:$8 sps:$4 sm:$0xff]  }
 0x190   : > { %2752 = vmatprep.mubr.bf16.mxu0 %v6522_v29  ;;  %3015 = vmatprep.subr.bf16.mxu1 %v5606_v39 }
 0x191   : > { %2978 = vmatprep.mubr.bf16.mxu1 %v6360_v7  ;;  %v5615_v7 = vld [vmem:[#allocation6 + $0x60c] ss:$16 sps:$4 sm:$0xff]   ;;  %3974 = vmatpush1.bf16.msra.mxu0 %v5673_v60 }
 0x192   : > { %3975 = vmatprep.subr.bf16.mxu0 %v5678_v59  ;;  %v5639_v60 = vld [vmem:[#allocation6 + $0x70c] ss:$16 sps:$4 sm:$0xff]   ;;  %v5700_v59 = vld [vmem:[#allocation9 + $0xd0] ss:$8 sps:$4 sm:$0xff]  }
 0x193   : > { %3016 = vmatpush1.bf16.msra.mxu1 %v5604_v56 }
 0x194   : > { %3017 = vmatprep.subr.bf16.mxu1 %v5609_v58 }
 0x195   : > { %3976 = vmatpush1.bf16.msra.mxu0 %v5676_v4 }
 0x196   : > { %2979 = vmatmul.mubr.bf16.gmra.mrb[60].mxu1 %v6368_v17  ;;  %3977 = vmatprep.subr.bf16.mxu0 %v5681_v62  ;;  %v5616_v17 = vld [vmem:[#allocation6 + $0x628] ss:$16 sps:$4 sm:$0xff]  }
 0x197   : > { %2753 = vmatmul.mubr.bf16.gmra.mrb[28].mxu0 %v6528_v61  ;;  %3018 = vmatpush1.bf16.msra.mxu1 %v5607_v45  ;;  %v5702_v45 = vld [vmem:[#allocation9 + $0xd4] ss:$8 sps:$4 sm:$0xff]  }
 0x198   : > { %3021 = vmatprep.mubr.bf16.mxu1 %v6372_v30  ;;  %3019 = vmatprep.subr.bf16.mxu1 %v5612_v51  ;;  %v5621_v30 = vld [vmem:[#allocation6 + $0x64c] ss:$16 sps:$4 sm:$0xff]   ;;  %v5634_v51 = vld [vmem:[#allocation6 + $0x6e8] ss:$16 sps:$4 sm:$0xff]  }
 0x199   : > { %3978 = vmatpush1.bf16.msra.mxu0 %v5679_v5  ;;  %v5708_v5 = vld [vmem:[#allocation9 + $0xf4] ss:$8 sps:$4 sm:$0xff]  }
 0x19a   : > { %3979 = vmatprep.subr.bf16.mxu0 %v5684_v21  ;;  %v5640_v21 = vld [vmem:[#allocation6 + $0x728] ss:$16 sps:$4 sm:$0xff]  }
 0x19b   : > { %3020 = vmatpush1.bf16.msra.mxu1 %v5610_v2 }
 0x19c   : > { %3102 = vmatprep.subr.bf16.mxu1 %v5615_v7  ;;  %v5705_v7 = vld [vmem:[#allocation9 + $0xe4] ss:$8 sps:$4 sm:$0xff]  }
 0x19d   : > { %3980 = vmatpush1.bf16.msra.mxu0 %v5682_v28 }
 0x19e   : > { %3022 = vmatmul.mubr.bf16.vlgmr.msra.gmra.mrb[32].mxu1 %v6378_v41  ;;  %3981 = vmatprep.subr.bf16.mxu0 %v5687_v16  ;;  %v5622_v41 = vld [vmem:[#allocation6 + $0x668] ss:$16 sps:$4 sm:$0xff]  }
 0x19f   : > { %3103 = vmatpush1.bf16.msra.mxu1 %v5613_v10  ;;  %3031 = vmatprep.mubr.bf16.mxu1 %v6382_v52  ;;  %v5627_v52 = vld [vmem:[#allocation6 + $0x68c] ss:$16 sps:$4 sm:$0xff]   ;;  %v5637_v10 = vld [vmem:[#allocation6 + $0x708] ss:$16 sps:$4 sm:$0xff]  }
 0x1a0   : > { %3104 = vmatprep.subr.bf16.mxu1 %v5618_v13 }
 0x1a1   : > { %3982 = vmatpush1.bf16.msra.mxu0 %v5685_v32 }
 0x1a2   : > { %3983 = vmatprep.subr.bf16.mxu0 %v5690_v55  ;;  %v5651_v55 = vld [vmem:[#allocation6 + $0x78c] ss:$16 sps:$4 sm:$0xff]  }
 0x1a3   : > { %3105 = vmatpush1.bf16.msra.mxu1 %v5616_v17  ;;  %v5645_v17 = vld [vmem:[#allocation6 + $0x74c] ss:$16 sps:$4 sm:$0xff]  }
 0x1a4   : > { %3106 = vmatprep.subr.bf16.mxu1 %v5621_v30  ;;  %v5706_v30 = vld [vmem:[#allocation9 + $0xf0] ss:$8 sps:$4 sm:$0xff]  }
 0x1a5   : > { %3984 = vmatpush1.bf16.msra.mxu0 %v5688_v25 }
 0x1a6   : > { %3032 = vmatmul.mubr.bf16.gmra.mrb[36].mxu1 %v6389_v63  ;;  %3985 = vmatprep.subr.bf16.mxu0 %v5693_v36  ;;  %v5628_v63 = vld [vmem:[#allocation6 + $0x6a8] ss:$16 sps:$4 sm:$0xff]  }
 0x1a7   : > { %3107 = vmatpush1.bf16.msra.mxu1 %v5619_v14  ;;  %3041 = vmatprep.mubr.bf16.mxu1 %v6392_v8  ;;  %v5633_v8 = vld [vmem:[#allocation6 + $0x6cc] ss:$16 sps:$4 sm:$0xff]   ;;  %v5649_v36 = vld [vmem:[#allocation6 + $0x788] ss:$16 sps:$4 sm:$0xff]  }
 0x1a8   : > { %3108 = vmatprep.subr.bf16.mxu1 %v5624_v24  ;;  %v5643_v24 = vld [vmem:[#allocation6 + $0x748] ss:$16 sps:$4 sm:$0xff]  }
 0x1a9   : > { %3986 = vmatpush1.bf16.msra.mxu0 %v5691_v44 }
 0x1aa   : > { %3987 = vmatprep.subr.bf16.mxu0 %v5696_v38 }
 0x1ab   : > { %3109 = vmatpush1.bf16.msra.mxu1 %v5622_v41 }
 0x1ac   : > { %3110 = vmatprep.subr.bf16.mxu1 %v5627_v52 }
 0x1ad   : > { %3988 = vmatpush1.bf16.msra.mxu0 %v5694_v49 }
 0x1ae   : > { %3042 = vmatmul.mubr.bf16.gmra.mrb[40].mxu1 %v6398_v20  ;;  %v5636_v20 = vld [vmem:[#allocation6 + $0x6ec] ss:$16 sps:$4 sm:$0xff]   ;;  %3989 = vmatprep.subr.bf16.mxu0 %v5699_v54 }
 0x1af   : > { %3111 = vmatpush1.bf16.msra.mxu1 %v5625_v12  ;;  %3051 = vmatprep.mubr.bf16.mxu1 %v6402_v31  ;;  %v5697_v31 = vld [vmem:[#allocation9 + $0xc0] ss:$8 sps:$4 sm:$0xff]   ;;  %v5660_v54 = vld [vmem:[#allocation6 + $0x7ec] ss:$16 sps:$4 sm:$0xff]  }
 0x1b0   : > { %3112 = vmatprep.subr.bf16.mxu1 %v5630_v43  ;;  %v5654_v43 = vld [vmem:[#allocation6 + $0x7ac] ss:$16 sps:$4 sm:$0xff]  }
 0x1b1   : > { %v6539_v39 = vpop.f32.mrb[0].mxu1  ;;  %3990 = vmatpush1.bf16.msra.mxu0 %v5697_v31 }
 0x1b2   : > { %v6541_v47 = vpop.f32.mrb[1].mxu1  ;;  %3991 = vmatprep.subr.bf16.mxu0 %v5702_v45 }
 0x1b3   : > { %v6543_v56 = vpop.f32.mrb[2].mxu1  ;;  %3113 = vmatpush1.bf16.msra.mxu1 %v5628_v63 }
 0x1b4   : > { %v6545_v58 = vpop.f32.mrb[3].mxu1  ;;  %3114 = vmatprep.subr.bf16.mxu1 %v5633_v8  ;;  %v5655_v8 = vld [vmem:[#allocation6 + $0x7c8] ss:$16 sps:$4 sm:$0xff]  }
 0x1b5   : > { %3992 = vmatpush1.bf16.msra.mxu0 %v5700_v59 }
 0x1b6   : > { %3052 = vmatmul.mubr.bf16.gmra.mrb[44].mxu1 %v6409_v40  ;;  %v5642_v40 = vld [vmem:[#allocation6 + $0x72c] ss:$16 sps:$4 sm:$0xff]   ;;  %3993 = vmatprep.subr.bf16.mxu0 %v5705_v7 }
 0x1b7   : > { %3115 = vmatpush1.bf16.msra.mxu1 %v5631_v35  ;;  %3061 = vmatprep.mubr.bf16.mxu1 %v6412_v53  ;;  %v5703_v53 = vld [vmem:[#allocation9 + $0xe0] ss:$8 sps:$4 sm:$0xff]  }
 0x1b8   : > { %3116 = vmatprep.subr.bf16.mxu1 %v5636_v20 }
 0x1b9   : > { %v6549_v2 = vpop.f32.mrb[4].mxu1  ;;  %3994 = vmatpush1.bf16.msra.mxu0 %v5703_v53 }
 0x1ba   : > { %v6551_v4 = vpop.f32.mrb[5].mxu1  ;;  %3995 = vmatprep.subr.bf16.mxu0 %v5708_v5 }
 0x1bb   : > { %v6553_v62 = vpop.f32.mrb[6].mxu1  ;;  %3117 = vmatpush1.bf16.msra.mxu1 %v5634_v51 }
 0x1bc   : > { %v6555_v13 = vpop.f32.mrb[7].mxu1  ;;  %3118 = vmatprep.subr.bf16.mxu1 %v5639_v60 }
 0x1bd   : > { %3996 = vmatpush1.bf16.msra.mxu0 %v5706_v30 }
 0x1be   : > { %3062 = vmatmul.mubr.bf16.gmra.mrb[48].mxu1 %v6419_v0  ;;  %v5648_v0 = vld [vmem:[#allocation6 + $0x76c] ss:$16 sps:$4 sm:$0xff]  }
 0x1bf   : > { %3119 = vmatpush1.bf16.msra.mxu1 %v5637_v10  ;;  %3071 = vmatprep.mubr.bf16.mxu1 %v6422_v18  ;;  %v5646_v18 = vld [vmem:[#allocation6 + $0x768] ss:$16 sps:$4 sm:$0xff]  }
 0x1c0   : > { %3120 = vmatprep.subr.bf16.mxu1 %v5642_v40 }
 0x1c1   : > { %v6559_v28 = vpop.f32.mrb[8].mxu1 }
 0x1c2   : > { %v6561_v16 = vpop.f32.mrb[9].mxu1 }
 0x1c3   : > { %v6563_v14 = vpop.f32.mrb[10].mxu1  ;;  %3121 = vmatpush1.bf16.msra.mxu1 %v5640_v21 }
 0x1c4   : > { %v6565_v32 = vpop.f32.mrb[11].mxu1  ;;  %3122 = vmatprep.subr.bf16.mxu1 %v5645_v17 }
 0x1c6   : > { %3072 = vmatmul.mubr.bf16.gmra.mrb[52].mxu1 %v6428_v22  ;;  %v5652_v22 = vld [vmem:[#allocation6 + $0x7a8] ss:$16 sps:$4 sm:$0xff]  }
 0x1c7   : > { %3123 = vmatpush1.bf16.msra.mxu1 %v5643_v24  ;;  %3081 = vmatprep.mubr.bf16.mxu1 %v6432_v34  ;;  %v5657_v34 = vld [vmem:[#allocation6 + $0x7cc] ss:$16 sps:$4 sm:$0xff]   ;;  %v3409_v24 = vld [vmem:[%s6234_s0] sm:$0xff] }
 0x1c8   : > { %3124 = vmatprep.subr.bf16.mxu1 %v5648_v0 }
 0x1c9   : > { %v6569_v41 = vpop.f32.mrb[12].mxu1 }
 0x1ca   : > { %v6571_v52 = vpop.f32.mrb[13].mxu1 }
 0x1cb   : > { %v6573_v25 = vpop.f32.mrb[14].mxu1  ;;  %3125 = vmatpush1.bf16.msra.mxu1 %v5646_v18  ;;  %v3413_v18 = vld [vmem:[%s6234_s0 + $0x20] sm:$0xff] }
 0x1cc   : > { %v6575_v12 = vpop.f32.mrb[15].mxu1  ;;  %3126 = vmatprep.subr.bf16.mxu1 %v5651_v55 }
 0x1ce   : > { %3082 = vmatmul.mubr.bf16.gmra.mrb[56].mxu1 %v6438_v42  ;;  %v5658_v42 = vld [vmem:[#allocation6 + $0x7e8] ss:$16 sps:$4 sm:$0xff]  }
 0x1cf   : > { %3127 = vmatpush1.bf16.msra.mxu1 %v5649_v36  ;;  %3091 = vmatprep.mubr.bf16.mxu1 %v6442_v50  ;;  %v3410_v36 = vld [vmem:[%s6234_s0 + $0x8] sm:$0xff] }
 0x1d0   : > { %3128 = vmatprep.subr.bf16.mxu1 %v5654_v43  ;;  %v3414_v43 = vld [vmem:[%s6234_s0 + $0x28] sm:$0xff] }
 0x1d1   : > { %v6579_v44 = vpop.f32.mrb[16].mxu1 }
 0x1d2   : > { %v6581_v38 = vpop.f32.mrb[17].mxu1 }
 0x1d3   : > { %v6583_v63 = vpop.f32.mrb[18].mxu1  ;;  %3129 = vmatpush1.bf16.msra.mxu1 %v5652_v22 }
 0x1d4   : > { %v6585_v49 = vpop.f32.mrb[19].mxu1  ;;  %3130 = vmatprep.subr.bf16.mxu1 %v5657_v34 }
 0x1d6   : > { %3092 = vmatmul.mubr.bf16.gmra.mrb[60].mxu1 %v6449_v11 }
 0x1d7   : > { %3131 = vmatpush1.bf16.msra.mxu1 %v5655_v8  ;;  %3134 = vmatprep.mubr.bf16.mxu1 %v6452_v9 }
 0x1d8   : > { %3132 = vmatprep.subr.bf16.mxu1 %v5660_v54 }
 0x1d9   : > { %v6589_v50 = vpop.f32.mrb[20].mxu1 }
 0x1da   : > { %v6591_v35 = vpop.f32.mrb[21].mxu1 }
 0x1db   : > { %v6593_v20 = vpop.f32.mrb[22].mxu1  ;;  %3133 = vmatpush1.bf16.msra.mxu1 %v5658_v42 }
 0x1dc   : > { %v6595_v31 = vpop.f32.mrb[23].mxu1 }
 0x1de   : > { %3135 = vmatmul.mubr.bf16.vlgmr.msra.gmra.mrb[32].mxu1 %v6460_v23 }
 0x1df   : > { %3144 = vmatprep.mubr.bf16.mxu1 %v6462_v26  ;;  %v5711_v26 = vld [vmem:[#allocation9 + $0x104] ss:$8 sps:$4 sm:$0xff]  }
 0x1e0   : > { %4078 = vmatprep.subr.bf16.mxu0 %v5711_v26 }
 0x1e1   : > { %v6599_v45 = vpop.f32.mrb[24].mxu1 }
 0x1e2   : > { %v6601_v11 = vpop.f32.mrb[25].mxu1 }
 0x1e3   : > { %v6603_v51 = vpop.f32.mrb[26].mxu1 }
 0x1e4   : > { %v6605_v9 = vpop.f32.mrb[27].mxu1 }
 0x1e6   : > { %3145 = vmatmul.mubr.bf16.gmra.mrb[36].mxu1 %v6470_v33  ;;  %v691_v33 = vlaneseq }
 0x1e7   : > { %3154 = vmatprep.mubr.bf16.mxu1 %v6472_v37 }
 0x1e8   : > { %v6628_v37 = vshrl.u32 %v691_v33, 7 }
 0x1e9   : > { %v6609_v60 = vpop.f32.mrb[28].mxu1 }
 0x1ea   : > { %v6611_v59 = vpop.f32.mrb[29].mxu1 }
 0x1eb   : > { %v6613_v7 = vpop.f32.mrb[30].mxu1 }
 0x1ec   : > { %v6615_v23 = vpop.f32.mrb[31].mxu1 }
 0x1ee   : > { %3155 = vmatmul.mubr.bf16.gmra.mrb[40].mxu1 %v6480_v48  ;;  %v693_v48 = vsub.s32 0, %v6628_v37 }
 0x1ef   : > { %3164 = vmatprep.mubr.bf16.mxu1 %v6482_v46  ;;  %v6634_v46 = vld [vmem:[%s6996_s2] sm:$0xf] }
 0x1f6   : > { %3165 = vmatmul.mubr.bf16.gmra.mrb[44].mxu1 %v6490_v57  ;;  %v697_v57 = vsub.s32 1, %v6628_v37 }
 0x1f7   : > { %3174 = vmatprep.mubr.bf16.mxu1 %v6492_v1  ;;  %v6640_v1 = vrot.slane %v6634_v46, %v693_v48 }
 0x1f9   : > { %v2356_v22 = vadd.f32 %v6549_v2, %v6640_v1 }
 0x1fe   : > { %3175 = vmatmul.mubr.bf16.gmra.mrb[48].mxu1 %v6500_v3  ;;  %v6645_v3 = vrot.slane %v6634_v46, %v697_v57 }
 0x1ff   : > { %3184 = vmatprep.mubr.bf16.mxu1 %v6502_v6  ;;  %v2346_v6 = vadd.f32 %v6539_v39, %v6640_v1 }
 0x200   : > { %v2352_v40 = vadd.f32 %v6545_v58, %v6645_v3  ;;  %v2358_v8 = vadd.f32 %v6551_v4, %v6645_v3 }
 0x206   : > { %3185 = vmatmul.mubr.bf16.gmra.mrb[52].mxu1 %v6510_v27  ;;  %v2348_v27 = vadd.f32 %v6541_v47, %v6645_v3 }
 0x207   : > { %3194 = vmatprep.mubr.bf16.mxu1 %v6512_v15 }
 0x20e   : > { %3195 = vmatmul.mubr.bf16.gmra.mrb[56].mxu1 %v6520_v19  ;;  %v6651_v19 = vstv %s3215_s11 }
 0x20f   : > { %3204 = vmatprep.mubr.bf16.mxu1 %v6522_v29  ;;  %v2350_v29 = vadd.f32 %v6543_v56, %v6640_v1 }
 0x216   : > { %3205 = vmatmul.mubr.bf16.gmra.mrb[60].mxu1 %v6528_v61 }
 0x232   : > { %v2684_v15 = vpop.f32.mrb[0].mxu0 }
 0x233   : > { %v4878_v61 = vadd.f32 %v2684_v15, %v2346_v6  ;;  %v2686_v10 = vpop.f32.mrb[1].mxu0  ;;  %v2360_v6 = vadd.f32 %v6553_v62, %v6640_v1  ;;  %v5709_v62 = vld [vmem:[#allocation9 + $0x100] ss:$8 sps:$4 sm:$0xff]  }
 0x234   : > { %v4880_v53 = vadd.f32 %v2686_v10, %v2348_v27  ;;  %v2688_v5 = vpop.f32.mrb[2].mxu0  ;;  %v2362_v10 = vadd.f32 %v6555_v13, %v6645_v3 }
 0x235   : > { %vm3216_vm0 = vcmp.gt.f32.partialorder %v4878_v61, 0.0  ;;  %v3281_v39 = vmul.f32 %v4878_v61, %v6651_v19  ;;  %v4882_v47 = vadd.f32 %v2688_v5, %v2350_v29  ;;  %v2690_v21 = vpop.f32.mrb[3].mxu0 }
 0x236   : > { %vm3217_vm1 = vcmp.gt.f32.partialorder %v4880_v53, 0.0  ;;  %v3282_v17 = vmul.f32 %v4880_v53, %v6651_v19  ;;  %v4884_v30 = vadd.f32 %v2690_v21, %v2352_v40 }
 0x237   : > { %v3345_v56 = vsel %vm3216_vm0, %v4878_v61, %v3281_v39  ;;  %vm3220_vm2 = vcmp.gt.f32.partialorder %v4882_v47, 0.0  ;;  %v3285_v0 = vmul.f32 %v4882_v47, %v6651_v19 }
 0x238   : > { %v3346_v58 = vsel %vm3217_vm1, %v4880_v53, %v3282_v17  ;;  %vm3221_vm3 = vcmp.gt.f32.partialorder %v4884_v30, 0.0  ;;  %v3286_v55 = vmul.f32 %v4884_v30, %v6651_v19  ;;  %v3473_v54 = vmul.f32 %v3409_v24, %v3345_v56  ;;  %v3417_v24 = vld [vmem:[%s6234_s0 + $0x40] sm:$0xff] }
 0x239   : > { %v3349_v34 = vsel %vm3220_vm2, %v4882_v47, %v3285_v0  ;;  %v3474_v29 = vmul.f32 %v3410_v36, %v3346_v58  ;;  %v3421_v0 = vld [vmem:[%s6234_s0 + $0x60] sm:$0xff]  ;;  %v3422_v36 = vld [vmem:[%s6234_s0 + $0x68] sm:$0xff] }
 0x23a   : > { %v3477_v42 = vmul.f32 %v3413_v18, %v3349_v34  ;;  %v3350_v26 = vsel %vm3221_vm3, %v4884_v30, %v3286_v55  ;;  %v2694_v33 = vpop.f32.mrb[4].mxu0  ;;  %v5714_v30 = vld [vmem:[#allocation9 + $0x114] ss:$8 sps:$4 sm:$0xff]   ;;  %v3418_v55 = vld [vmem:[%s6234_s0 + $0x48] sm:$0xff]  ;;  %v5712_v34 = vld [vmem:[#allocation9 + $0x110] ss:$8 sps:$4 sm:$0xff]  }
 0x23b   : > { %v4886_v27 = vadd.f32 %v2694_v33, %v2356_v22  ;;  %v2696_v15 = vpop.f32.mrb[5].mxu0  ;;  %v3478_v61 = vmul.f32 %v3414_v43, %v3350_v26  ;;  %v2366_v43 = vadd.f32 %v6559_v28, %v6640_v1  ;;  %v2372_v28 = vadd.f32 %v6565_v32, %v6645_v3  ;;  %v5720_v32 = vld [vmem:[#allocation9 + $0x134] ss:$8 sps:$4 sm:$0xff]  }
 0x23c   : > { %v3537_v40 = vpack.c.bf16 %v3477_v42, %v3473_v54  ;;  %v4888_v2 = vadd.f32 %v2696_v15, %v2358_v8  ;;  %v2698_v53 = vpop.f32.mrb[6].mxu0  ;;  %v2368_v8 = vadd.f32 %v6561_v16, %v6645_v3 }
 0x23d   : > { %vm3224_vm4 = vcmp.gt.f32.partialorder %v4886_v27, 0.0  ;;  %v3289_v4 = vmul.f32 %v4886_v27, %v6651_v19  ;;  %v4890_v5 = vadd.f32 %v2698_v53, %v2360_v6  ;;  %v2700_v39 = vpop.f32.mrb[7].mxu0  ;;  %v3538_v47 = vpack.c.bf16 %v3478_v61, %v3474_v29  ;;  %v5717_v6 = vld [vmem:[#allocation9 + $0x124] ss:$8 sps:$4 sm:$0xff]  }
 0x23e   : > { %vm3225_vm5 = vcmp.gt.f32.partialorder %v4888_v2, 0.0  ;;  %v3290_v21 = vmul.f32 %v4888_v2, %v6651_v19  ;;  %v4892_v17 = vadd.f32 %v2700_v39, %v2362_v10 }
 0x23f   : > { %v3353_v13 = vsel %vm3224_vm4, %v4886_v27, %v3289_v4  ;;  %vm3228_vm6 = vcmp.gt.f32.partialorder %v4890_v5, 0.0  ;;  %v3293_v56 = vmul.f32 %v4890_v5, %v6651_v19  ;;  %3997 = vmatprep.mubr.bf16.mxu0 %v3538_v47  ;;  %v2370_v27 = vadd.f32 %v6563_v14, %v6640_v1  ;;  %v5715_v14 = vld [vmem:[#allocation9 + $0x120] ss:$8 sps:$4 sm:$0xff]  }
 0x240   : > { %v3354_v18 = vsel %vm3225_vm5, %v4888_v2, %v3290_v21  ;;  %vm3229_vm7 = vcmp.gt.f32.partialorder %v4892_v17, 0.0  ;;  %v3294_v58 = vmul.f32 %v4892_v17, %v6651_v19  ;;  %3998 = vmatmul.mubr.bf16.vlgmr.msra.gmra.mrb[32].mxu0 %v3537_v40  ;;  %v3481_v26 = vmul.f32 %v3417_v24, %v3353_v13  ;;  %v3429_v13 = vld [vmem:[%s6234_s0 + $0xa0] sm:$0xff] }
 0x241   : > { %v3357_v22 = vsel %vm3228_vm6, %v4890_v5, %v3293_v56  ;;  %4079 = vmatpush1.bf16.msra.mxu0 %v5709_v62  ;;  %v3482_v61 = vmul.f32 %v3418_v55, %v3354_v18  ;;  %v3430_v18 = vld [vmem:[%s6234_s0 + $0xa8] sm:$0xff] }
 0x242   : > { %v3358_v54 = vsel %vm3229_vm7, %v4892_v17, %v3294_v58  ;;  %v2704_v42 = vpop.f32.mrb[8].mxu0  ;;  %v3485_v33 = vmul.f32 %v3421_v0, %v3357_v22  ;;  %4080 = vmatprep.subr.bf16.mxu0 %v5714_v30  ;;  %v3425_v30 = vld [vmem:[%s6234_s0 + $0x80] sm:$0xff]  ;;  %v3426_v0 = vld [vmem:[%s6234_s0 + $0x88] sm:$0xff]  ;;  %v2376_v58 = vadd.f32 %v6569_v41, %v6640_v1  ;;  %v2382_v41 = vadd.f32 %v6575_v12, %v6645_v3  ;;  %v5726_v12 = vld [vmem:[#allocation9 + $0x154] ss:$8 sps:$4 sm:$0xff]  }
 0x243   : > { %v4894_v15 = vadd.f32 %v2704_v42, %v2366_v43  ;;  %v2706_v29 = vpop.f32.mrb[9].mxu0  ;;  %v3486_v10 = vmul.f32 %v3422_v36, %v3358_v54  ;;  %v5718_v36 = vld [vmem:[#allocation9 + $0x130] ss:$8 sps:$4 sm:$0xff]   ;;  %v2378_v43 = vadd.f32 %v6571_v52, %v6645_v3  ;;  %v5723_v42 = vld [vmem:[#allocation9 + $0x144] ss:$8 sps:$4 sm:$0xff]  }
 0x244   : > { %v4896_v40 = vadd.f32 %v2706_v29, %v2368_v8  ;;  %v2708_v2 = vpop.f32.mrb[10].mxu0  ;;  %v3541_v53 = vpack.c.bf16 %v3485_v33, %v3481_v26  ;;  %v2380_v26 = vadd.f32 %v6573_v25, %v6640_v1  ;;  %v5721_v25 = vld [vmem:[#allocation9 + $0x140] ss:$8 sps:$4 sm:$0xff]  }
 0x245   : > { %vm3232_vm8 = vcmp.gt.f32.partialorder %v4894_v15, 0.0  ;;  %v3297_v16 = vmul.f32 %v4894_v15, %v6651_v19  ;;  %v4898_v4 = vadd.f32 %v2708_v2, %v2370_v27  ;;  %v2710_v5 = vpop.f32.mrb[11].mxu0  ;;  %v3542_v39 = vpack.c.bf16 %v3486_v10, %v3482_v61  ;;  %4081 = vmatpush1.bf16.msra.mxu0 %v5712_v34 }
 0x246   : > { %vm3233_vm9 = vcmp.gt.f32.partialorder %v4896_v40, 0.0  ;;  %v3298_v47 = vmul.f32 %v4896_v40, %v6651_v19  ;;  %v4900_v62 = vadd.f32 %v2710_v5, %v2372_v28  ;;  %4082 = vmatprep.subr.bf16.mxu0 %v5717_v6 }
 0x247   : > { %v3361_v21 = vsel %vm3232_vm8, %v4894_v15, %v3297_v16  ;;  %vm3236_vm10 = vcmp.gt.f32.partialorder %v4898_v4, 0.0  ;;  %v3301_v17 = vmul.f32 %v4898_v4, %v6651_v19  ;;  %4007 = vmatprep.mubr.bf16.mxu0 %v3542_v39  ;;  %v3433_v39 = vld [vmem:[%s6234_s0 + $0xc0] sm:$0xff] }
 0x248   : > { %v3362_v56 = vsel %vm3233_vm9, %v4896_v40, %v3298_v47  ;;  %vm3237_vm11 = vcmp.gt.f32.partialorder %v4900_v62, 0.0  ;;  %v3302_v24 = vmul.f32 %v4900_v62, %v6651_v19  ;;  %4008 = vmatmul.mubr.bf16.gmra.mrb[36].mxu0 %v3541_v53  ;;  %v3489_v8 = vmul.f32 %v3425_v30, %v3361_v21  ;;  %v3438_v21 = vld [vmem:[%s6234_s0 + $0xe8] sm:$0xff] }
 0x249   : > { %v3365_v55 = vsel %vm3236_vm10, %v4898_v4, %v3301_v17  ;;  %4083 = vmatpush1.bf16.msra.mxu0 %v5715_v14  ;;  %v3490_v27 = vmul.f32 %v3426_v0, %v3362_v56  ;;  %v3437_v14 = vld [vmem:[%s6234_s0 + $0xe0] sm:$0xff]  ;;  %v2386_v17 = vadd.f32 %v6579_v44, %v6640_v1  ;;  %v2388_v56 = vadd.f32 %v6581_v38, %v6645_v3 }
 0x24a   : > { %v3366_v22 = vsel %vm3237_vm11, %v4900_v62, %v3302_v24  ;;  %v2714_v34 = vpop.f32.mrb[12].mxu0  ;;  %v3493_v54 = vmul.f32 %v3429_v13, %v3365_v55  ;;  %4084 = vmatprep.subr.bf16.mxu0 %v5720_v32  ;;  %v3434_v32 = vld [vmem:[%s6234_s0 + $0xc8] sm:$0xff]  ;;  %v5724_v13 = vld [vmem:[#allocation9 + $0x150] ss:$8 sps:$4 sm:$0xff]   ;;  %v2392_v44 = vadd.f32 %v6585_v49, %v6645_v3  ;;  %v5732_v49 = vld [vmem:[#allocation9 + $0x174] ss:$8 sps:$4 sm:$0xff]  }
 0x24b   : > { %v4902_v33 = vadd.f32 %v2714_v34, %v2376_v58  ;;  %v2716_v6 = vpop.f32.mrb[13].mxu0  ;;  %v3494_v15 = vmul.f32 %v3430_v18, %v3366_v22  ;;  %v5729_v55 = vld [vmem:[#allocation9 + $0x164] ss:$8 sps:$4 sm:$0xff]  }
 0x24c   : > { %v4904_v29 = vadd.f32 %v2716_v6, %v2378_v43  ;;  %v2718_v61 = vpop.f32.mrb[14].mxu0  ;;  %v3545_v10 = vpack.c.bf16 %v3493_v54, %v3489_v8 }
 0x24d   : > { %vm3240_vm12 = vcmp.gt.f32.partialorder %v4902_v33, 0.0  ;;  %v3305_v52 = vmul.f32 %v4902_v33, %v6651_v19  ;;  %v4906_v28 = vadd.f32 %v2718_v61, %v2380_v26  ;;  %v2720_v40 = vpop.f32.mrb[15].mxu0  ;;  %v3546_v2 = vpack.c.bf16 %v3494_v15, %v3490_v27  ;;  %4085 = vmatpush1.bf16.msra.mxu0 %v5718_v36 }
 0x24e   : > { %vm3241_vm13 = vcmp.gt.f32.partialorder %v4904_v29, 0.0  ;;  %v3306_v53 = vmul.f32 %v4904_v29, %v6651_v19  ;;  %v4908_v16 = vadd.f32 %v2720_v40, %v2382_v41  ;;  %4086 = vmatprep.subr.bf16.mxu0 %v5723_v42  ;;  %v2390_v36 = vadd.f32 %v6583_v63, %v6640_v1  ;;  %v5727_v63 = vld [vmem:[#allocation9 + $0x160] ss:$8 sps:$4 sm:$0xff]  }
 0x24f   : > { %v3369_v4 = vsel %vm3240_vm12, %v4902_v33, %v3305_v52  ;;  %vm3244_vm14 = vcmp.gt.f32.partialorder %v4906_v28, 0.0  ;;  %v3309_v5 = vmul.f32 %v4906_v28, %v6651_v19  ;;  %4017 = vmatprep.mubr.bf16.mxu0 %v3546_v2  ;;  %v3445_v52 = vld [vmem:[%s6234_s0 + $0x120] sm:$0xff]  ;;  %v3442_v2 = vld [vmem:[%s6234_s0 + $0x108] sm:$0xff] }
 0x250   : > { %v3370_v47 = vsel %vm3241_vm13, %v4904_v29, %v3306_v53  ;;  %vm3245_vm15 = vcmp.gt.f32.partialorder %v4908_v16, 0.0  ;;  %v3310_v62 = vmul.f32 %v4908_v16, %v6651_v19  ;;  %4018 = vmatmul.mubr.bf16.gmra.mrb[40].mxu0 %v3545_v10  ;;  %v3497_v18 = vmul.f32 %v3433_v39, %v3369_v4  ;;  %v3441_v10 = vld [vmem:[%s6234_s0 + $0x100] sm:$0xff] }
 0x251   : > { %v3373_v30 = vsel %vm3244_vm14, %v4906_v28, %v3309_v5  ;;  %4087 = vmatpush1.bf16.msra.mxu0 %v5721_v25  ;;  %v3498_v34 = vmul.f32 %v3434_v32, %v3370_v47  ;;  %v3446_v25 = vld [vmem:[%s6234_s0 + $0x128] sm:$0xff]  ;;  %v2396_v53 = vadd.f32 %v6589_v50, %v6640_v1  ;;  %v2398_v4 = vadd.f32 %v6591_v35, %v6645_v3 }
 0x252   : > { %v3374_v24 = vsel %vm3245_vm15, %v4908_v16, %v3310_v62  ;;  %v2724_v0 = vpop.f32.mrb[16].mxu0  ;;  %v3501_v58 = vmul.f32 %v3437_v14, %v3373_v30  ;;  %4088 = vmatprep.subr.bf16.mxu0 %v5726_v12  ;;  %v5730_v12 = vld [vmem:[#allocation9 + $0x170] ss:$8 sps:$4 sm:$0xff]   ;;  %v5735_v62 = vld [vmem:[#allocation9 + $0x184] ss:$8 sps:$4 sm:$0xff]   ;;  %v2400_v32 = vadd.f32 %v6593_v20, %v6640_v1  ;;  %v2402_v50 = vadd.f32 %v6595_v31, %v6645_v3 }
 0x253   : > { %v4910_v43 = vadd.f32 %v2724_v0, %v2386_v17  ;;  %v2726_v22 = vpop.f32.mrb[17].mxu0  ;;  %v3502_v8 = vmul.f32 %v3438_v21, %v3374_v24  ;;  %v5733_v20 = vld [vmem:[#allocation9 + $0x180] ss:$8 sps:$4 sm:$0xff]   ;;  %v5738_v31 = vld [vmem:[#allocation9 + $0x194] ss:$8 sps:$4 sm:$0xff]  }
 0x254   : > { %v4912_v54 = vadd.f32 %v2726_v22, %v2388_v56  ;;  %v2728_v42 = vpop.f32.mrb[18].mxu0  ;;  %v3549_v26 = vpack.c.bf16 %v3501_v58, %v3497_v18 }
 0x255   : > { %vm3248_vm0 = vcmp.gt.f32.partialorder %v4910_v43, 0.0  ;;  %v3313_v38 = vmul.f32 %v4910_v43, %v6651_v19  ;;  %v4914_v33 = vadd.f32 %v2728_v42, %v2390_v36  ;;  %v2730_v6 = vpop.f32.mrb[19].mxu0  ;;  %v3550_v27 = vpack.c.bf16 %v3502_v8, %v3498_v34  ;;  %4089 = vmatpush1.bf16.msra.mxu0 %v5724_v13  ;;  %v3449_v8 = vld [vmem:[%s6234_s0 + $0x140] sm:$0xff] }
 0x256   : > { %vm3249_vm1 = vcmp.gt.f32.partialorder %v4912_v54, 0.0  ;;  %v3314_v15 = vmul.f32 %v4912_v54, %v6651_v19  ;;  %v4916_v41 = vadd.f32 %v2730_v6, %v2392_v44  ;;  %4090 = vmatprep.subr.bf16.mxu0 %v5729_v55  ;;  %v3453_v44 = vld [vmem:[%s6234_s0 + $0x160] sm:$0xff] }
 0x257   : > { %v3377_v29 = vsel %vm3248_vm0, %v4910_v43, %v3313_v38  ;;  %vm3252_vm2 = vcmp.gt.f32.partialorder %v4914_v33, 0.0  ;;  %v3317_v61 = vmul.f32 %v4914_v33, %v6651_v19  ;;  %4027 = vmatprep.mubr.bf16.mxu0 %v3550_v27  ;;  %v3454_v38 = vld [vmem:[%s6234_s0 + $0x168] sm:$0xff]  ;;  %v5736_v27 = vld [vmem:[#allocation9 + $0x190] ss:$8 sps:$4 sm:$0xff]  }
 0x258   : > { %v3378_v28 = vsel %vm3249_vm1, %v4912_v54, %v3314_v15  ;;  %vm3253_vm3 = vcmp.gt.f32.partialorder %v4916_v41, 0.0  ;;  %v3318_v40 = vmul.f32 %v4916_v41, %v6651_v19  ;;  %4028 = vmatmul.mubr.bf16.gmra.mrb[44].mxu0 %v3549_v26  ;;  %v3505_v14 = vmul.f32 %v3441_v10, %v3377_v29  ;;  %v3450_v26 = vld [vmem:[%s6234_s0 + $0x148] sm:$0xff] }
 0x259   : > { %v3381_v16 = vsel %vm3252_vm2, %v4914_v33, %v3317_v61  ;;  %4091 = vmatpush1.bf16.msra.mxu0 %v5727_v63  ;;  %v3506_v30 = vmul.f32 %v3442_v2, %v3378_v28  ;;  %v2406_v33 = vadd.f32 %v6599_v45, %v6640_v1  ;;  %v2408_v63 = vadd.f32 %v6601_v11, %v6645_v3  ;;  %v5741_v61 = vld [vmem:[#allocation9 + $0x1a4] ss:$8 sps:$4 sm:$0xff]  }
 0x25a   : > { %v3382_v5 = vsel %vm3253_vm3, %v4916_v41, %v3318_v40  ;;  %v2734_v39 = vpop.f32.mrb[20].mxu0  ;;  %v3509_v47 = vmul.f32 %v3445_v52, %v3381_v16  ;;  %4092 = vmatprep.subr.bf16.mxu0 %v5732_v49  ;;  %v2410_v10 = vadd.f32 %v6603_v51, %v6640_v1  ;;  %v2412_v45 = vadd.f32 %v6605_v9, %v6645_v3  ;;  %v5739_v51 = vld [vmem:[#allocation9 + $0x1a0] ss:$8 sps:$4 sm:$0xff]   ;;  %v5744_v9 = vld [vmem:[#allocation9 + $0x1b4] ss:$8 sps:$4 sm:$0xff]  }
 0x25b   : > { %v4918_v21 = vadd.f32 %v2734_v39, %v2396_v53  ;;  %v2736_v17 = vpop.f32.mrb[21].mxu0  ;;  %v3510_v13 = vmul.f32 %v3446_v25, %v3382_v5 }
 0x25c   : > { %v4920_v56 = vadd.f32 %v2736_v17, %v2398_v4  ;;  %v2738_v24 = vpop.f32.mrb[22].mxu0  ;;  %v3553_v0 = vpack.c.bf16 %v3509_v47, %v3505_v14 }
 0x25d   : > { %vm3256_vm4 = vcmp.gt.f32.partialorder %v4918_v21, 0.0  ;;  %v3321_v35 = vmul.f32 %v4918_v21, %v6651_v19  ;;  %v4922_v18 = vadd.f32 %v2738_v24, %v2400_v32  ;;  %v2740_v58 = vpop.f32.mrb[23].mxu0  ;;  %v3554_v55 = vpack.c.bf16 %v3510_v13, %v3506_v30  ;;  %4093 = vmatpush1.bf16.msra.mxu0 %v5730_v12  ;;  %v3457_v32 = vld [vmem:[%s6234_s0 + $0x180] sm:$0xff]  ;;  %v3458_v13 = vld [vmem:[%s6234_s0 + $0x188] sm:$0xff] }
 0x25e   : > { %vm3257_vm5 = vcmp.gt.f32.partialorder %v4920_v56, 0.0  ;;  %v3322_v36 = vmul.f32 %v4920_v56, %v6651_v19  ;;  %v4924_v43 = vadd.f32 %v2740_v58, %v2402_v50  ;;  %4094 = vmatprep.subr.bf16.mxu0 %v5735_v62  ;;  %v3462_v50 = vld [vmem:[%s6234_s0 + $0x1a8] sm:$0xff] }
 0x25f   : > { %v3385_v22 = vsel %vm3256_vm4, %v4918_v21, %v3321_v35  ;;  %vm3260_vm6 = vcmp.gt.f32.partialorder %v4922_v18, 0.0  ;;  %v3325_v34 = vmul.f32 %v4922_v18, %v6651_v19  ;;  %4037 = vmatprep.mubr.bf16.mxu0 %v3554_v55  ;;  %v3461_v21 = vld [vmem:[%s6234_s0 + $0x1a0] sm:$0xff]  ;;  %v2418_v35 = vadd.f32 %v6611_v59, %v6645_v3 }
 0x260   : > { %v3386_v54 = vsel %vm3257_vm5, %v4920_v56, %v3322_v36  ;;  %vm3261_vm7 = vcmp.gt.f32.partialorder %v4924_v43, 0.0  ;;  %v3326_v42 = vmul.f32 %v4924_v43, %v6651_v19  ;;  %4038 = vmatmul.mubr.bf16.gmra.mrb[48].mxu0 %v3553_v0  ;;  %v3513_v49 = vmul.f32 %v3449_v8, %v3385_v22  ;;  %v5742_v0 = vld [vmem:[#allocation9 + $0x1b0] ss:$8 sps:$4 sm:$0xff]   ;;  %v5747_v36 = vld [vmem:[#allocation9 + $0x1c4] ss:$8 sps:$4 sm:$0xff]  }
 0x261   : > { %v3389_v6 = vsel %vm3260_vm6, %v4922_v18, %v3325_v34  ;;  %4095 = vmatpush1.bf16.msra.mxu0 %v5733_v20  ;;  %v3514_v40 = vmul.f32 %v3450_v26, %v3386_v54  ;;  %v2416_v56 = vadd.f32 %v6609_v60, %v6640_v1  ;;  %v2422_v60 = vadd.f32 %v6615_v23, %v6645_v3  ;;  %v5750_v23 = vld [vmem:[#allocation9 + $0x1d4] ss:$8 sps:$4 sm:$0xff]  }
 0x262   : > { %v3390_v15 = vsel %vm3261_vm7, %v4924_v43, %v3326_v42  ;;  %v2744_v41 = vpop.f32.mrb[24].mxu0  ;;  %v3517_v29 = vmul.f32 %v3453_v44, %v3389_v6  ;;  %4096 = vmatprep.subr.bf16.mxu0 %v5738_v31  ;;  %v2420_v43 = vadd.f32 %v6613_v7, %v6640_v1  ;;  %v5745_v7 = vld [vmem:[#allocation9 + $0x1c0] ss:$8 sps:$4 sm:$0xff]  }
 0x263   : > { %v4926_v52 = vadd.f32 %v2744_v41, %v2406_v33  ;;  %v2746_v28 = vpop.f32.mrb[25].mxu0  ;;  %v3518_v2 = vmul.f32 %v3454_v38, %v3390_v15  ;;  %v3469_v15 = vld [vmem:[%s6234_s0 + $0x1e0] sm:$0xff] }
 0x264   : > { %v4928_v25 = vadd.f32 %v2746_v28, %v2408_v63  ;;  %v2748_v53 = vpop.f32.mrb[26].mxu0  ;;  %v3557_v16 = vpack.c.bf16 %v3517_v29, %v3513_v49  ;;  %v3465_v63 = vld [vmem:[%s6234_s0 + $0x1c0] sm:$0xff]  ;;  %v3466_v29 = vld [vmem:[%s6234_s0 + $0x1c8] sm:$0xff] }
 0x265   : > { %vm3264_vm8 = vcmp.gt.f32.partialorder %v4926_v52, 0.0  ;;  %v3329_v11 = vmul.f32 %v4926_v52, %v6651_v19  ;;  %v4930_v12 = vadd.f32 %v2748_v53, %v2410_v10  ;;  %v2750_v4 = vpop.f32.mrb[27].mxu0  ;;  %v3558_v5 = vpack.c.bf16 %v3518_v2, %v3514_v40  ;;  %4097 = vmatpush1.bf16.msra.mxu0 %v5736_v27 }
 0x266   : > { %vm3265_vm9 = vcmp.gt.f32.partialorder %v4928_v25, 0.0  ;;  %v3330_v39 = vmul.f32 %v4928_v25, %v6651_v19  ;;  %v4932_v14 = vadd.f32 %v2750_v4, %v2412_v45  ;;  %4098 = vmatprep.subr.bf16.mxu0 %v5741_v61  ;;  %v3470_v61 = vld [vmem:[%s6234_s0 + $0x1e8] sm:$0xff]  ;;  %v5756_v4 = vld [vmem:[#allocation9 + $0x1f4] ss:$8 sps:$4 sm:$0xff]  }
 0x267   : > { %v3393_v47 = vsel %vm3264_vm8, %v4926_v52, %v3329_v11  ;;  %vm3268_vm10 = vcmp.gt.f32.partialorder %v4930_v12, 0.0  ;;  %v3333_v62 = vmul.f32 %v4930_v12, %v6651_v19  ;;  %4047 = vmatprep.mubr.bf16.mxu0 %v3558_v5  ;;  %v5748_v52 = vld [vmem:[#allocation9 + $0x1d0] ss:$8 sps:$4 sm:$0xff]   ;;  %v5753_v45 = vld [vmem:[#allocation9 + $0x1e4] ss:$8 sps:$4 sm:$0xff]  }
 0x268   : > { %v3394_v17 = vsel %vm3265_vm9, %v4928_v25, %v3330_v39  ;;  %vm3269_vm11 = vcmp.gt.f32.partialorder %v4932_v14, 0.0  ;;  %v3334_v30 = vmul.f32 %v4932_v14, %v6651_v19  ;;  %4048 = vmatmul.mubr.bf16.gmra.mrb[52].mxu0 %v3557_v16  ;;  %v3521_v55 = vmul.f32 %v3457_v32, %v3393_v47  ;;  %v5754_v5 = vld [vmem:[#allocation9 + $0x1f0] ss:$8 sps:$4 sm:$0xff]  }
 0x269   : > { %v3397_v24 = vsel %vm3268_vm10, %v4930_v12, %v3333_v62  ;;  %4099 = vmatpush1.bf16.msra.mxu0 %v5739_v51  ;;  %v3522_v34 = vmul.f32 %v3458_v13, %v3394_v17  ;;  %v5751_v12 = vld [vmem:[#allocation9 + $0x1e0] ss:$8 sps:$4 sm:$0xff]   ;;  %v701_v51 = vsub.s32 2, %v6628_v37  ;;  %v705_v39 = vsub.s32 3, %v6628_v37 }
 0x26a   : > { %v3398_v18 = vsel %vm3269_vm11, %v4932_v14, %v3334_v30  ;;  %v2754_v58 = vpop.f32.mrb[28].mxu0  ;;  %v3525_v20 = vmul.f32 %v3461_v21, %v3397_v24  ;;  %4100 = vmatprep.subr.bf16.mxu0 %v5744_v9 }
 0x26b   : > { %v4934_v31 = vadd.f32 %v2754_v58, %v2416_v56  ;;  %v2756_v22 = vpop.f32.mrb[29].mxu0  ;;  %v3526_v8 = vmul.f32 %v3462_v50, %v3398_v18  ;;  %v6780_v14 = vrot.slane %v6634_v46, %v701_v51  ;;  %v6783_v9 = vrot.slane %v6634_v46, %v705_v39  ;;  %v3415_v18 = vld [vmem:[%s6234_s0 + $0x30] sm:$0xff] }
 0x26c   : > { %v4936_v44 = vadd.f32 %v2756_v22, %v2418_v35  ;;  %v2758_v54 = vpop.f32.mrb[30].mxu0  ;;  %v3561_v42 = vpack.c.bf16 %v3525_v20, %v3521_v55  ;;  %v3412_v20 = vld [vmem:[%s6234_s0 + $0x18] sm:$0xff] }
 0x26d   : > { %vm3272_vm12 = vcmp.gt.f32.partialorder %v4934_v31, 0.0  ;;  %v3337_v59 = vmul.f32 %v4934_v31, %v6651_v19  ;;  %v4938_v26 = vadd.f32 %v2758_v54, %v2420_v43  ;;  %v2760_v38 = vpop.f32.mrb[31].mxu0  ;;  %v3562_v33 = vpack.c.bf16 %v3526_v8, %v3522_v34  ;;  %4101 = vmatpush1.bf16.msra.mxu0 %v5742_v0  ;;  %v3411_v0 = vld [vmem:[%s6234_s0 + $0x10] sm:$0xff] }
 0x26e   : > { %vm3273_vm13 = vcmp.gt.f32.partialorder %v4936_v44, 0.0  ;;  %v3338_v1 = vmul.f32 %v4936_v44, %v6651_v19  ;;  %v4940_v6 = vadd.f32 %v2760_v38, %v2422_v60  ;;  %4102 = vmatprep.subr.bf16.mxu0 %v5747_v36  ;;  %v3416_v36 = vld [vmem:[%s6234_s0 + $0x38] sm:$0xff] }
 0x26f   : > { %v3401_v3 = vsel %vm3272_vm12, %v4934_v31, %v3337_v59  ;;  %vm3276_vm14 = vcmp.gt.f32.partialorder %v4938_v26, 0.0  ;;  %v3341_v27 = vmul.f32 %v4938_v26, %v6651_v19  ;;  %4057 = vmatprep.mubr.bf16.mxu0 %v3562_v33 }
 0x270   : > { %v3402_v41 = vsel %vm3273_vm13, %v4936_v44, %v3338_v1  ;;  %vm3277_vm15 = vcmp.gt.f32.partialorder %v4940_v6, 0.0  ;;  %v3342_v49 = vmul.f32 %v4940_v6, %v6651_v19  ;;  %4058 = vmatmul.mubr.bf16.gmra.mrb[56].mxu0 %v3561_v42  ;;  %v3529_v40 = vmul.f32 %v3465_v63, %v3401_v3 }
 0x271   : > { %v3405_v10 = vsel %vm3276_vm14, %v4938_v26, %v3341_v27  ;;  %4103 = vmatpush1.bf16.msra.mxu0 %v5745_v7  ;;  %v3530_v25 = vmul.f32 %v3466_v29, %v3402_v41  ;;  %v3423_v41 = vld [vmem:[%s6234_s0 + $0x70] sm:$0xff] }
 0x272   : > { %v3406_v28 = vsel %vm3277_vm15, %v4940_v6, %v3342_v49  ;;  %v3533_v2 = vmul.f32 %v3469_v15, %v3405_v10  ;;  %4104 = vmatprep.subr.bf16.mxu0 %v5750_v23  ;;  %v3419_v15 = vld [vmem:[%s6234_s0 + $0x50] sm:$0xff]  ;;  %v3424_v10 = vld [vmem:[%s6234_s0 + $0x78] sm:$0xff] }
 0x273   : > { %v3534_v53 = vmul.f32 %v3470_v61, %v3406_v28  ;;  %v3420_v61 = vld [vmem:[%s6234_s0 + $0x58] sm:$0xff] }
 0x274   : > { %v3565_v16 = vpack.c.bf16 %v3533_v2, %v3529_v40 }
 0x275   : > { %v3566_v11 = vpack.c.bf16 %v3534_v53, %v3530_v25  ;;  %4105 = vmatpush1.bf16.msra.mxu0 %v5748_v52 }
 0x276   : > { %4106 = vmatprep.subr.bf16.mxu0 %v5753_v45 }
 0x277   : > { %4067 = vmatprep.mubr.bf16.mxu0 %v3566_v11 }
 0x278   : > { %4068 = vmatmul.mubr.bf16.gmra.mrb[60].mxu0 %v3565_v16 }
 0x279   : > { %4107 = vmatpush1.bf16.msra.mxu0 %v5751_v12 }
 0x27a   : > { %4108 = vmatprep.subr.bf16.mxu0 %v5756_v4 }
 0x27d   : > { %4109 = vmatpush1.bf16.msra.mxu0 %v5754_v5 }
 0x2b1   : > { %v3136_v47 = vpop.f32.mrb[32].mxu1 }
 0x2b2   : > { %v4941_v62 = vadd.f32 %v3136_v47, %v6780_v14  ;;  %v3138_v32 = vpop.f32.mrb[33].mxu1 }
 0x2b3   : > { %v4942_v21 = vadd.f32 %v3138_v32, %v6783_v9  ;;  %v3140_v17 = vpop.f32.mrb[34].mxu1 }
 0x2b4   : > { %vm3218_vm0 = vcmp.gt.f32.partialorder %v4941_v62, 0.0  ;;  %v3283_v30 = vmul.f32 %v4941_v62, %v6651_v19  ;;  %v4943_v13 = vadd.f32 %v3140_v17, %v6780_v14  ;;  %v3142_v50 = vpop.f32.mrb[35].mxu1 }
 0x2b5   : > { %vm3219_vm1 = vcmp.gt.f32.partialorder %v4942_v21, 0.0  ;;  %v3284_v46 = vmul.f32 %v4942_v21, %v6651_v19  ;;  %v4944_v56 = vadd.f32 %v3142_v50, %v6783_v9  ;;  %v3431_v50 = vld [vmem:[%s6234_s0 + $0xb0] sm:$0xff] }
 0x2b6   : > { %v3347_v24 = vsel %vm3218_vm0, %v4941_v62, %v3283_v30  ;;  %vm3222_vm2 = vcmp.gt.f32.partialorder %v4943_v13, 0.0  ;;  %v3287_v35 = vmul.f32 %v4943_v13, %v6651_v19 }
 0x2b7   : > { %v3348_v58 = vsel %vm3219_vm1, %v4942_v21, %v3284_v46  ;;  %vm3223_vm3 = vcmp.gt.f32.partialorder %v4944_v56, 0.0  ;;  %v3288_v55 = vmul.f32 %v4944_v56, %v6651_v19  ;;  %v3475_v31 = vmul.f32 %v3411_v0, %v3347_v24  ;;  %v3428_v24 = vld [vmem:[%s6234_s0 + $0x98] sm:$0xff] }
 0x2b8   : > { %v3351_v43 = vsel %vm3222_vm2, %v4943_v13, %v3287_v35  ;;  %v3476_v54 = vmul.f32 %v3412_v20, %v3348_v58  ;;  %v3427_v13 = vld [vmem:[%s6234_s0 + $0x90] sm:$0xff]  ;;  %v3432_v0 = vld [vmem:[%s6234_s0 + $0xb8] sm:$0xff] }
 0x2b9   : > { %v3479_v22 = vmul.f32 %v3415_v18, %v3351_v43  ;;  %v3352_v34 = vsel %vm3223_vm3, %v4944_v56, %v3288_v55  ;;  %v3146_v8 = vpop.f32.mrb[36].mxu1 }
 0x2ba   : > { %v4945_v60 = vadd.f32 %v3146_v8, %v6780_v14  ;;  %v3148_v44 = vpop.f32.mrb[37].mxu1  ;;  %v3480_v42 = vmul.f32 %v3416_v36, %v3352_v34 }
 0x2bb   : > { %v3539_v59 = vpack.c.bf16 %v3479_v22, %v3475_v31  ;;  %v4946_v26 = vadd.f32 %v3148_v44, %v6783_v9  ;;  %v3150_v38 = vpop.f32.mrb[38].mxu1 }
 0x2bc   : > { %vm3226_vm4 = vcmp.gt.f32.partialorder %v4945_v60, 0.0  ;;  %v3291_v33 = vmul.f32 %v4945_v60, %v6651_v19  ;;  %v4947_v7 = vadd.f32 %v3150_v38, %v6780_v14  ;;  %v3152_v1 = vpop.f32.mrb[39].mxu1  ;;  %v3540_v6 = vpack.c.bf16 %v3480_v42, %v3476_v54 }
 0x2bd   : > { %vm3227_vm5 = vcmp.gt.f32.partialorder %v4946_v26, 0.0  ;;  %v3292_v23 = vmul.f32 %v4946_v26, %v6651_v19  ;;  %v4948_v3 = vadd.f32 %v3152_v1, %v6783_v9  ;;  %v3435_v1 = vld [vmem:[%s6234_s0 + $0xd0] sm:$0xff] }
 0x2be   : > { %v3355_v27 = vsel %vm3226_vm4, %v4945_v60, %v3291_v33  ;;  %vm3230_vm6 = vcmp.gt.f32.partialorder %v4947_v7, 0.0  ;;  %v3295_v63 = vmul.f32 %v4947_v7, %v6651_v19  ;;  %4110 = vmatprep.mubr.bf16.mxu0 %v3540_v6  ;;  %v3439_v6 = vld [vmem:[%s6234_s0 + $0xf0] sm:$0xff] }
 0x2bf   : > { %v3356_v49 = vsel %vm3227_vm5, %v4946_v26, %v3292_v23  ;;  %vm3231_vm7 = vcmp.gt.f32.partialorder %v4948_v3, 0.0  ;;  %v3296_v29 = vmul.f32 %v4948_v3, %v6651_v19  ;;  %4111 = vmatmul.mubr.bf16.vlgmr.msra.gmra.mrb[32].mxu0 %v3539_v59  ;;  %v3483_v2 = vmul.f32 %v3419_v15, %v3355_v27  ;;  %v3436_v27 = vld [vmem:[%s6234_s0 + $0xd8] sm:$0xff] }
 0x2c0   : > { %v3359_v52 = vsel %vm3230_vm6, %v4947_v7, %v3295_v63  ;;  %v3484_v16 = vmul.f32 %v3420_v61, %v3356_v49  ;;  %v3440_v63 = vld [vmem:[%s6234_s0 + $0xf8] sm:$0xff] }
 0x2c1   : > { %v3360_v28 = vsel %vm3231_vm7, %v4948_v3, %v3296_v29  ;;  %v3156_v40 = vpop.f32.mrb[40].mxu1  ;;  %v3487_v45 = vmul.f32 %v3423_v41, %v3359_v52 }
 0x2c2   : > { %v4949_v25 = vadd.f32 %v3156_v40, %v6780_v14  ;;  %v3158_v53 = vpop.f32.mrb[41].mxu1  ;;  %v3488_v11 = vmul.f32 %v3424_v10, %v3360_v28 }
 0x2c3   : > { %v4950_v12 = vadd.f32 %v3158_v53, %v6783_v9  ;;  %v3160_v4 = vpop.f32.mrb[42].mxu1  ;;  %v3543_v5 = vpack.c.bf16 %v3487_v45, %v3483_v2 }
 0x2c4   : > { %vm3234_vm8 = vcmp.gt.f32.partialorder %v4949_v25, 0.0  ;;  %v3299_v51 = vmul.f32 %v4949_v25, %v6651_v19  ;;  %v4951_v39 = vadd.f32 %v3160_v4, %v6780_v14  ;;  %v3162_v47 = vpop.f32.mrb[43].mxu1  ;;  %v3544_v62 = vpack.c.bf16 %v3488_v11, %v3484_v16 }
 0x2c5   : > { %vm3235_vm9 = vcmp.gt.f32.partialorder %v4950_v12, 0.0  ;;  %v3300_v32 = vmul.f32 %v4950_v12, %v6651_v19  ;;  %v4952_v21 = vadd.f32 %v3162_v47, %v6783_v9  ;;  %v3443_v47 = vld [vmem:[%s6234_s0 + $0x110] sm:$0xff] }
 0x2c6   : > { %v3363_v17 = vsel %vm3234_vm8, %v4949_v25, %v3299_v51  ;;  %vm3238_vm10 = vcmp.gt.f32.partialorder %v4951_v39, 0.0  ;;  %v3303_v30 = vmul.f32 %v4951_v39, %v6651_v19  ;;  %4120 = vmatprep.mubr.bf16.mxu0 %v3544_v62  ;;  %v3447_v62 = vld [vmem:[%s6234_s0 + $0x130] sm:$0xff] }
 0x2c7   : > { %v3364_v46 = vsel %vm3235_vm9, %v4950_v12, %v3300_v32  ;;  %vm3239_vm11 = vcmp.gt.f32.partialorder %v4952_v21, 0.0  ;;  %v3304_v56 = vmul.f32 %v4952_v21, %v6651_v19  ;;  %4121 = vmatmul.mubr.bf16.gmra.mrb[36].mxu0 %v3543_v5  ;;  %v3491_v55 = vmul.f32 %v3427_v13, %v3363_v17  ;;  %v3444_v17 = vld [vmem:[%s6234_s0 + $0x118] sm:$0xff] }
 0x2c8   : > { %v3367_v35 = vsel %vm3238_vm10, %v4951_v39, %v3303_v30  ;;  %v3492_v31 = vmul.f32 %v3428_v24, %v3364_v46  ;;  %v3448_v30 = vld [vmem:[%s6234_s0 + $0x138] sm:$0xff] }
 0x2c9   : > { %v3368_v18 = vsel %vm3239_vm11, %v4952_v21, %v3304_v56  ;;  %v3166_v58 = vpop.f32.mrb[44].mxu1  ;;  %v3495_v20 = vmul.f32 %v3431_v50, %v3367_v35 }
 0x2ca   : > { %v4953_v36 = vadd.f32 %v3166_v58, %v6780_v14  ;;  %v3168_v43 = vpop.f32.mrb[45].mxu1  ;;  %v3496_v22 = vmul.f32 %v3432_v0, %v3368_v18 }
 0x2cb   : > { %v4954_v34 = vadd.f32 %v3168_v43, %v6783_v9  ;;  %v3170_v8 = vpop.f32.mrb[46].mxu1  ;;  %v3547_v60 = vpack.c.bf16 %v3495_v20, %v3491_v55 }
 0x2cc   : > { %vm3242_vm12 = vcmp.gt.f32.partialorder %v4953_v36, 0.0  ;;  %v3307_v44 = vmul.f32 %v4953_v36, %v6651_v19  ;;  %v4955_v54 = vadd.f32 %v3170_v8, %v6780_v14  ;;  %v3172_v42 = vpop.f32.mrb[47].mxu1  ;;  %v3548_v59 = vpack.c.bf16 %v3496_v22, %v3492_v31 }
 0x2cd   : > { %vm3243_vm13 = vcmp.gt.f32.partialorder %v4954_v34, 0.0  ;;  %v3308_v26 = vmul.f32 %v4954_v34, %v6651_v19  ;;  %v4956_v38 = vadd.f32 %v3172_v42, %v6783_v9  ;;  %v3451_v42 = vld [vmem:[%s6234_s0 + $0x150] sm:$0xff] }
 0x2ce   : > { %v3371_v33 = vsel %vm3242_vm12, %v4953_v36, %v3307_v44  ;;  %vm3246_vm14 = vcmp.gt.f32.partialorder %v4955_v54, 0.0  ;;  %v3311_v7 = vmul.f32 %v4955_v54, %v6651_v19  ;;  %4130 = vmatprep.mubr.bf16.mxu0 %v3548_v59  ;;  %v3455_v59 = vld [vmem:[%s6234_s0 + $0x170] sm:$0xff] }
 0x2cf   : > { %v3372_v23 = vsel %vm3243_vm13, %v4954_v34, %v3308_v26  ;;  %vm3247_vm15 = vcmp.gt.f32.partialorder %v4956_v38, 0.0  ;;  %v3312_v3 = vmul.f32 %v4956_v38, %v6651_v19  ;;  %4131 = vmatmul.mubr.bf16.gmra.mrb[40].mxu0 %v3547_v60  ;;  %v3499_v29 = vmul.f32 %v3435_v1, %v3371_v33  ;;  %v3452_v33 = vld [vmem:[%s6234_s0 + $0x158] sm:$0xff] }
 0x2d0   : > { %v3375_v15 = vsel %vm3246_vm14, %v4955_v54, %v3311_v7  ;;  %v3500_v28 = vmul.f32 %v3436_v27, %v3372_v23  ;;  %v3456_v7 = vld [vmem:[%s6234_s0 + $0x178] sm:$0xff] }
 0x2d1   : > { %v3376_v41 = vsel %vm3247_vm15, %v4956_v38, %v3312_v3  ;;  %v3176_v49 = vpop.f32.mrb[48].mxu1  ;;  %v3503_v61 = vmul.f32 %v3439_v6, %v3375_v15 }
 0x2d2   : > { %v4957_v10 = vadd.f32 %v3176_v49, %v6780_v14  ;;  %v3178_v52 = vpop.f32.mrb[49].mxu1  ;;  %v3504_v40 = vmul.f32 %v3440_v63, %v3376_v41 }
 0x2d3   : > { %v4958_v2 = vadd.f32 %v3178_v52, %v6783_v9  ;;  %v3180_v45 = vpop.f32.mrb[50].mxu1  ;;  %v3551_v25 = vpack.c.bf16 %v3503_v61, %v3499_v29 }
 0x2d4   : > { %vm3250_vm0 = vcmp.gt.f32.partialorder %v4957_v10, 0.0  ;;  %v3315_v53 = vmul.f32 %v4957_v10, %v6651_v19  ;;  %v4959_v16 = vadd.f32 %v3180_v45, %v6780_v14  ;;  %v3182_v11 = vpop.f32.mrb[51].mxu1  ;;  %v3552_v12 = vpack.c.bf16 %v3504_v40, %v3500_v28 }
 0x2d5   : > { %vm3251_vm1 = vcmp.gt.f32.partialorder %v4958_v2, 0.0  ;;  %v3316_v4 = vmul.f32 %v4958_v2, %v6651_v19  ;;  %v4960_v5 = vadd.f32 %v3182_v11, %v6783_v9  ;;  %v3459_v11 = vld [vmem:[%s6234_s0 + $0x190] sm:$0xff] }
 0x2d6   : > { %v3379_v51 = vsel %vm3250_vm0, %v4957_v10, %v3315_v53  ;;  %vm3254_vm2 = vcmp.gt.f32.partialorder %v4959_v16, 0.0  ;;  %v3319_v39 = vmul.f32 %v4959_v16, %v6651_v19  ;;  %4140 = vmatprep.mubr.bf16.mxu0 %v3552_v12  ;;  %v3463_v12 = vld [vmem:[%s6234_s0 + $0x1b0] sm:$0xff] }
 0x2d7   : > { %v3380_v32 = vsel %vm3251_vm1, %v4958_v2, %v3316_v4  ;;  %vm3255_vm3 = vcmp.gt.f32.partialorder %v4960_v5, 0.0  ;;  %v3320_v21 = vmul.f32 %v4960_v5, %v6651_v19  ;;  %4141 = vmatmul.mubr.bf16.gmra.mrb[44].mxu0 %v3551_v25  ;;  %v3507_v56 = vmul.f32 %v3443_v47, %v3379_v51  ;;  %v3460_v51 = vld [vmem:[%s6234_s0 + $0x198] sm:$0xff] }
 0x2d8   : > { %v3383_v13 = vsel %vm3254_vm2, %v4959_v16, %v3319_v39  ;;  %v3508_v18 = vmul.f32 %v3444_v17, %v3380_v32  ;;  %v3464_v39 = vld [vmem:[%s6234_s0 + $0x1b8] sm:$0xff] }
 0x2d9   : > { %v3384_v50 = vsel %vm3255_vm3, %v4960_v5, %v3320_v21  ;;  %v3186_v46 = vpop.f32.mrb[52].mxu1  ;;  %v3511_v24 = vmul.f32 %v3447_v62, %v3383_v13 }
 0x2da   : > { %v4961_v0 = vadd.f32 %v3186_v46, %v6780_v14  ;;  %v3188_v35 = vpop.f32.mrb[53].mxu1  ;;  %v3512_v58 = vmul.f32 %v3448_v30, %v3384_v50 }
 0x2db   : > { %v4962_v55 = vadd.f32 %v3188_v35, %v6783_v9  ;;  %v3190_v20 = vpop.f32.mrb[54].mxu1  ;;  %v3555_v36 = vpack.c.bf16 %v3511_v24, %v3507_v56 }
 0x2dc   : > { %vm3258_vm4 = vcmp.gt.f32.partialorder %v4961_v0, 0.0  ;;  %v3323_v43 = vmul.f32 %v4961_v0, %v6651_v19  ;;  %v4963_v31 = vadd.f32 %v3190_v20, %v6780_v14  ;;  %v3192_v22 = vpop.f32.mrb[55].mxu1  ;;  %v3556_v34 = vpack.c.bf16 %v3512_v58, %v3508_v18 }
 0x2dd   : > { %vm3259_vm5 = vcmp.gt.f32.partialorder %v4962_v55, 0.0  ;;  %v3324_v8 = vmul.f32 %v4962_v55, %v6651_v19  ;;  %v4964_v60 = vadd.f32 %v3192_v22, %v6783_v9  ;;  %v3467_v22 = vld [vmem:[%s6234_s0 + $0x1d0] sm:$0xff] }
 0x2de   : > { %v3387_v44 = vsel %vm3258_vm4, %v4961_v0, %v3323_v43  ;;  %vm3262_vm6 = vcmp.gt.f32.partialorder %v4963_v31, 0.0  ;;  %v3327_v54 = vmul.f32 %v4963_v31, %v6651_v19  ;;  %4150 = vmatprep.mubr.bf16.mxu0 %v3556_v34  ;;  %v3471_v34 = vld [vmem:[%s6234_s0 + $0x1f0] sm:$0xff] }
 0x2df   : > { %v3388_v26 = vsel %vm3259_vm5, %v4962_v55, %v3324_v8  ;;  %vm3263_vm7 = vcmp.gt.f32.partialorder %v4964_v60, 0.0  ;;  %v3328_v38 = vmul.f32 %v4964_v60, %v6651_v19  ;;  %4151 = vmatmul.mubr.bf16.gmra.mrb[48].mxu0 %v3555_v36  ;;  %v3515_v3 = vmul.f32 %v3451_v42, %v3387_v44  ;;  %v3472_v44 = vld [vmem:[%s6234_s0 + $0x1f8] sm:$0xff] }
 0x2e0   : > { %v3391_v1 = vsel %vm3262_vm6, %v4963_v31, %v3327_v54  ;;  %v3516_v41 = vmul.f32 %v3452_v33, %v3388_v26 }
 0x2e1   : > { %v3392_v6 = vsel %vm3263_vm7, %v4964_v60, %v3328_v38  ;;  %v3196_v23 = vpop.f32.mrb[56].mxu1  ;;  %v3519_v27 = vmul.f32 %v3455_v59, %v3391_v1  ;;  %v3468_v60 = vld [vmem:[%s6234_s0 + $0x1d8] sm:$0xff]  ;;  %v3633_v1 = vld [vmem:[%s6999_s5] sm:$0x3] }
 0x2e2   : > { %v4965_v63 = vadd.f32 %v3196_v23, %v6780_v14  ;;  %v3198_v15 = vpop.f32.mrb[57].mxu1  ;;  %v3520_v49 = vmul.f32 %v3456_v7, %v3392_v6  ;;  %v6890_v6 = vrot.slane %v3633_v1, %v697_v57 }
 0x2e3   : > { %v4966_v29 = vadd.f32 %v3198_v15, %v6783_v9  ;;  %v3200_v61 = vpop.f32.mrb[58].mxu1  ;;  %v3559_v10 = vpack.c.bf16 %v3519_v27, %v3515_v3 }
 0x2e4   : > { %vm3266_vm8 = vcmp.gt.f32.partialorder %v4965_v63, 0.0  ;;  %v3331_v52 = vmul.f32 %v4965_v63, %v6651_v19  ;;  %v4967_v28 = vadd.f32 %v3200_v61, %v6780_v14  ;;  %v3202_v40 = vpop.f32.mrb[59].mxu1  ;;  %v3560_v2 = vpack.c.bf16 %v3520_v49, %v3516_v41 }
 0x2e5   : > { %vm3267_vm9 = vcmp.gt.f32.partialorder %v4966_v29, 0.0  ;;  %v3332_v45 = vmul.f32 %v4966_v29, %v6651_v19  ;;  %v4968_v25 = vadd.f32 %v3202_v40, %v6783_v9 }
 0x2e6   : > { %v3395_v53 = vsel %vm3266_vm8, %v4965_v63, %v3331_v52  ;;  %vm3270_vm10 = vcmp.gt.f32.partialorder %v4967_v28, 0.0  ;;  %v3335_v16 = vmul.f32 %v4967_v28, %v6651_v19  ;;  %4160 = vmatprep.mubr.bf16.mxu0 %v3560_v2 }
 0x2e7   : > { %v3396_v4 = vsel %vm3267_vm9, %v4966_v29, %v3332_v45  ;;  %vm3271_vm11 = vcmp.gt.f32.partialorder %v4968_v25, 0.0  ;;  %v3336_v5 = vmul.f32 %v4968_v25, %v6651_v19  ;;  %4161 = vmatmul.mubr.bf16.gmra.mrb[52].mxu0 %v3559_v10  ;;  %v3523_v21 = vmul.f32 %v3459_v11, %v3395_v53 }
 0x2e8   : > { %v3399_v47 = vsel %vm3270_vm10, %v4967_v28, %v3335_v16  ;;  %v3524_v50 = vmul.f32 %v3460_v51, %v3396_v4 }
 0x2e9   : > { %v3400_v62 = vsel %vm3271_vm11, %v4968_v25, %v3336_v5  ;;  %v3206_v32 = vpop.f32.mrb[60].mxu1  ;;  %v3527_v17 = vmul.f32 %v3463_v12, %v3399_v47 }
 0x2ea   : > { %v4969_v30 = vadd.f32 %v3206_v32, %v6780_v14  ;;  %v3208_v13 = vpop.f32.mrb[61].mxu1  ;;  %v3528_v46 = vmul.f32 %v3464_v39, %v3400_v62 }
 0x2eb   : > { %v4970_v56 = vadd.f32 %v3208_v13, %v6783_v9  ;;  %v3210_v24 = vpop.f32.mrb[62].mxu1  ;;  %v3563_v0 = vpack.c.bf16 %v3527_v17, %v3523_v21 }
 0x2ec   : > { %vm3274_vm12 = vcmp.gt.f32.partialorder %v4969_v30, 0.0  ;;  %v3339_v35 = vmul.f32 %v4969_v30, %v6651_v19  ;;  %v4971_v18 = vadd.f32 %v3210_v24, %v6780_v14  ;;  %v3212_v58 = vpop.f32.mrb[63].mxu1  ;;  %v3564_v55 = vpack.c.bf16 %v3528_v46, %v3524_v50 }
 0x2ed   : > { %vm3275_vm13 = vcmp.gt.f32.partialorder %v4970_v56, 0.0  ;;  %v3340_v20 = vmul.f32 %v4970_v56, %v6651_v19  ;;  %v4972_v36 = vadd.f32 %v3212_v58, %v6783_v9 }
 0x2ee   : > { %v3403_v43 = vsel %vm3274_vm12, %v4969_v30, %v3339_v35  ;;  %vm3278_vm14 = vcmp.gt.f32.partialorder %v4971_v18, 0.0  ;;  %v3343_v31 = vmul.f32 %v4971_v18, %v6651_v19  ;;  %4170 = vmatprep.mubr.bf16.mxu0 %v3564_v55 }
 0x2ef   : > { %v3404_v8 = vsel %vm3275_vm13, %v4970_v56, %v3340_v20  ;;  %vm3279_vm15 = vcmp.gt.f32.partialorder %v4972_v36, 0.0  ;;  %v3344_v14 = vmul.f32 %v4972_v36, %v6651_v19  ;;  %4171 = vmatmul.mubr.bf16.gmra.mrb[56].mxu0 %v3563_v0  ;;  %v3531_v59 = vmul.f32 %v3467_v22, %v3403_v43 }
 0x2f0   : > { %v3407_v54 = vsel %vm3278_vm14, %v4971_v18, %v3343_v31  ;;  %v3532_v9 = vmul.f32 %v3468_v60, %v3404_v8  ;;  %v6886_v19 = vrot.slane %v3633_v1, %v693_v48 }
 0x2f1   : > { %v3408_v42 = vsel %vm3279_vm15, %v4972_v36, %v3344_v14  ;;  %v3535_v26 = vmul.f32 %v3471_v34, %v3407_v54 }
 0x2f2   : > { %v3536_v38 = vmul.f32 %v3472_v44, %v3408_v42 }
 0x2f3   : > { %v3567_v33 = vpack.c.bf16 %v3535_v26, %v3531_v59 }
 0x2f4   : > { %v3568_v7 = vpack.c.bf16 %v3536_v38, %v3532_v9 }
 0x2f6   : > { %4180 = vmatprep.mubr.bf16.mxu0 %v3568_v7 }
 0x2f7   : > { %4181 = vmatmul.mubr.bf16.gmra.mrb[60].mxu0 %v3567_v33 }
 0x392   : > { %v4112_v23 = vpop.f32.mrb[32].mxu0 }
 0x393   : > { %v4973_v3 = vadd.f32 %v4112_v23, %v6886_v19  ;;  %v4114_v27 = vpop.f32.mrb[33].mxu0 }
 0x394   : > { %v4974_v63 = vadd.f32 %v4114_v27, %v6890_v6  ;;  %v4116_v15 = vpop.f32.mrb[34].mxu0 }
 0x395   : > { %v4975_v41 = vadd.f32 %v4116_v15, %v6886_v19  ;;  %v4118_v49 = vpop.f32.mrb[35].mxu0 }
 0x396   : > { %v4859_v29 = vpack.c.bf16 %v4974_v63, %v4973_v3  ;;  %v4976_v61 = vadd.f32 %v4118_v49, %v6890_v6 }
 0x398   : > { %4287 = vst [vmem:[%s6897_s9] sm:$0xff] %v4859_v29  ;;  %v4860_v37 = vpack.c.bf16 %v4976_v61, %v4975_v41 }
 0x39a   : > { %4288 = vst [vmem:[%s6897_s9 + $0x8] sm:$0xff] %v4860_v37  ;;  %v4122_v48 = vpop.f32.mrb[36].mxu0 }
 0x39b   : > { %v4977_v57 = vadd.f32 %v4122_v48, %v6886_v19  ;;  %v4124_v10 = vpop.f32.mrb[37].mxu0 }
 0x39c   : > { %v4978_v52 = vadd.f32 %v4124_v10, %v6890_v6  ;;  %v4126_v28 = vpop.f32.mrb[38].mxu0 }
 0x39d   : > { %v4979_v40 = vadd.f32 %v4126_v28, %v6886_v19  ;;  %v4128_v2 = vpop.f32.mrb[39].mxu0 }
 0x39e   : > { %v4861_v45 = vpack.c.bf16 %v4978_v52, %v4977_v57  ;;  %v4980_v25 = vadd.f32 %v4128_v2, %v6890_v6 }
 0x3a0   : > { %4289 = vst [vmem:[%s6897_s9 + $0x10] sm:$0xff] %v4861_v45  ;;  %v4862_v53 = vpack.c.bf16 %v4980_v25, %v4979_v40 }
 0x3a2   : > { %4290 = vst [vmem:[%s6897_s9 + $0x18] sm:$0xff] %v4862_v53  ;;  %v4132_v16 = vpop.f32.mrb[40].mxu0 }
 0x3a3   : > { %v4981_v11 = vadd.f32 %v4132_v16, %v6886_v19  ;;  %v4134_v12 = vpop.f32.mrb[41].mxu0 }
 0x3a4   : > { %v4982_v4 = vadd.f32 %v4134_v12, %v6890_v6  ;;  %v4136_v5 = vpop.f32.mrb[42].mxu0 }
 0x3a5   : > { %v4983_v51 = vadd.f32 %v4136_v5, %v6886_v19  ;;  %v4138_v39 = vpop.f32.mrb[43].mxu0 }
 0x3a6   : > { %v4863_v47 = vpack.c.bf16 %v4982_v4, %v4981_v11  ;;  %v4984_v62 = vadd.f32 %v4138_v39, %v6890_v6 }
 0x3a8   : > { %4291 = vst [vmem:[%s6897_s9 + $0x20] sm:$0xff] %v4863_v47  ;;  %v4864_v32 = vpack.c.bf16 %v4984_v62, %v4983_v51 }
 0x3aa   : > { %4292 = vst [vmem:[%s6897_s9 + $0x28] sm:$0xff] %v4864_v32  ;;  %v4142_v21 = vpop.f32.mrb[44].mxu0 }
 0x3ab   : > { %v4985_v17 = vadd.f32 %v4142_v21, %v6886_v19  ;;  %v4144_v30 = vpop.f32.mrb[45].mxu0 }
 0x3ac   : > { %v4986_v13 = vadd.f32 %v4144_v30, %v6890_v6  ;;  %v4146_v50 = vpop.f32.mrb[46].mxu0 }
 0x3ad   : > { %v4987_v46 = vadd.f32 %v4146_v50, %v6886_v19  ;;  %v4148_v56 = vpop.f32.mrb[47].mxu0 }
 0x3ae   : > { %v4865_v24 = vpack.c.bf16 %v4986_v13, %v4985_v17  ;;  %v4988_v0 = vadd.f32 %v4148_v56, %v6890_v6 }
 0x3b0   : > { %4293 = vst [vmem:[%s6897_s9 + $0x30] sm:$0xff] %v4865_v24  ;;  %v4866_v35 = vpack.c.bf16 %v4988_v0, %v4987_v46 }
 0x3b2   : > { %4294 = vst [vmem:[%s6897_s9 + $0x38] sm:$0xff] %v4866_v35  ;;  %v4152_v18 = vpop.f32.mrb[48].mxu0 }
 0x3b3   : > { %v4989_v58 = vadd.f32 %v4152_v18, %v6886_v19  ;;  %v4154_v55 = vpop.f32.mrb[49].mxu0 }
 0x3b4   : > { %v4990_v20 = vadd.f32 %v4154_v55, %v6890_v6  ;;  %v4156_v36 = vpop.f32.mrb[50].mxu0 }
 0x3b5   : > { %v4991_v43 = vadd.f32 %v4156_v36, %v6886_v19  ;;  %v4158_v31 = vpop.f32.mrb[51].mxu0 }
 0x3b6   : > { %v4867_v22 = vpack.c.bf16 %v4990_v20, %v4989_v58  ;;  %v4992_v34 = vadd.f32 %v4158_v31, %v6890_v6 }
 0x3b8   : > { %4295 = vst [vmem:[%s6897_s9 + $0x40] sm:$0xff] %v4867_v22  ;;  %v4868_v8 = vpack.c.bf16 %v4992_v34, %v4991_v43 }
 0x3ba   : > { %4296 = vst [vmem:[%s6897_s9 + $0x48] sm:$0xff] %v4868_v8  ;;  %v4162_v14 = vpop.f32.mrb[52].mxu0 }
 0x3bb   : > { %v4993_v60 = vadd.f32 %v4162_v14, %v6886_v19  ;;  %v4164_v44 = vpop.f32.mrb[53].mxu0 }
 0x3bc   : > { %v4994_v54 = vadd.f32 %v4164_v44, %v6890_v6  ;;  %v4166_v42 = vpop.f32.mrb[54].mxu0 }
 0x3bd   : > { %v4995_v59 = vadd.f32 %v4166_v42, %v6886_v19  ;;  %v4168_v26 = vpop.f32.mrb[55].mxu0 }
 0x3be   : > { %v4869_v9 = vpack.c.bf16 %v4994_v54, %v4993_v60  ;;  %v4996_v38 = vadd.f32 %v4168_v26, %v6890_v6 }
 0x3c0   : > { %4297 = vst [vmem:[%s6897_s9 + $0x50] sm:$0xff] %v4869_v9  ;;  %v4870_v33 = vpack.c.bf16 %v4996_v38, %v4995_v59 }
 0x3c2   : > { %4298 = vst [vmem:[%s6897_s9 + $0x58] sm:$0xff] %v4870_v33  ;;  %v4172_v7 = vpop.f32.mrb[56].mxu0 }
 0x3c3   : > { %v4997_v1 = vadd.f32 %v4172_v7, %v6886_v19  ;;  %v4174_v23 = vpop.f32.mrb[57].mxu0 }
 0x3c4   : > { %v4998_v3 = vadd.f32 %v4174_v23, %v6890_v6  ;;  %v4176_v27 = vpop.f32.mrb[58].mxu0 }
 0x3c5   : > { %v4999_v63 = vadd.f32 %v4176_v27, %v6886_v19  ;;  %v4178_v15 = vpop.f32.mrb[59].mxu0 }
 0x3c6   : > { %v4871_v41 = vpack.c.bf16 %v4998_v3, %v4997_v1  ;;  %v5000_v49 = vadd.f32 %v4178_v15, %v6890_v6 }
 0x3c8   : > { %4299 = vst [vmem:[%s6897_s9 + $0x60] sm:$0xff] %v4871_v41  ;;  %v4872_v29 = vpack.c.bf16 %v5000_v49, %v4999_v63 }
 0x3ca   : > { %4300 = vst [vmem:[%s6897_s9 + $0x68] sm:$0xff] %v4872_v29  ;;  %v4182_v61 = vpop.f32.mrb[60].mxu0 }
 0x3cb   : > { %v5001_v37 = vadd.f32 %v4182_v61, %v6886_v19  ;;  %v4184_v48 = vpop.f32.mrb[61].mxu0 }
 0x3cc   : > { %v5002_v57 = vadd.f32 %v4184_v48, %v6890_v6  ;;  %v4186_v10 = vpop.f32.mrb[62].mxu0 }
 0x3cd   : > { %v5003_v52 = vadd.f32 %v4186_v10, %v6886_v19  ;;  %v4188_v28 = vpop.f32.mrb[63].mxu0 }
 0x3ce   : > { %v4873_v40 = vpack.c.bf16 %v5002_v57, %v5001_v37  ;;  %v5004_v2 = vadd.f32 %v4188_v28, %v6890_v6 }
 0x3d0   : > { %4301 = vst [vmem:[%s6897_s9 + $0x70] sm:$0xff] %v4873_v40  ;;  %v4874_v45 = vpack.c.bf16 %v5004_v2, %v5003_v52 }
 0x3d2   : > { %4302 = vst [vmem:[%s6897_s9 + $0x78] sm:$0xff] %v4874_v45 }
 0x3d3   : > { %5886 = shalt.err (!%p5883_p5)
}
 0x3d4   : > { %s5887_s1 = scalar_lea.hbm %s6946_s23, 2048  ;;  %s5891_s30 = scalar_lea.hbm %s7046_s20, 4096 }
 0x3d5   : > { %p5888_p9 = scmp.ne.s32.totalorder %s6946_s23, %s5887_s1  ;;  %p5892_p1 = scmp.lt.u32.totalorder %s6946_s23, %s7046_s20 }
 0x3d6   : > { %p5893_p6 = scmp.lt.u32.totalorder %s5891_s30, %s5887_s1  ;;  %p5895_p11 = scmp.lt.u32.totalorder %s5887_s1, %s6946_s23 }
 0x3d7   : > { %p5889_p12 = pnand %p5888_p9, %p7047_p3 }
 0x3d8   : > { %p5894_p10 = por %p5893_p6, %p5892_p1 }
 0x3d9   : > { %p5890_p13 = pneg %p5889_p12 }
 0x3da   : > { %p5896_p4 = por %p5895_p11, %p5894_p10 }
 0x3dc   : > { %p5897_p8 = pnand %p5896_p4, %p5890_p13 }
 0x3de   : > { %5900 = shalt.err (!%p5897_p8)
}
 0x3df   : > { %s5964_s10 = smov 128   ;;  %s5965_s11 = smov 8  }
 0x3e0   : > { %5209 = dma.vmem_to_hbm [thread:$0]  (%p7047_p3), %s6948_s25, 2048, %s6946_s23, %s4304_s6, %s5964_s10, %s5964_s10, %s5965_s11  }
 0x3e1 PF: > { %s7048_s17 = sld [smem:[#allocation16_spill]]  ;;  %s7049_s16 = sld [smem:[#allocation18_spill]] }
 0x3e2   : > { %p7051_p0 = scmp.ge.s32.totalorder %s5951_s29, 2 }
 0x3e7   : > { %s4333_s12 = sand.u32 1, %s7048_s17   ;;  %p7050_p7 = scmp.ne.s32.totalorder %s7049_s16, 0 }
 0x3e8   : > { %s4334_s9 = scalar_lea.sflag [#allocation5], %s4333_s12 }
 0x3e9   : > { %p5226_p2 = pnand %p7051_p0, %p7050_p7 }
 0x3eb   : > { %5934 = dma.done.wait (!%p5226_p2), %s4334_s9, 2048  }
 0x3ec   : > { %5936 = vsyncadd (!%p5226_p2), %s4334_s9, 4294965248  ;;  %s7052_s29 = sld [smem:[#allocation19_spill]]  ;;  %s7053_s14 = sld [smem:[#allocation17_spill]] }
 0x3ed   : > { %s7054_s28 = sld [smem:[#allocation20_spill]]  ;;  %s7055_s26 = smov %s5943_s27 }
 0x3f2   : > { %p22_p5 = scmp.ge.s32.totalorder %s7052_s29, 4   ;;  %s7056_s27 = smov %s7053_s14 }
 0x3f4   :  { %24 = sbr.rel (!%p22_p5) target bundleno = 11 (0xb), region = 112 }
 0x3fb   :  { %4339 = vsyncpa [#allocation4], 1 }
 0x3fc   :  { %4341 = vsyncpa [#allocation4 + $0x1], 1 }
 0x3fd   :  { %4342 = vsyncpa [#allocation7], 1 }
 0x3fe   :  { %4343 = vsyncpa [#allocation5], 1 }
 0x3ff   :  { %4345 = vsyncpa [#allocation5 + $0x1], 1 }

</bundles_post_ra>
